<compile_context>
chip_gen: v7x
topology: tpu7x:2x2x1
jax: 0.10.0
libtpu: 0.0.40
codegen_flags: <defaults>
</compile_context>

<pallas_src>
import jax
import jax.numpy as jnp
from jax.experimental import pallas as pl
from jax.experimental.pallas import tpu as pltpu

VOCAB_SIZE = 5000   # matches the PyTorch module's globals
EMBED_SIZE = 100
BATCH = 30          # small demo batch (not a multiple of TILE_B on purpose)
TILE_B = 32         # word pairs per grid step -> demo batch fits in one step
LANES = 128         # embedding dim padded to a full lane width


def glove_loss_kernel(i_ref,     # SMEM (B_pad,)  int32   row ids i
                      k_ref,     # SMEM (B_pad,)  int32   row ids k
                      bu_ref,    # SMEM (V,)      f32     B_u bias table
                      bv_ref,    # SMEM (V,)      f32     B_v bias table
                      x_ref,     # SMEM (B_pad,)  f32     co-occurrence counts
                      wt_ref,    # SMEM (B_pad,)  f32     loss weights
                      w_ref,     # VMEM (V, LANES) f32    resident embedding table
                      out_ref):  # VMEM (1, 1)    f32     total loss (resident)
    t = pl.program_id(0)

    @pl.when(t == 0)
    def _():
        out_ref[...] = jnp.zeros_like(out_ref)

    base = t * TILE_B
    partial = jnp.zeros((1, 1), jnp.float32)

    # Unrolled per-pair loop: two dynamic-row vector loads from the resident
    # table, one (1,128) VPU multiply, one lane reduce (XLU), scalar bias
    # reads from SMEM, log on EUP.  No DMA, no semaphores.
    for r in range(TILE_B):
        i_row = i_ref[base + r]
        k_row = k_ref[base + r]
        wi = w_ref[pl.ds(i_row, 1), :]                        # (1, LANES)
        wk = w_ref[pl.ds(k_row, 1), :]
        # zero-padded lanes are neutral for the dot product
        sim = jnp.sum(wi * wk, axis=1, keepdims=True)         # (1, 1)
        x_v = jnp.full((1, 1), x_ref[base + r], jnp.float32)  # keep log vectorized
        err = sim + bu_ref[i_row] + bv_ref[k_row] - jnp.log(x_v)
        partial = partial + (0.5 * wt_ref[base + r]) * err * err

    out_ref[...] = out_ref[...] + partial


def prepare_params(W, B_u, B_v):
    """One-time parameter prep (hoisted out of the step per perf review)."""
    V, E = W.shape
    assert E <= LANES
    W_pad = jnp.pad(W.astype(jnp.float32), ((0, 0), (0, LANES - E)))
    bu = B_u.reshape(-1).astype(jnp.float32)   # 1-D -> compact SMEM padding
    bv = B_v.reshape(-1).astype(jnp.float32)
    return W_pad, bu, bv


def glove_forward(W_pad, bu, bv, i, k, x_ik, w):
    """Equivalent of GloVeModel.forward(i, k, x_ik, w); returns a scalar loss."""
    V = W_pad.shape[0]
    B = i.shape[0]
    num_tiles = pl.cdiv(B, TILE_B)
    B_pad = num_tiles * TILE_B
    pad = B_pad - B

    # Pad the batch with zero-weight pairs (i=k=0, x=1, w=0 -> zero loss).
    i_idx = jnp.pad(i.astype(jnp.int32), (0, pad))
    k_idx = jnp.pad(k.astype(jnp.int32), (0, pad))
    x_f = jnp.pad(x_ik.astype(jnp.float32), (0, pad), constant_values=1.0)
    w_f = jnp.pad(w.astype(jnp.float32), (0, pad), constant_values=0.0)

    out = pl.pallas_call(
        glove_loss_kernel,
        out_shape=jax.ShapeDtypeStruct((1, 1), jnp.float32),
        grid=(num_tiles,),
        in_specs=[
            pl.BlockSpec(memory_space=pltpu.MemorySpace.SMEM),   # i indices
            pl.BlockSpec(memory_space=pltpu.MemorySpace.SMEM),   # k indices
            pl.BlockSpec(memory_space=pltpu.MemorySpace.SMEM),   # B_u table
            pl.BlockSpec(memory_space=pltpu.MemorySpace.SMEM),   # B_v table
            pl.BlockSpec(memory_space=pltpu.MemorySpace.SMEM),   # x_ik
            pl.BlockSpec(memory_space=pltpu.MemorySpace.SMEM),   # w
            pl.BlockSpec((V, LANES), lambda t: (0, 0)),          # W, VMEM resident
        ],
        out_specs=pl.BlockSpec((1, 1), lambda t: (0, 0)),
        compiler_params=pltpu.CompilerParams(
            # resident (1,1) accumulator across the batch axis => sequential
            dimension_semantics=("arbitrary",),
        ),
    )(i_idx, k_idx, bu, bv, x_f, w_f, W_pad)
    return out[0, 0]


if __name__ == "__main__":
    key = jax.random.PRNGKey(0)
    kW, kBv, kBu, ki, kk_, kx, kw = jax.random.split(key, 7)

    # Same init scheme as the PyTorch module:
    # uniform(-initrange, initrange) with initrange = 0.5 / vocab_size.
    initrange = 0.5 / VOCAB_SIZE
    W = jax.random.uniform(kW, (VOCAB_SIZE, EMBED_SIZE), jnp.float32,
                           -initrange, initrange)
    B_v = jax.random.uniform(kBv, (VOCAB_SIZE, 1), jnp.float32,
                             -initrange, initrange)
    B_u = jax.random.uniform(kBu, (VOCAB_SIZE, 1), jnp.float32,
                             -initrange, initrange)

    # Example inputs: word-pair indices, co-occurrence counts (>= 1), weights.
    i = jax.random.randint(ki, (BATCH,), 0, VOCAB_SIZE, dtype=jnp.int32)
    k = jax.random.randint(kk_, (BATCH,), 0, VOCAB_SIZE, dtype=jnp.int32)
    x_ik = jax.random.randint(kx, (BATCH,), 1, 100, dtype=jnp.int32)
    w = jax.random.uniform(kw, (BATCH,), jnp.float32, 0.0, 1.0)

    # One-time param prep (pad W to 128 lanes, flatten biases) — NOT per step.
    W_pad, bu_flat, bv_flat = jax.block_until_ready(prepare_params(W, B_u, B_v))

    out = jax.block_until_ready(
        jax.jit(glove_forward)(W_pad, bu_flat, bv_flat, i, k, x_ik, w))

    # Pure-JAX reference of the PyTorch forward for a correctness check.
    sim_ref = jnp.sum(W[i] * W[k], axis=1)
    loss_ref = sim_ref + B_u[i, 0] + B_v[k, 0] - jnp.log(x_ik.astype(jnp.float32))
    ref = jnp.sum(0.5 * w * loss_ref * loss_ref)
    assert jnp.allclose(out, ref, rtol=1e-5, atol=1e-6), (out, ref)

    print("KERNEL_OK")
</pallas_src>

<mosaic_0001>
module attributes {stable_mosaic.version = 11 : i64} {
  func.func @glove_loss_kernel(%arg0: i32, %arg1: memref<32xi32, #tpu.memory_space<smem>>, %arg2: memref<32xi32, #tpu.memory_space<smem>>, %arg3: memref<5000xf32, #tpu.memory_space<smem>>, %arg4: memref<5000xf32, #tpu.memory_space<smem>>, %arg5: memref<32xf32, #tpu.memory_space<smem>>, %arg6: memref<32xf32, #tpu.memory_space<smem>>, %arg7: memref<5000x128xf32, #tpu.memory_space<vmem>>, %arg8: memref<1x1xf32, #tpu.memory_space<vmem>>) attributes {dimension_semantics = [#tpu.dimension_semantics<arbitrary>], iteration_bounds = array<i64: 1>, scalar_prefetch = 0 : i64, scratch_operands = 0 : i64, tpu.core_type = #tpu.core_type<tc>, window_params = [{transform_indices = @transform_0, window_bounds = array<i64: 32>}, {transform_indices = @transform_1, window_bounds = array<i64: 32>}, {transform_indices = @transform_2, window_bounds = array<i64: 5000>}, {transform_indices = @transform_3, window_bounds = array<i64: 5000>}, {transform_indices = @transform_4, window_bounds = array<i64: 32>}, {transform_indices = @transform_5, window_bounds = array<i64: 32>}, {pipeline_mode = #tpu.pipeline_mode<synchronous>, transform_indices = @transform_6, window_bounds = array<i64: 5000, 128>}, {pipeline_mode = #tpu.pipeline_mode<synchronous>, transform_indices = @transform_7, window_bounds = array<i64: 1, 1>}]} {
    %c0_i32 = arith.constant 0 : i32
    %0 = arith.cmpi eq, %arg0, %c0_i32 : i32
    %1 = arith.extui %0 : i1 to i32
    %c0_i32_0 = arith.constant 0 : i32
    %2 = arith.cmpi ne, %1, %c0_i32_0 : i32
    scf.if %2 {
      %cst_229 = arith.constant 0.000000e+00 : f32
      %1128 = vector.broadcast %cst_229 : f32 to vector<1x1xf32>
      %c0_230 = arith.constant 0 : index
      %c0_231 = arith.constant 0 : index
      %1129 = vector.load %arg8[%c0_230, %c0_231] : memref<1x1xf32, #tpu.memory_space<vmem>>, vector<1x1xf32>
      tpu.vector_store %arg8[%c0_230, %c0_231], %1128 {strides = array<i32>} : memref<1x1xf32, #tpu.memory_space<vmem>>, vector<1x1xf32>,
    } else {
    }
    %c32_i32 = arith.constant 32 : i32
    %3 = arith.muli %arg0, %c32_i32 : i32
    %cst = arith.constant 0.000000e+00 : f32
    %4 = vector.broadcast %cst : f32 to vector<1x1xf32>
    %c0_i32_1 = arith.constant 0 : i32
    %5 = arith.addi %3, %c0_i32_1 : i32
    %6 = arith.index_cast %5 : i32 to index
    %7 = memref.load %arg1[%6] : memref<32xi32, #tpu.memory_space<smem>>
    %c0_i32_2 = arith.constant 0 : i32
    %8 = arith.addi %3, %c0_i32_2 : i32
    %9 = arith.index_cast %8 : i32 to index
    %10 = memref.load %arg2[%9] : memref<32xi32, #tpu.memory_space<smem>>
    %11 = arith.index_cast %7 : i32 to index
    %c0 = arith.constant 0 : index
    %12 = vector.load %arg7[%11, %c0] : memref<5000x128xf32, #tpu.memory_space<vmem>>, vector<1x128xf32>
    %13 = arith.index_cast %10 : i32 to index
    %c0_3 = arith.constant 0 : index
    %14 = vector.load %arg7[%13, %c0_3] : memref<5000x128xf32, #tpu.memory_space<vmem>>, vector<1x128xf32>
    %15 = arith.mulf %12, %14 : vector<1x128xf32>
    %cst_4 = arith.constant dense<0.000000e+00> : vector<1xf32>
    %16 = vector.multi_reduction <add>, %15, %cst_4 [1] : vector<1x128xf32> to vector<1xf32>
    %17 = vector.shape_cast %16 : vector<1xf32> to vector<1x1xf32>
    %c0_i32_5 = arith.constant 0 : i32
    %18 = arith.addi %3, %c0_i32_5 : i32
    %19 = arith.index_cast %18 : i32 to index
    %20 = memref.load %arg5[%19] : memref<32xf32, #tpu.memory_space<smem>>
    %21 = vector.broadcast %20 : f32 to vector<1x1xf32>
    %22 = arith.index_cast %7 : i32 to index
    %23 = memref.load %arg3[%22] : memref<5000xf32, #tpu.memory_space<smem>>
    %24 = vector.broadcast %23 : f32 to vector<1x1xf32>
    %25 = arith.addf %17, %24 : vector<1x1xf32>
    %26 = arith.index_cast %10 : i32 to index
    %27 = memref.load %arg4[%26] : memref<5000xf32, #tpu.memory_space<smem>>
    %28 = vector.broadcast %27 : f32 to vector<1x1xf32>
    %29 = arith.addf %25, %28 : vector<1x1xf32>
    %30 = math.log %21 : vector<1x1xf32>
    %31 = arith.subf %29, %30 : vector<1x1xf32>
    %c0_i32_6 = arith.constant 0 : i32
    %32 = arith.addi %3, %c0_i32_6 : i32
    %33 = arith.index_cast %32 : i32 to index
    %34 = memref.load %arg6[%33] : memref<32xf32, #tpu.memory_space<smem>>
    %cst_7 = arith.constant 5.000000e-01 : f32
    %35 = arith.mulf %cst_7, %34 : f32
    %36 = vector.broadcast %35 : f32 to vector<1x1xf32>
    %37 = arith.mulf %36, %31 : vector<1x1xf32>
    %38 = arith.mulf %37, %31 : vector<1x1xf32>
    %39 = arith.addf %4, %38 : vector<1x1xf32>
    %c1_i32 = arith.constant 1 : i32
    %40 = arith.addi %3, %c1_i32 : i32
    %41 = arith.index_cast %40 : i32 to index
    %42 = memref.load %arg1[%41] : memref<32xi32, #tpu.memory_space<smem>>
    %c1_i32_8 = arith.constant 1 : i32
    %43 = arith.addi %3, %c1_i32_8 : i32
    %44 = arith.index_cast %43 : i32 to index
    %45 = memref.load %arg2[%44] : memref<32xi32, #tpu.memory_space<smem>>
    %46 = arith.index_cast %42 : i32 to index
    %c0_9 = arith.constant 0 : index
    %47 = vector.load %arg7[%46, %c0_9] : memref<5000x128xf32, #tpu.memory_space<vmem>>, vector<1x128xf32>
    %48 = arith.index_cast %45 : i32 to index
    %c0_10 = arith.constant 0 : index
    %49 = vector.load %arg7[%48, %c0_10] : memref<5000x128xf32, #tpu.memory_space<vmem>>, vector<1x128xf32>
    %50 = arith.mulf %47, %49 : vector<1x128xf32>
    %cst_11 = arith.constant dense<0.000000e+00> : vector<1xf32>
    %51 = vector.multi_reduction <add>, %50, %cst_11 [1] : vector<1x128xf32> to vector<1xf32>
    %52 = vector.shape_cast %51 : vector<1xf32> to vector<1x1xf32>
    %c1_i32_12 = arith.constant 1 : i32
    %53 = arith.addi %3, %c1_i32_12 : i32
    %54 = arith.index_cast %53 : i32 to index
    %55 = memref.load %arg5[%54] : memref<32xf32, #tpu.memory_space<smem>>
    %56 = vector.broadcast %55 : f32 to vector<1x1xf32>
    %57 = arith.index_cast %42 : i32 to index
    %58 = memref.load %arg3[%57] : memref<5000xf32, #tpu.memory_space<smem>>
    %59 = vector.broadcast %58 : f32 to vector<1x1xf32>
    %60 = arith.addf %52, %59 : vector<1x1xf32>
    %61 = arith.index_cast %45 : i32 to index
    %62 = memref.load %arg4[%61] : memref<5000xf32, #tpu.memory_space<smem>>
    %63 = vector.broadcast %62 : f32 to vector<1x1xf32>
    %64 = arith.addf %60, %63 : vector<1x1xf32>
    %65 = math.log %56 : vector<1x1xf32>
    %66 = arith.subf %64, %65 : vector<1x1xf32>
    %c1_i32_13 = arith.constant 1 : i32
    %67 = arith.addi %3, %c1_i32_13 : i32
    %68 = arith.index_cast %67 : i32 to index
    %69 = memref.load %arg6[%68] : memref<32xf32, #tpu.memory_space<smem>>
    %cst_14 = arith.constant 5.000000e-01 : f32
    %70 = arith.mulf %cst_14, %69 : f32
    %71 = vector.broadcast %70 : f32 to vector<1x1xf32>
    %72 = arith.mulf %71, %66 : vector<1x1xf32>
    %73 = arith.mulf %72, %66 : vector<1x1xf32>
    %74 = arith.addf %39, %73 : vector<1x1xf32>
    %c2_i32 = arith.constant 2 : i32
    %75 = arith.addi %3, %c2_i32 : i32
    %76 = arith.index_cast %75 : i32 to index
    %77 = memref.load %arg1[%76] : memref<32xi32, #tpu.memory_space<smem>>
    %c2_i32_15 = arith.constant 2 : i32
    %78 = arith.addi %3, %c2_i32_15 : i32
    %79 = arith.index_cast %78 : i32 to index
    %80 = memref.load %arg2[%79] : memref<32xi32, #tpu.memory_space<smem>>
    %81 = arith.index_cast %77 : i32 to index
    %c0_16 = arith.constant 0 : index
    %82 = vector.load %arg7[%81, %c0_16] : memref<5000x128xf32, #tpu.memory_space<vmem>>, vector<1x128xf32>
    %83 = arith.index_cast %80 : i32 to index
    %c0_17 = arith.constant 0 : index
    %84 = vector.load %arg7[%83, %c0_17] : memref<5000x128xf32, #tpu.memory_space<vmem>>, vector<1x128xf32>
    %85 = arith.mulf %82, %84 : vector<1x128xf32>
    %cst_18 = arith.constant dense<0.000000e+00> : vector<1xf32>
    %86 = vector.multi_reduction <add>, %85, %cst_18 [1] : vector<1x128xf32> to vector<1xf32>
    %87 = vector.shape_cast %86 : vector<1xf32> to vector<1x1xf32>
    %c2_i32_19 = arith.constant 2 : i32
    %88 = arith.addi %3, %c2_i32_19 : i32
    %89 = arith.index_cast %88 : i32 to index
    %90 = memref.load %arg5[%89] : memref<32xf32, #tpu.memory_space<smem>>
    %91 = vector.broadcast %90 : f32 to vector<1x1xf32>
    %92 = arith.index_cast %77 : i32 to index
    %93 = memref.load %arg3[%92] : memref<5000xf32, #tpu.memory_space<smem>>
    %94 = vector.broadcast %93 : f32 to vector<1x1xf32>
    %95 = arith.addf %87, %94 : vector<1x1xf32>
    %96 = arith.index_cast %80 : i32 to index
    %97 = memref.load %arg4[%96] : memref<5000xf32, #tpu.memory_space<smem>>
    %98 = vector.broadcast %97 : f32 to vector<1x1xf32>
    %99 = arith.addf %95, %98 : vector<1x1xf32>
    %100 = math.log %91 : vector<1x1xf32>
    %101 = arith.subf %99, %100 : vector<1x1xf32>
    %c2_i32_20 = arith.constant 2 : i32
    %102 = arith.addi %3, %c2_i32_20 : i32
    %103 = arith.index_cast %102 : i32 to index
    %104 = memref.load %arg6[%103] : memref<32xf32, #tpu.memory_space<smem>>
    %cst_21 = arith.constant 5.000000e-01 : f32
    %105 = arith.mulf %cst_21, %104 : f32
    %106 = vector.broadcast %105 : f32 to vector<1x1xf32>
    %107 = arith.mulf %106, %101 : vector<1x1xf32>
    %108 = arith.mulf %107, %101 : vector<1x1xf32>
    %109 = arith.addf %74, %108 : vector<1x1xf32>
    %c3_i32 = arith.constant 3 : i32
    %110 = arith.addi %3, %c3_i32 : i32
    %111 = arith.index_cast %110 : i32 to index
    %112 = memref.load %arg1[%111] : memref<32xi32, #tpu.memory_space<smem>>
    %c3_i32_22 = arith.constant 3 : i32
    %113 = arith.addi %3, %c3_i32_22 : i32
    %114 = arith.index_cast %113 : i32 to index
    %115 = memref.load %arg2[%114] : memref<32xi32, #tpu.memory_space<smem>>
    %116 = arith.index_cast %112 : i32 to index
    %c0_23 = arith.constant 0 : index
    %117 = vector.load %arg7[%116, %c0_23] : memref<5000x128xf32, #tpu.memory_space<vmem>>, vector<1x128xf32>
    %118 = arith.index_cast %115 : i32 to index
    %c0_24 = arith.constant 0 : index
    %119 = vector.load %arg7[%118, %c0_24] : memref<5000x128xf32, #tpu.memory_space<vmem>>, vector<1x128xf32>
    %120 = arith.mulf %117, %119 : vector<1x128xf32>
    %cst_25 = arith.constant dense<0.000000e+00> : vector<1xf32>
    %121 = vector.multi_reduction <add>, %120, %cst_25 [1] : vector<1x128xf32> to vector<1xf32>
    %122 = vector.shape_cast %121 : vector<1xf32> to vector<1x1xf32>
    %c3_i32_26 = arith.constant 3 : i32
    %123 = arith.addi %3, %c3_i32_26 : i32
    %124 = arith.index_cast %123 : i32 to index
    %125 = memref.load %arg5[%124] : memref<32xf32, #tpu.memory_space<smem>>
    %126 = vector.broadcast %125 : f32 to vector<1x1xf32>
    %127 = arith.index_cast %112 : i32 to index
    %128 = memref.load %arg3[%127] : memref<5000xf32, #tpu.memory_space<smem>>
    %129 = vector.broadcast %128 : f32 to vector<1x1xf32>
    %130 = arith.addf %122, %129 : vector<1x1xf32>
    %131 = arith.index_cast %115 : i32 to index
    %132 = memref.load %arg4[%131] : memref<5000xf32, #tpu.memory_space<smem>>
    %133 = vector.broadcast %132 : f32 to vector<1x1xf32>
    %134 = arith.addf %130, %133 : vector<1x1xf32>
    %135 = math.log %126 : vector<1x1xf32>
    %136 = arith.subf %134, %135 : vector<1x1xf32>
    %c3_i32_27 = arith.constant 3 : i32
    %137 = arith.addi %3, %c3_i32_27 : i32
    %138 = arith.index_cast %137 : i32 to index
    %139 = memref.load %arg6[%138] : memref<32xf32, #tpu.memory_space<smem>>
    %cst_28 = arith.constant 5.000000e-01 : f32
    %140 = arith.mulf %cst_28, %139 : f32
    %141 = vector.broadcast %140 : f32 to vector<1x1xf32>
    %142 = arith.mulf %141, %136 : vector<1x1xf32>
    %143 = arith.mulf %142, %136 : vector<1x1xf32>
    %144 = arith.addf %109, %143 : vector<1x1xf32>
    %c4_i32 = arith.constant 4 : i32
    %145 = arith.addi %3, %c4_i32 : i32
    %146 = arith.index_cast %145 : i32 to index
    %147 = memref.load %arg1[%146] : memref<32xi32, #tpu.memory_space<smem>>
    %c4_i32_29 = arith.constant 4 : i32
    %148 = arith.addi %3, %c4_i32_29 : i32
    %149 = arith.index_cast %148 : i32 to index
    %150 = memref.load %arg2[%149] : memref<32xi32, #tpu.memory_space<smem>>
    %151 = arith.index_cast %147 : i32 to index
    %c0_30 = arith.constant 0 : index
    %152 = vector.load %arg7[%151, %c0_30] : memref<5000x128xf32, #tpu.memory_space<vmem>>, vector<1x128xf32>
    %153 = arith.index_cast %150 : i32 to index
    %c0_31 = arith.constant 0 : index
    %154 = vector.load %arg7[%153, %c0_31] : memref<5000x128xf32, #tpu.memory_space<vmem>>, vector<1x128xf32>
    %155 = arith.mulf %152, %154 : vector<1x128xf32>
    %cst_32 = arith.constant dense<0.000000e+00> : vector<1xf32>
    %156 = vector.multi_reduction <add>, %155, %cst_32 [1] : vector<1x128xf32> to vector<1xf32>
    %157 = vector.shape_cast %156 : vector<1xf32> to vector<1x1xf32>
    %c4_i32_33 = arith.constant 4 : i32
    %158 = arith.addi %3, %c4_i32_33 : i32
    %159 = arith.index_cast %158 : i32 to index
    %160 = memref.load %arg5[%159] : memref<32xf32, #tpu.memory_space<smem>>
    %161 = vector.broadcast %160 : f32 to vector<1x1xf32>
    %162 = arith.index_cast %147 : i32 to index
    %163 = memref.load %arg3[%162] : memref<5000xf32, #tpu.memory_space<smem>>
    %164 = vector.broadcast %163 : f32 to vector<1x1xf32>
    %165 = arith.addf %157, %164 : vector<1x1xf32>
    %166 = arith.index_cast %150 : i32 to index
    %167 = memref.load %arg4[%166] : memref<5000xf32, #tpu.memory_space<smem>>
    %168 = vector.broadcast %167 : f32 to vector<1x1xf32>
    %169 = arith.addf %165, %168 : vector<1x1xf32>
    %170 = math.log %161 : vector<1x1xf32>
    %171 = arith.subf %169, %170 : vector<1x1xf32>
    %c4_i32_34 = arith.constant 4 : i32
    %172 = arith.addi %3, %c4_i32_34 : i32
    %173 = arith.index_cast %172 : i32 to index
    %174 = memref.load %arg6[%173] : memref<32xf32, #tpu.memory_space<smem>>
    %cst_35 = arith.constant 5.000000e-01 : f32
    %175 = arith.mulf %cst_35, %174 : f32
    %176 = vector.broadcast %175 : f32 to vector<1x1xf32>
    %177 = arith.mulf %176, %171 : vector<1x1xf32>
    %178 = arith.mulf %177, %171 : vector<1x1xf32>
    %179 = arith.addf %144, %178 : vector<1x1xf32>
    %c5_i32 = arith.constant 5 : i32
    %180 = arith.addi %3, %c5_i32 : i32
    %181 = arith.index_cast %180 : i32 to index
    %182 = memref.load %arg1[%181] : memref<32xi32, #tpu.memory_space<smem>>
    %c5_i32_36 = arith.constant 5 : i32
    %183 = arith.addi %3, %c5_i32_36 : i32
    %184 = arith.index_cast %183 : i32 to index
    %185 = memref.load %arg2[%184] : memref<32xi32, #tpu.memory_space<smem>>
    %186 = arith.index_cast %182 : i32 to index
    %c0_37 = arith.constant 0 : index
    %187 = vector.load %arg7[%186, %c0_37] : memref<5000x128xf32, #tpu.memory_space<vmem>>, vector<1x128xf32>
    %188 = arith.index_cast %185 : i32 to index
    %c0_38 = arith.constant 0 : index
    %189 = vector.load %arg7[%188, %c0_38] : memref<5000x128xf32, #tpu.memory_space<vmem>>, vector<1x128xf32>
    %190 = arith.mulf %187, %189 : vector<1x128xf32>
    %cst_39 = arith.constant dense<0.000000e+00> : vector<1xf32>
    %191 = vector.multi_reduction <add>, %190, %cst_39 [1] : vector<1x128xf32> to vector<1xf32>
    %192 = vector.shape_cast %191 : vector<1xf32> to vector<1x1xf32>
    %c5_i32_40 = arith.constant 5 : i32
    %193 = arith.addi %3, %c5_i32_40 : i32
    %194 = arith.index_cast %193 : i32 to index
    %195 = memref.load %arg5[%194] : memref<32xf32, #tpu.memory_space<smem>>
    %196 = vector.broadcast %195 : f32 to vector<1x1xf32>
    %197 = arith.index_cast %182 : i32 to index
    %198 = memref.load %arg3[%197] : memref<5000xf32, #tpu.memory_space<smem>>
    %199 = vector.broadcast %198 : f32 to vector<1x1xf32>
    %200 = arith.addf %192, %199 : vector<1x1xf32>
    %201 = arith.index_cast %185 : i32 to index
    %202 = memref.load %arg4[%201] : memref<5000xf32, #tpu.memory_space<smem>>
    %203 = vector.broadcast %202 : f32 to vector<1x1xf32>
    %204 = arith.addf %200, %203 : vector<1x1xf32>
    %205 = math.log %196 : vector<1x1xf32>
    %206 = arith.subf %204, %205 : vector<1x1xf32>
    %c5_i32_41 = arith.constant 5 : i32
    %207 = arith.addi %3, %c5_i32_41 : i32
    %208 = arith.index_cast %207 : i32 to index
    %209 = memref.load %arg6[%208] : memref<32xf32, #tpu.memory_space<smem>>
    %cst_42 = arith.constant 5.000000e-01 : f32
    %210 = arith.mulf %cst_42, %209 : f32
    %211 = vector.broadcast %210 : f32 to vector<1x1xf32>
    %212 = arith.mulf %211, %206 : vector<1x1xf32>
    %213 = arith.mulf %212, %206 : vector<1x1xf32>
    %214 = arith.addf %179, %213 : vector<1x1xf32>
    %c6_i32 = arith.constant 6 : i32
    %215 = arith.addi %3, %c6_i32 : i32
    %216 = arith.index_cast %215 : i32 to index
    %217 = memref.load %arg1[%216] : memref<32xi32, #tpu.memory_space<smem>>
    %c6_i32_43 = arith.constant 6 : i32
    %218 = arith.addi %3, %c6_i32_43 : i32
    %219 = arith.index_cast %218 : i32 to index
    %220 = memref.load %arg2[%219] : memref<32xi32, #tpu.memory_space<smem>>
    %221 = arith.index_cast %217 : i32 to index
    %c0_44 = arith.constant 0 : index
    %222 = vector.load %arg7[%221, %c0_44] : memref<5000x128xf32, #tpu.memory_space<vmem>>, vector<1x128xf32>
    %223 = arith.index_cast %220 : i32 to index
    %c0_45 = arith.constant 0 : index
    %224 = vector.load %arg7[%223, %c0_45] : memref<5000x128xf32, #tpu.memory_space<vmem>>, vector<1x128xf32>
    %225 = arith.mulf %222, %224 : vector<1x128xf32>
    %cst_46 = arith.constant dense<0.000000e+00> : vector<1xf32>
    %226 = vector.multi_reduction <add>, %225, %cst_46 [1] : vector<1x128xf32> to vector<1xf32>
    %227 = vector.shape_cast %226 : vector<1xf32> to vector<1x1xf32>
    %c6_i32_47 = arith.constant 6 : i32
    %228 = arith.addi %3, %c6_i32_47 : i32
    %229 = arith.index_cast %228 : i32 to index
    %230 = memref.load %arg5[%229] : memref<32xf32, #tpu.memory_space<smem>>
    %231 = vector.broadcast %230 : f32 to vector<1x1xf32>
    %232 = arith.index_cast %217 : i32 to index
    %233 = memref.load %arg3[%232] : memref<5000xf32, #tpu.memory_space<smem>>
    %234 = vector.broadcast %233 : f32 to vector<1x1xf32>
    %235 = arith.addf %227, %234 : vector<1x1xf32>
    %236 = arith.index_cast %220 : i32 to index
    %237 = memref.load %arg4[%236] : memref<5000xf32, #tpu.memory_space<smem>>
    %238 = vector.broadcast %237 : f32 to vector<1x1xf32>
    %239 = arith.addf %235, %238 : vector<1x1xf32>
    %240 = math.log %231 : vector<1x1xf32>
    %241 = arith.subf %239, %240 : vector<1x1xf32>
    %c6_i32_48 = arith.constant 6 : i32
    %242 = arith.addi %3, %c6_i32_48 : i32
    %243 = arith.index_cast %242 : i32 to index
    %244 = memref.load %arg6[%243] : memref<32xf32, #tpu.memory_space<smem>>
    %cst_49 = arith.constant 5.000000e-01 : f32
    %245 = arith.mulf %cst_49, %244 : f32
    %246 = vector.broadcast %245 : f32 to vector<1x1xf32>
    %247 = arith.mulf %246, %241 : vector<1x1xf32>
    %248 = arith.mulf %247, %241 : vector<1x1xf32>
    %249 = arith.addf %214, %248 : vector<1x1xf32>
    %c7_i32 = arith.constant 7 : i32
    %250 = arith.addi %3, %c7_i32 : i32
    %251 = arith.index_cast %250 : i32 to index
    %252 = memref.load %arg1[%251] : memref<32xi32, #tpu.memory_space<smem>>
    %c7_i32_50 = arith.constant 7 : i32
    %253 = arith.addi %3, %c7_i32_50 : i32
    %254 = arith.index_cast %253 : i32 to index
    %255 = memref.load %arg2[%254] : memref<32xi32, #tpu.memory_space<smem>>
    %256 = arith.index_cast %252 : i32 to index
    %c0_51 = arith.constant 0 : index
    %257 = vector.load %arg7[%256, %c0_51] : memref<5000x128xf32, #tpu.memory_space<vmem>>, vector<1x128xf32>
    %258 = arith.index_cast %255 : i32 to index
    %c0_52 = arith.constant 0 : index
    %259 = vector.load %arg7[%258, %c0_52] : memref<5000x128xf32, #tpu.memory_space<vmem>>, vector<1x128xf32>
    %260 = arith.mulf %257, %259 : vector<1x128xf32>
    %cst_53 = arith.constant dense<0.000000e+00> : vector<1xf32>
    %261 = vector.multi_reduction <add>, %260, %cst_53 [1] : vector<1x128xf32> to vector<1xf32>
    %262 = vector.shape_cast %261 : vector<1xf32> to vector<1x1xf32>
    %c7_i32_54 = arith.constant 7 : i32
    %263 = arith.addi %3, %c7_i32_54 : i32
    %264 = arith.index_cast %263 : i32 to index
    %265 = memref.load %arg5[%264] : memref<32xf32, #tpu.memory_space<smem>>
    %266 = vector.broadcast %265 : f32 to vector<1x1xf32>
    %267 = arith.index_cast %252 : i32 to index
    %268 = memref.load %arg3[%267] : memref<5000xf32, #tpu.memory_space<smem>>
    %269 = vector.broadcast %268 : f32 to vector<1x1xf32>
    %270 = arith.addf %262, %269 : vector<1x1xf32>
    %271 = arith.index_cast %255 : i32 to index
    %272 = memref.load %arg4[%271] : memref<5000xf32, #tpu.memory_space<smem>>
    %273 = vector.broadcast %272 : f32 to vector<1x1xf32>
    %274 = arith.addf %270, %273 : vector<1x1xf32>
    %275 = math.log %266 : vector<1x1xf32>
    %276 = arith.subf %274, %275 : vector<1x1xf32>
    %c7_i32_55 = arith.constant 7 : i32
    %277 = arith.addi %3, %c7_i32_55 : i32
    %278 = arith.index_cast %277 : i32 to index
    %279 = memref.load %arg6[%278] : memref<32xf32, #tpu.memory_space<smem>>
    %cst_56 = arith.constant 5.000000e-01 : f32
    %280 = arith.mulf %cst_56, %279 : f32
    %281 = vector.broadcast %280 : f32 to vector<1x1xf32>
    %282 = arith.mulf %281, %276 : vector<1x1xf32>
    %283 = arith.mulf %282, %276 : vector<1x1xf32>
    %284 = arith.addf %249, %283 : vector<1x1xf32>
    %c8_i32 = arith.constant 8 : i32
    %285 = arith.addi %3, %c8_i32 : i32
    %286 = arith.index_cast %285 : i32 to index
    %287 = memref.load %arg1[%286] : memref<32xi32, #tpu.memory_space<smem>>
    %c8_i32_57 = arith.constant 8 : i32
    %288 = arith.addi %3, %c8_i32_57 : i32
    %289 = arith.index_cast %288 : i32 to index
    %290 = memref.load %arg2[%289] : memref<32xi32, #tpu.memory_space<smem>>
    %291 = arith.index_cast %287 : i32 to index
    %c0_58 = arith.constant 0 : index
    %292 = vector.load %arg7[%291, %c0_58] : memref<5000x128xf32, #tpu.memory_space<vmem>>, vector<1x128xf32>
    %293 = arith.index_cast %290 : i32 to index
    %c0_59 = arith.constant 0 : index
    %294 = vector.load %arg7[%293, %c0_59] : memref<5000x128xf32, #tpu.memory_space<vmem>>, vector<1x128xf32>
    %295 = arith.mulf %292, %294 : vector<1x128xf32>
    %cst_60 = arith.constant dense<0.000000e+00> : vector<1xf32>
    %296 = vector.multi_reduction <add>, %295, %cst_60 [1] : vector<1x128xf32> to vector<1xf32>
    %297 = vector.shape_cast %296 : vector<1xf32> to vector<1x1xf32>
    %c8_i32_61 = arith.constant 8 : i32
    %298 = arith.addi %3, %c8_i32_61 : i32
    %299 = arith.index_cast %298 : i32 to index
    %300 = memref.load %arg5[%299] : memref<32xf32, #tpu.memory_space<smem>>
    %301 = vector.broadcast %300 : f32 to vector<1x1xf32>
    %302 = arith.index_cast %287 : i32 to index
    %303 = memref.load %arg3[%302] : memref<5000xf32, #tpu.memory_space<smem>>
    %304 = vector.broadcast %303 : f32 to vector<1x1xf32>
    %305 = arith.addf %297, %304 : vector<1x1xf32>
    %306 = arith.index_cast %290 : i32 to index
    %307 = memref.load %arg4[%306] : memref<5000xf32, #tpu.memory_space<smem>>
    %308 = vector.broadcast %307 : f32 to vector<1x1xf32>
    %309 = arith.addf %305, %308 : vector<1x1xf32>
    %310 = math.log %301 : vector<1x1xf32>
    %311 = arith.subf %309, %310 : vector<1x1xf32>
    %c8_i32_62 = arith.constant 8 : i32
    %312 = arith.addi %3, %c8_i32_62 : i32
    %313 = arith.index_cast %312 : i32 to index
    %314 = memref.load %arg6[%313] : memref<32xf32, #tpu.memory_space<smem>>
    %cst_63 = arith.constant 5.000000e-01 : f32
    %315 = arith.mulf %cst_63, %314 : f32
    %316 = vector.broadcast %315 : f32 to vector<1x1xf32>
    %317 = arith.mulf %316, %311 : vector<1x1xf32>
    %318 = arith.mulf %317, %311 : vector<1x1xf32>
    %319 = arith.addf %284, %318 : vector<1x1xf32>
    %c9_i32 = arith.constant 9 : i32
    %320 = arith.addi %3, %c9_i32 : i32
    %321 = arith.index_cast %320 : i32 to index
    %322 = memref.load %arg1[%321] : memref<32xi32, #tpu.memory_space<smem>>
    %c9_i32_64 = arith.constant 9 : i32
    %323 = arith.addi %3, %c9_i32_64 : i32
    %324 = arith.index_cast %323 : i32 to index
    %325 = memref.load %arg2[%324] : memref<32xi32, #tpu.memory_space<smem>>
    %326 = arith.index_cast %322 : i32 to index
    %c0_65 = arith.constant 0 : index
    %327 = vector.load %arg7[%326, %c0_65] : memref<5000x128xf32, #tpu.memory_space<vmem>>, vector<1x128xf32>
    %328 = arith.index_cast %325 : i32 to index
    %c0_66 = arith.constant 0 : index
    %329 = vector.load %arg7[%328, %c0_66] : memref<5000x128xf32, #tpu.memory_space<vmem>>, vector<1x128xf32>
    %330 = arith.mulf %327, %329 : vector<1x128xf32>
    %cst_67 = arith.constant dense<0.000000e+00> : vector<1xf32>
    %331 = vector.multi_reduction <add>, %330, %cst_67 [1] : vector<1x128xf32> to vector<1xf32>
    %332 = vector.shape_cast %331 : vector<1xf32> to vector<1x1xf32>
    %c9_i32_68 = arith.constant 9 : i32
    %333 = arith.addi %3, %c9_i32_68 : i32
    %334 = arith.index_cast %333 : i32 to index
    %335 = memref.load %arg5[%334] : memref<32xf32, #tpu.memory_space<smem>>
    %336 = vector.broadcast %335 : f32 to vector<1x1xf32>
    %337 = arith.index_cast %322 : i32 to index
    %338 = memref.load %arg3[%337] : memref<5000xf32, #tpu.memory_space<smem>>
    %339 = vector.broadcast %338 : f32 to vector<1x1xf32>
    %340 = arith.addf %332, %339 : vector<1x1xf32>
    %341 = arith.index_cast %325 : i32 to index
    %342 = memref.load %arg4[%341] : memref<5000xf32, #tpu.memory_space<smem>>
    %343 = vector.broadcast %342 : f32 to vector<1x1xf32>
    %344 = arith.addf %340, %343 : vector<1x1xf32>
    %345 = math.log %336 : vector<1x1xf32>
    %346 = arith.subf %344, %345 : vector<1x1xf32>
    %c9_i32_69 = arith.constant 9 : i32
    %347 = arith.addi %3, %c9_i32_69 : i32
    %348 = arith.index_cast %347 : i32 to index
    %349 = memref.load %arg6[%348] : memref<32xf32, #tpu.memory_space<smem>>
    %cst_70 = arith.constant 5.000000e-01 : f32
    %350 = arith.mulf %cst_70, %349 : f32
    %351 = vector.broadcast %350 : f32 to vector<1x1xf32>
    %352 = arith.mulf %351, %346 : vector<1x1xf32>
    %353 = arith.mulf %352, %346 : vector<1x1xf32>
    %354 = arith.addf %319, %353 : vector<1x1xf32>
    %c10_i32 = arith.constant 10 : i32
    %355 = arith.addi %3, %c10_i32 : i32
    %356 = arith.index_cast %355 : i32 to index
    %357 = memref.load %arg1[%356] : memref<32xi32, #tpu.memory_space<smem>>
    %c10_i32_71 = arith.constant 10 : i32
    %358 = arith.addi %3, %c10_i32_71 : i32
    %359 = arith.index_cast %358 : i32 to index
    %360 = memref.load %arg2[%359] : memref<32xi32, #tpu.memory_space<smem>>
    %361 = arith.index_cast %357 : i32 to index
    %c0_72 = arith.constant 0 : index
    %362 = vector.load %arg7[%361, %c0_72] : memref<5000x128xf32, #tpu.memory_space<vmem>>, vector<1x128xf32>
    %363 = arith.index_cast %360 : i32 to index
    %c0_73 = arith.constant 0 : index
    %364 = vector.load %arg7[%363, %c0_73] : memref<5000x128xf32, #tpu.memory_space<vmem>>, vector<1x128xf32>
    %365 = arith.mulf %362, %364 : vector<1x128xf32>
    %cst_74 = arith.constant dense<0.000000e+00> : vector<1xf32>
    %366 = vector.multi_reduction <add>, %365, %cst_74 [1] : vector<1x128xf32> to vector<1xf32>
    %367 = vector.shape_cast %366 : vector<1xf32> to vector<1x1xf32>
    %c10_i32_75 = arith.constant 10 : i32
    %368 = arith.addi %3, %c10_i32_75 : i32
    %369 = arith.index_cast %368 : i32 to index
    %370 = memref.load %arg5[%369] : memref<32xf32, #tpu.memory_space<smem>>
    %371 = vector.broadcast %370 : f32 to vector<1x1xf32>
    %372 = arith.index_cast %357 : i32 to index
    %373 = memref.load %arg3[%372] : memref<5000xf32, #tpu.memory_space<smem>>
    %374 = vector.broadcast %373 : f32 to vector<1x1xf32>
    %375 = arith.addf %367, %374 : vector<1x1xf32>
    %376 = arith.index_cast %360 : i32 to index
    %377 = memref.load %arg4[%376] : memref<5000xf32, #tpu.memory_space<smem>>
    %378 = vector.broadcast %377 : f32 to vector<1x1xf32>
    %379 = arith.addf %375, %378 : vector<1x1xf32>
    %380 = math.log %371 : vector<1x1xf32>
    %381 = arith.subf %379, %380 : vector<1x1xf32>
    %c10_i32_76 = arith.constant 10 : i32
    %382 = arith.addi %3, %c10_i32_76 : i32
    %383 = arith.index_cast %382 : i32 to index
    %384 = memref.load %arg6[%383] : memref<32xf32, #tpu.memory_space<smem>>
    %cst_77 = arith.constant 5.000000e-01 : f32
    %385 = arith.mulf %cst_77, %384 : f32
    %386 = vector.broadcast %385 : f32 to vector<1x1xf32>
    %387 = arith.mulf %386, %381 : vector<1x1xf32>
    %388 = arith.mulf %387, %381 : vector<1x1xf32>
    %389 = arith.addf %354, %388 : vector<1x1xf32>
    %c11_i32 = arith.constant 11 : i32
    %390 = arith.addi %3, %c11_i32 : i32
    %391 = arith.index_cast %390 : i32 to index
    %392 = memref.load %arg1[%391] : memref<32xi32, #tpu.memory_space<smem>>
    %c11_i32_78 = arith.constant 11 : i32
    %393 = arith.addi %3, %c11_i32_78 : i32
    %394 = arith.index_cast %393 : i32 to index
    %395 = memref.load %arg2[%394] : memref<32xi32, #tpu.memory_space<smem>>
    %396 = arith.index_cast %392 : i32 to index
    %c0_79 = arith.constant 0 : index
    %397 = vector.load %arg7[%396, %c0_79] : memref<5000x128xf32, #tpu.memory_space<vmem>>, vector<1x128xf32>
    %398 = arith.index_cast %395 : i32 to index
    %c0_80 = arith.constant 0 : index
    %399 = vector.load %arg7[%398, %c0_80] : memref<5000x128xf32, #tpu.memory_space<vmem>>, vector<1x128xf32>
    %400 = arith.mulf %397, %399 : vector<1x128xf32>
    %cst_81 = arith.constant dense<0.000000e+00> : vector<1xf32>
    %401 = vector.multi_reduction <add>, %400, %cst_81 [1] : vector<1x128xf32> to vector<1xf32>
    %402 = vector.shape_cast %401 : vector<1xf32> to vector<1x1xf32>
    %c11_i32_82 = arith.constant 11 : i32
    %403 = arith.addi %3, %c11_i32_82 : i32
    %404 = arith.index_cast %403 : i32 to index
    %405 = memref.load %arg5[%404] : memref<32xf32, #tpu.memory_space<smem>>
    %406 = vector.broadcast %405 : f32 to vector<1x1xf32>
    %407 = arith.index_cast %392 : i32 to index
    %408 = memref.load %arg3[%407] : memref<5000xf32, #tpu.memory_space<smem>>
    %409 = vector.broadcast %408 : f32 to vector<1x1xf32>
    %410 = arith.addf %402, %409 : vector<1x1xf32>
    %411 = arith.index_cast %395 : i32 to index
    %412 = memref.load %arg4[%411] : memref<5000xf32, #tpu.memory_space<smem>>
    %413 = vector.broadcast %412 : f32 to vector<1x1xf32>
    %414 = arith.addf %410, %413 : vector<1x1xf32>
    %415 = math.log %406 : vector<1x1xf32>
    %416 = arith.subf %414, %415 : vector<1x1xf32>
    %c11_i32_83 = arith.constant 11 : i32
    %417 = arith.addi %3, %c11_i32_83 : i32
    %418 = arith.index_cast %417 : i32 to index
    %419 = memref.load %arg6[%418] : memref<32xf32, #tpu.memory_space<smem>>
    %cst_84 = arith.constant 5.000000e-01 : f32
    %420 = arith.mulf %cst_84, %419 : f32
    %421 = vector.broadcast %420 : f32 to vector<1x1xf32>
    %422 = arith.mulf %421, %416 : vector<1x1xf32>
    %423 = arith.mulf %422, %416 : vector<1x1xf32>
    %424 = arith.addf %389, %423 : vector<1x1xf32>
    %c12_i32 = arith.constant 12 : i32
    %425 = arith.addi %3, %c12_i32 : i32
    %426 = arith.index_cast %425 : i32 to index
    %427 = memref.load %arg1[%426] : memref<32xi32, #tpu.memory_space<smem>>
    %c12_i32_85 = arith.constant 12 : i32
    %428 = arith.addi %3, %c12_i32_85 : i32
    %429 = arith.index_cast %428 : i32 to index
    %430 = memref.load %arg2[%429] : memref<32xi32, #tpu.memory_space<smem>>
    %431 = arith.index_cast %427 : i32 to index
    %c0_86 = arith.constant 0 : index
    %432 = vector.load %arg7[%431, %c0_86] : memref<5000x128xf32, #tpu.memory_space<vmem>>, vector<1x128xf32>
    %433 = arith.index_cast %430 : i32 to index
    %c0_87 = arith.constant 0 : index
    %434 = vector.load %arg7[%433, %c0_87] : memref<5000x128xf32, #tpu.memory_space<vmem>>, vector<1x128xf32>
    %435 = arith.mulf %432, %434 : vector<1x128xf32>
    %cst_88 = arith.constant dense<0.000000e+00> : vector<1xf32>
    %436 = vector.multi_reduction <add>, %435, %cst_88 [1] : vector<1x128xf32> to vector<1xf32>
    %437 = vector.shape_cast %436 : vector<1xf32> to vector<1x1xf32>
    %c12_i32_89 = arith.constant 12 : i32
    %438 = arith.addi %3, %c12_i32_89 : i32
    %439 = arith.index_cast %438 : i32 to index
    %440 = memref.load %arg5[%439] : memref<32xf32, #tpu.memory_space<smem>>
    %441 = vector.broadcast %440 : f32 to vector<1x1xf32>
    %442 = arith.index_cast %427 : i32 to index
    %443 = memref.load %arg3[%442] : memref<5000xf32, #tpu.memory_space<smem>>
    %444 = vector.broadcast %443 : f32 to vector<1x1xf32>
    %445 = arith.addf %437, %444 : vector<1x1xf32>
    %446 = arith.index_cast %430 : i32 to index
    %447 = memref.load %arg4[%446] : memref<5000xf32, #tpu.memory_space<smem>>
    %448 = vector.broadcast %447 : f32 to vector<1x1xf32>
    %449 = arith.addf %445, %448 : vector<1x1xf32>
    %450 = math.log %441 : vector<1x1xf32>
    %451 = arith.subf %449, %450 : vector<1x1xf32>
    %c12_i32_90 = arith.constant 12 : i32
    %452 = arith.addi %3, %c12_i32_90 : i32
    %453 = arith.index_cast %452 : i32 to index
    %454 = memref.load %arg6[%453] : memref<32xf32, #tpu.memory_space<smem>>
    %cst_91 = arith.constant 5.000000e-01 : f32
    %455 = arith.mulf %cst_91, %454 : f32
    %456 = vector.broadcast %455 : f32 to vector<1x1xf32>
    %457 = arith.mulf %456, %451 : vector<1x1xf32>
    %458 = arith.mulf %457, %451 : vector<1x1xf32>
    %459 = arith.addf %424, %458 : vector<1x1xf32>
    %c13_i32 = arith.constant 13 : i32
    %460 = arith.addi %3, %c13_i32 : i32
    %461 = arith.index_cast %460 : i32 to index
    %462 = memref.load %arg1[%461] : memref<32xi32, #tpu.memory_space<smem>>
    %c13_i32_92 = arith.constant 13 : i32
    %463 = arith.addi %3, %c13_i32_92 : i32
    %464 = arith.index_cast %463 : i32 to index
    %465 = memref.load %arg2[%464] : memref<32xi32, #tpu.memory_space<smem>>
    %466 = arith.index_cast %462 : i32 to index
    %c0_93 = arith.constant 0 : index
    %467 = vector.load %arg7[%466, %c0_93] : memref<5000x128xf32, #tpu.memory_space<vmem>>, vector<1x128xf32>
    %468 = arith.index_cast %465 : i32 to index
    %c0_94 = arith.constant 0 : index
    %469 = vector.load %arg7[%468, %c0_94] : memref<5000x128xf32, #tpu.memory_space<vmem>>, vector<1x128xf32>
    %470 = arith.mulf %467, %469 : vector<1x128xf32>
    %cst_95 = arith.constant dense<0.000000e+00> : vector<1xf32>
    %471 = vector.multi_reduction <add>, %470, %cst_95 [1] : vector<1x128xf32> to vector<1xf32>
    %472 = vector.shape_cast %471 : vector<1xf32> to vector<1x1xf32>
    %c13_i32_96 = arith.constant 13 : i32
    %473 = arith.addi %3, %c13_i32_96 : i32
    %474 = arith.index_cast %473 : i32 to index
    %475 = memref.load %arg5[%474] : memref<32xf32, #tpu.memory_space<smem>>
    %476 = vector.broadcast %475 : f32 to vector<1x1xf32>
    %477 = arith.index_cast %462 : i32 to index
    %478 = memref.load %arg3[%477] : memref<5000xf32, #tpu.memory_space<smem>>
    %479 = vector.broadcast %478 : f32 to vector<1x1xf32>
    %480 = arith.addf %472, %479 : vector<1x1xf32>
    %481 = arith.index_cast %465 : i32 to index
    %482 = memref.load %arg4[%481] : memref<5000xf32, #tpu.memory_space<smem>>
    %483 = vector.broadcast %482 : f32 to vector<1x1xf32>
    %484 = arith.addf %480, %483 : vector<1x1xf32>
    %485 = math.log %476 : vector<1x1xf32>
    %486 = arith.subf %484, %485 : vector<1x1xf32>
    %c13_i32_97 = arith.constant 13 : i32
    %487 = arith.addi %3, %c13_i32_97 : i32
    %488 = arith.index_cast %487 : i32 to index
    %489 = memref.load %arg6[%488] : memref<32xf32, #tpu.memory_space<smem>>
    %cst_98 = arith.constant 5.000000e-01 : f32
    %490 = arith.mulf %cst_98, %489 : f32
    %491 = vector.broadcast %490 : f32 to vector<1x1xf32>
    %492 = arith.mulf %491, %486 : vector<1x1xf32>
    %493 = arith.mulf %492, %486 : vector<1x1xf32>
    %494 = arith.addf %459, %493 : vector<1x1xf32>
    %c14_i32 = arith.constant 14 : i32
    %495 = arith.addi %3, %c14_i32 : i32
    %496 = arith.index_cast %495 : i32 to index
    %497 = memref.load %arg1[%496] : memref<32xi32, #tpu.memory_space<smem>>
    %c14_i32_99 = arith.constant 14 : i32
    %498 = arith.addi %3, %c14_i32_99 : i32
    %499 = arith.index_cast %498 : i32 to index
    %500 = memref.load %arg2[%499] : memref<32xi32, #tpu.memory_space<smem>>
    %501 = arith.index_cast %497 : i32 to index
    %c0_100 = arith.constant 0 : index
    %502 = vector.load %arg7[%501, %c0_100] : memref<5000x128xf32, #tpu.memory_space<vmem>>, vector<1x128xf32>
    %503 = arith.index_cast %500 : i32 to index
    %c0_101 = arith.constant 0 : index
    %504 = vector.load %arg7[%503, %c0_101] : memref<5000x128xf32, #tpu.memory_space<vmem>>, vector<1x128xf32>
    %505 = arith.mulf %502, %504 : vector<1x128xf32>
    %cst_102 = arith.constant dense<0.000000e+00> : vector<1xf32>
    %506 = vector.multi_reduction <add>, %505, %cst_102 [1] : vector<1x128xf32> to vector<1xf32>
    %507 = vector.shape_cast %506 : vector<1xf32> to vector<1x1xf32>
    %c14_i32_103 = arith.constant 14 : i32
    %508 = arith.addi %3, %c14_i32_103 : i32
    %509 = arith.index_cast %508 : i32 to index
    %510 = memref.load %arg5[%509] : memref<32xf32, #tpu.memory_space<smem>>
    %511 = vector.broadcast %510 : f32 to vector<1x1xf32>
    %512 = arith.index_cast %497 : i32 to index
    %513 = memref.load %arg3[%512] : memref<5000xf32, #tpu.memory_space<smem>>
    %514 = vector.broadcast %513 : f32 to vector<1x1xf32>
    %515 = arith.addf %507, %514 : vector<1x1xf32>
    %516 = arith.index_cast %500 : i32 to index
    %517 = memref.load %arg4[%516] : memref<5000xf32, #tpu.memory_space<smem>>
    %518 = vector.broadcast %517 : f32 to vector<1x1xf32>
    %519 = arith.addf %515, %518 : vector<1x1xf32>
    %520 = math.log %511 : vector<1x1xf32>
    %521 = arith.subf %519, %520 : vector<1x1xf32>
    %c14_i32_104 = arith.constant 14 : i32
    %522 = arith.addi %3, %c14_i32_104 : i32
    %523 = arith.index_cast %522 : i32 to index
    %524 = memref.load %arg6[%523] : memref<32xf32, #tpu.memory_space<smem>>
    %cst_105 = arith.constant 5.000000e-01 : f32
    %525 = arith.mulf %cst_105, %524 : f32
    %526 = vector.broadcast %525 : f32 to vector<1x1xf32>
    %527 = arith.mulf %526, %521 : vector<1x1xf32>
    %528 = arith.mulf %527, %521 : vector<1x1xf32>
    %529 = arith.addf %494, %528 : vector<1x1xf32>
    %c15_i32 = arith.constant 15 : i32
    %530 = arith.addi %3, %c15_i32 : i32
    %531 = arith.index_cast %530 : i32 to index
    %532 = memref.load %arg1[%531] : memref<32xi32, #tpu.memory_space<smem>>
    %c15_i32_106 = arith.constant 15 : i32
    %533 = arith.addi %3, %c15_i32_106 : i32
    %534 = arith.index_cast %533 : i32 to index
    %535 = memref.load %arg2[%534] : memref<32xi32, #tpu.memory_space<smem>>
    %536 = arith.index_cast %532 : i32 to index
    %c0_107 = arith.constant 0 : index
    %537 = vector.load %arg7[%536, %c0_107] : memref<5000x128xf32, #tpu.memory_space<vmem>>, vector<1x128xf32>
    %538 = arith.index_cast %535 : i32 to index
    %c0_108 = arith.constant 0 : index
    %539 = vector.load %arg7[%538, %c0_108] : memref<5000x128xf32, #tpu.memory_space<vmem>>, vector<1x128xf32>
    %540 = arith.mulf %537, %539 : vector<1x128xf32>
    %cst_109 = arith.constant dense<0.000000e+00> : vector<1xf32>
    %541 = vector.multi_reduction <add>, %540, %cst_109 [1] : vector<1x128xf32> to vector<1xf32>
    %542 = vector.shape_cast %541 : vector<1xf32> to vector<1x1xf32>
    %c15_i32_110 = arith.constant 15 : i32
    %543 = arith.addi %3, %c15_i32_110 : i32
    %544 = arith.index_cast %543 : i32 to index
    %545 = memref.load %arg5[%544] : memref<32xf32, #tpu.memory_space<smem>>
    %546 = vector.broadcast %545 : f32 to vector<1x1xf32>
    %547 = arith.index_cast %532 : i32 to index
    %548 = memref.load %arg3[%547] : memref<5000xf32, #tpu.memory_space<smem>>
    %549 = vector.broadcast %548 : f32 to vector<1x1xf32>
    %550 = arith.addf %542, %549 : vector<1x1xf32>
    %551 = arith.index_cast %535 : i32 to index
    %552 = memref.load %arg4[%551] : memref<5000xf32, #tpu.memory_space<smem>>
    %553 = vector.broadcast %552 : f32 to vector<1x1xf32>
    %554 = arith.addf %550, %553 : vector<1x1xf32>
    %555 = math.log %546 : vector<1x1xf32>
    %556 = arith.subf %554, %555 : vector<1x1xf32>
    %c15_i32_111 = arith.constant 15 : i32
    %557 = arith.addi %3, %c15_i32_111 : i32
    %558 = arith.index_cast %557 : i32 to index
    %559 = memref.load %arg6[%558] : memref<32xf32, #tpu.memory_space<smem>>
    %cst_112 = arith.constant 5.000000e-01 : f32
    %560 = arith.mulf %cst_112, %559 : f32
    %561 = vector.broadcast %560 : f32 to vector<1x1xf32>
    %562 = arith.mulf %561, %556 : vector<1x1xf32>
    %563 = arith.mulf %562, %556 : vector<1x1xf32>
    %564 = arith.addf %529, %563 : vector<1x1xf32>
    %c16_i32 = arith.constant 16 : i32
    %565 = arith.addi %3, %c16_i32 : i32
    %566 = arith.index_cast %565 : i32 to index
    %567 = memref.load %arg1[%566] : memref<32xi32, #tpu.memory_space<smem>>
    %c16_i32_113 = arith.constant 16 : i32
    %568 = arith.addi %3, %c16_i32_113 : i32
    %569 = arith.index_cast %568 : i32 to index
    %570 = memref.load %arg2[%569] : memref<32xi32, #tpu.memory_space<smem>>
    %571 = arith.index_cast %567 : i32 to index
    %c0_114 = arith.constant 0 : index
    %572 = vector.load %arg7[%571, %c0_114] : memref<5000x128xf32, #tpu.memory_space<vmem>>, vector<1x128xf32>
    %573 = arith.index_cast %570 : i32 to index
    %c0_115 = arith.constant 0 : index
    %574 = vector.load %arg7[%573, %c0_115] : memref<5000x128xf32, #tpu.memory_space<vmem>>, vector<1x128xf32>
    %575 = arith.mulf %572, %574 : vector<1x128xf32>
    %cst_116 = arith.constant dense<0.000000e+00> : vector<1xf32>
    %576 = vector.multi_reduction <add>, %575, %cst_116 [1] : vector<1x128xf32> to vector<1xf32>
    %577 = vector.shape_cast %576 : vector<1xf32> to vector<1x1xf32>
    %c16_i32_117 = arith.constant 16 : i32
    %578 = arith.addi %3, %c16_i32_117 : i32
    %579 = arith.index_cast %578 : i32 to index
    %580 = memref.load %arg5[%579] : memref<32xf32, #tpu.memory_space<smem>>
    %581 = vector.broadcast %580 : f32 to vector<1x1xf32>
    %582 = arith.index_cast %567 : i32 to index
    %583 = memref.load %arg3[%582] : memref<5000xf32, #tpu.memory_space<smem>>
    %584 = vector.broadcast %583 : f32 to vector<1x1xf32>
    %585 = arith.addf %577, %584 : vector<1x1xf32>
    %586 = arith.index_cast %570 : i32 to index
    %587 = memref.load %arg4[%586] : memref<5000xf32, #tpu.memory_space<smem>>
    %588 = vector.broadcast %587 : f32 to vector<1x1xf32>
    %589 = arith.addf %585, %588 : vector<1x1xf32>
    %590 = math.log %581 : vector<1x1xf32>
    %591 = arith.subf %589, %590 : vector<1x1xf32>
    %c16_i32_118 = arith.constant 16 : i32
    %592 = arith.addi %3, %c16_i32_118 : i32
    %593 = arith.index_cast %592 : i32 to index
    %594 = memref.load %arg6[%593] : memref<32xf32, #tpu.memory_space<smem>>
    %cst_119 = arith.constant 5.000000e-01 : f32
    %595 = arith.mulf %cst_119, %594 : f32
    %596 = vector.broadcast %595 : f32 to vector<1x1xf32>
    %597 = arith.mulf %596, %591 : vector<1x1xf32>
    %598 = arith.mulf %597, %591 : vector<1x1xf32>
    %599 = arith.addf %564, %598 : vector<1x1xf32>
    %c17_i32 = arith.constant 17 : i32
    %600 = arith.addi %3, %c17_i32 : i32
    %601 = arith.index_cast %600 : i32 to index
    %602 = memref.load %arg1[%601] : memref<32xi32, #tpu.memory_space<smem>>
    %c17_i32_120 = arith.constant 17 : i32
    %603 = arith.addi %3, %c17_i32_120 : i32
    %604 = arith.index_cast %603 : i32 to index
    %605 = memref.load %arg2[%604] : memref<32xi32, #tpu.memory_space<smem>>
    %606 = arith.index_cast %602 : i32 to index
    %c0_121 = arith.constant 0 : index
    %607 = vector.load %arg7[%606, %c0_121] : memref<5000x128xf32, #tpu.memory_space<vmem>>, vector<1x128xf32>
    %608 = arith.index_cast %605 : i32 to index
    %c0_122 = arith.constant 0 : index
    %609 = vector.load %arg7[%608, %c0_122] : memref<5000x128xf32, #tpu.memory_space<vmem>>, vector<1x128xf32>
    %610 = arith.mulf %607, %609 : vector<1x128xf32>
    %cst_123 = arith.constant dense<0.000000e+00> : vector<1xf32>
    %611 = vector.multi_reduction <add>, %610, %cst_123 [1] : vector<1x128xf32> to vector<1xf32>
    %612 = vector.shape_cast %611 : vector<1xf32> to vector<1x1xf32>
    %c17_i32_124 = arith.constant 17 : i32
    %613 = arith.addi %3, %c17_i32_124 : i32
    %614 = arith.index_cast %613 : i32 to index
    %615 = memref.load %arg5[%614] : memref<32xf32, #tpu.memory_space<smem>>
    %616 = vector.broadcast %615 : f32 to vector<1x1xf32>
    %617 = arith.index_cast %602 : i32 to index
    %618 = memref.load %arg3[%617] : memref<5000xf32, #tpu.memory_space<smem>>
    %619 = vector.broadcast %618 : f32 to vector<1x1xf32>
    %620 = arith.addf %612, %619 : vector<1x1xf32>
    %621 = arith.index_cast %605 : i32 to index
    %622 = memref.load %arg4[%621] : memref<5000xf32, #tpu.memory_space<smem>>
    %623 = vector.broadcast %622 : f32 to vector<1x1xf32>
    %624 = arith.addf %620, %623 : vector<1x1xf32>
    %625 = math.log %616 : vector<1x1xf32>
    %626 = arith.subf %624, %625 : vector<1x1xf32>
    %c17_i32_125 = arith.constant 17 : i32
    %627 = arith.addi %3, %c17_i32_125 : i32
    %628 = arith.index_cast %627 : i32 to index
    %629 = memref.load %arg6[%628] : memref<32xf32, #tpu.memory_space<smem>>
    %cst_126 = arith.constant 5.000000e-01 : f32
    %630 = arith.mulf %cst_126, %629 : f32
    %631 = vector.broadcast %630 : f32 to vector<1x1xf32>
    %632 = arith.mulf %631, %626 : vector<1x1xf32>
    %633 = arith.mulf %632, %626 : vector<1x1xf32>
    %634 = arith.addf %599, %633 : vector<1x1xf32>
    %c18_i32 = arith.constant 18 : i32
    %635 = arith.addi %3, %c18_i32 : i32
    %636 = arith.index_cast %635 : i32 to index
    %637 = memref.load %arg1[%636] : memref<32xi32, #tpu.memory_space<smem>>
    %c18_i32_127 = arith.constant 18 : i32
    %638 = arith.addi %3, %c18_i32_127 : i32
    %639 = arith.index_cast %638 : i32 to index
    %640 = memref.load %arg2[%639] : memref<32xi32, #tpu.memory_space<smem>>
    %641 = arith.index_cast %637 : i32 to index
    %c0_128 = arith.constant 0 : index
    %642 = vector.load %arg7[%641, %c0_128] : memref<5000x128xf32, #tpu.memory_space<vmem>>, vector<1x128xf32>
    %643 = arith.index_cast %640 : i32 to index
    %c0_129 = arith.constant 0 : index
    %644 = vector.load %arg7[%643, %c0_129] : memref<5000x128xf32, #tpu.memory_space<vmem>>, vector<1x128xf32>
    %645 = arith.mulf %642, %644 : vector<1x128xf32>
    %cst_130 = arith.constant dense<0.000000e+00> : vector<1xf32>
    %646 = vector.multi_reduction <add>, %645, %cst_130 [1] : vector<1x128xf32> to vector<1xf32>
    %647 = vector.shape_cast %646 : vector<1xf32> to vector<1x1xf32>
    %c18_i32_131 = arith.constant 18 : i32
    %648 = arith.addi %3, %c18_i32_131 : i32
    %649 = arith.index_cast %648 : i32 to index
    %650 = memref.load %arg5[%649] : memref<32xf32, #tpu.memory_space<smem>>
    %651 = vector.broadcast %650 : f32 to vector<1x1xf32>
    %652 = arith.index_cast %637 : i32 to index
    %653 = memref.load %arg3[%652] : memref<5000xf32, #tpu.memory_space<smem>>
    %654 = vector.broadcast %653 : f32 to vector<1x1xf32>
    %655 = arith.addf %647, %654 : vector<1x1xf32>
    %656 = arith.index_cast %640 : i32 to index
    %657 = memref.load %arg4[%656] : memref<5000xf32, #tpu.memory_space<smem>>
    %658 = vector.broadcast %657 : f32 to vector<1x1xf32>
    %659 = arith.addf %655, %658 : vector<1x1xf32>
    %660 = math.log %651 : vector<1x1xf32>
    %661 = arith.subf %659, %660 : vector<1x1xf32>
    %c18_i32_132 = arith.constant 18 : i32
    %662 = arith.addi %3, %c18_i32_132 : i32
    %663 = arith.index_cast %662 : i32 to index
    %664 = memref.load %arg6[%663] : memref<32xf32, #tpu.memory_space<smem>>
    %cst_133 = arith.constant 5.000000e-01 : f32
    %665 = arith.mulf %cst_133, %664 : f32
    %666 = vector.broadcast %665 : f32 to vector<1x1xf32>
    %667 = arith.mulf %666, %661 : vector<1x1xf32>
    %668 = arith.mulf %667, %661 : vector<1x1xf32>
    %669 = arith.addf %634, %668 : vector<1x1xf32>
    %c19_i32 = arith.constant 19 : i32
    %670 = arith.addi %3, %c19_i32 : i32
    %671 = arith.index_cast %670 : i32 to index
    %672 = memref.load %arg1[%671] : memref<32xi32, #tpu.memory_space<smem>>
    %c19_i32_134 = arith.constant 19 : i32
    %673 = arith.addi %3, %c19_i32_134 : i32
    %674 = arith.index_cast %673 : i32 to index
    %675 = memref.load %arg2[%674] : memref<32xi32, #tpu.memory_space<smem>>
    %676 = arith.index_cast %672 : i32 to index
    %c0_135 = arith.constant 0 : index
    %677 = vector.load %arg7[%676, %c0_135] : memref<5000x128xf32, #tpu.memory_space<vmem>>, vector<1x128xf32>
    %678 = arith.index_cast %675 : i32 to index
    %c0_136 = arith.constant 0 : index
    %679 = vector.load %arg7[%678, %c0_136] : memref<5000x128xf32, #tpu.memory_space<vmem>>, vector<1x128xf32>
    %680 = arith.mulf %677, %679 : vector<1x128xf32>
    %cst_137 = arith.constant dense<0.000000e+00> : vector<1xf32>
    %681 = vector.multi_reduction <add>, %680, %cst_137 [1] : vector<1x128xf32> to vector<1xf32>
    %682 = vector.shape_cast %681 : vector<1xf32> to vector<1x1xf32>
    %c19_i32_138 = arith.constant 19 : i32
    %683 = arith.addi %3, %c19_i32_138 : i32
    %684 = arith.index_cast %683 : i32 to index
    %685 = memref.load %arg5[%684] : memref<32xf32, #tpu.memory_space<smem>>
    %686 = vector.broadcast %685 : f32 to vector<1x1xf32>
    %687 = arith.index_cast %672 : i32 to index
    %688 = memref.load %arg3[%687] : memref<5000xf32, #tpu.memory_space<smem>>
    %689 = vector.broadcast %688 : f32 to vector<1x1xf32>
    %690 = arith.addf %682, %689 : vector<1x1xf32>
    %691 = arith.index_cast %675 : i32 to index
    %692 = memref.load %arg4[%691] : memref<5000xf32, #tpu.memory_space<smem>>
    %693 = vector.broadcast %692 : f32 to vector<1x1xf32>
    %694 = arith.addf %690, %693 : vector<1x1xf32>
    %695 = math.log %686 : vector<1x1xf32>
    %696 = arith.subf %694, %695 : vector<1x1xf32>
    %c19_i32_139 = arith.constant 19 : i32
    %697 = arith.addi %3, %c19_i32_139 : i32
    %698 = arith.index_cast %697 : i32 to index
    %699 = memref.load %arg6[%698] : memref<32xf32, #tpu.memory_space<smem>>
    %cst_140 = arith.constant 5.000000e-01 : f32
    %700 = arith.mulf %cst_140, %699 : f32
    %701 = vector.broadcast %700 : f32 to vector<1x1xf32>
    %702 = arith.mulf %701, %696 : vector<1x1xf32>
    %703 = arith.mulf %702, %696 : vector<1x1xf32>
    %704 = arith.addf %669, %703 : vector<1x1xf32>
    %c20_i32 = arith.constant 20 : i32
    %705 = arith.addi %3, %c20_i32 : i32
    %706 = arith.index_cast %705 : i32 to index
    %707 = memref.load %arg1[%706] : memref<32xi32, #tpu.memory_space<smem>>
    %c20_i32_141 = arith.constant 20 : i32
    %708 = arith.addi %3, %c20_i32_141 : i32
    %709 = arith.index_cast %708 : i32 to index
    %710 = memref.load %arg2[%709] : memref<32xi32, #tpu.memory_space<smem>>
    %711 = arith.index_cast %707 : i32 to index
    %c0_142 = arith.constant 0 : index
    %712 = vector.load %arg7[%711, %c0_142] : memref<5000x128xf32, #tpu.memory_space<vmem>>, vector<1x128xf32>
    %713 = arith.index_cast %710 : i32 to index
    %c0_143 = arith.constant 0 : index
    %714 = vector.load %arg7[%713, %c0_143] : memref<5000x128xf32, #tpu.memory_space<vmem>>, vector<1x128xf32>
    %715 = arith.mulf %712, %714 : vector<1x128xf32>
    %cst_144 = arith.constant dense<0.000000e+00> : vector<1xf32>
    %716 = vector.multi_reduction <add>, %715, %cst_144 [1] : vector<1x128xf32> to vector<1xf32>
    %717 = vector.shape_cast %716 : vector<1xf32> to vector<1x1xf32>
    %c20_i32_145 = arith.constant 20 : i32
    %718 = arith.addi %3, %c20_i32_145 : i32
    %719 = arith.index_cast %718 : i32 to index
    %720 = memref.load %arg5[%719] : memref<32xf32, #tpu.memory_space<smem>>
    %721 = vector.broadcast %720 : f32 to vector<1x1xf32>
    %722 = arith.index_cast %707 : i32 to index
    %723 = memref.load %arg3[%722] : memref<5000xf32, #tpu.memory_space<smem>>
    %724 = vector.broadcast %723 : f32 to vector<1x1xf32>
    %725 = arith.addf %717, %724 : vector<1x1xf32>
    %726 = arith.index_cast %710 : i32 to index
    %727 = memref.load %arg4[%726] : memref<5000xf32, #tpu.memory_space<smem>>
    %728 = vector.broadcast %727 : f32 to vector<1x1xf32>
    %729 = arith.addf %725, %728 : vector<1x1xf32>
    %730 = math.log %721 : vector<1x1xf32>
    %731 = arith.subf %729, %730 : vector<1x1xf32>
    %c20_i32_146 = arith.constant 20 : i32
    %732 = arith.addi %3, %c20_i32_146 : i32
    %733 = arith.index_cast %732 : i32 to index
    %734 = memref.load %arg6[%733] : memref<32xf32, #tpu.memory_space<smem>>
    %cst_147 = arith.constant 5.000000e-01 : f32
    %735 = arith.mulf %cst_147, %734 : f32
    %736 = vector.broadcast %735 : f32 to vector<1x1xf32>
    %737 = arith.mulf %736, %731 : vector<1x1xf32>
    %738 = arith.mulf %737, %731 : vector<1x1xf32>
    %739 = arith.addf %704, %738 : vector<1x1xf32>
    %c21_i32 = arith.constant 21 : i32
    %740 = arith.addi %3, %c21_i32 : i32
    %741 = arith.index_cast %740 : i32 to index
    %742 = memref.load %arg1[%741] : memref<32xi32, #tpu.memory_space<smem>>
    %c21_i32_148 = arith.constant 21 : i32
    %743 = arith.addi %3, %c21_i32_148 : i32
    %744 = arith.index_cast %743 : i32 to index
    %745 = memref.load %arg2[%744] : memref<32xi32, #tpu.memory_space<smem>>
    %746 = arith.index_cast %742 : i32 to index
    %c0_149 = arith.constant 0 : index
    %747 = vector.load %arg7[%746, %c0_149] : memref<5000x128xf32, #tpu.memory_space<vmem>>, vector<1x128xf32>
    %748 = arith.index_cast %745 : i32 to index
    %c0_150 = arith.constant 0 : index
    %749 = vector.load %arg7[%748, %c0_150] : memref<5000x128xf32, #tpu.memory_space<vmem>>, vector<1x128xf32>
    %750 = arith.mulf %747, %749 : vector<1x128xf32>
    %cst_151 = arith.constant dense<0.000000e+00> : vector<1xf32>
    %751 = vector.multi_reduction <add>, %750, %cst_151 [1] : vector<1x128xf32> to vector<1xf32>
    %752 = vector.shape_cast %751 : vector<1xf32> to vector<1x1xf32>
    %c21_i32_152 = arith.constant 21 : i32
    %753 = arith.addi %3, %c21_i32_152 : i32
    %754 = arith.index_cast %753 : i32 to index
    %755 = memref.load %arg5[%754] : memref<32xf32, #tpu.memory_space<smem>>
    %756 = vector.broadcast %755 : f32 to vector<1x1xf32>
    %757 = arith.index_cast %742 : i32 to index
    %758 = memref.load %arg3[%757] : memref<5000xf32, #tpu.memory_space<smem>>
    %759 = vector.broadcast %758 : f32 to vector<1x1xf32>
    %760 = arith.addf %752, %759 : vector<1x1xf32>
    %761 = arith.index_cast %745 : i32 to index
    %762 = memref.load %arg4[%761] : memref<5000xf32, #tpu.memory_space<smem>>
    %763 = vector.broadcast %762 : f32 to vector<1x1xf32>
    %764 = arith.addf %760, %763 : vector<1x1xf32>
    %765 = math.log %756 : vector<1x1xf32>
    %766 = arith.subf %764, %765 : vector<1x1xf32>
    %c21_i32_153 = arith.constant 21 : i32
    %767 = arith.addi %3, %c21_i32_153 : i32
    %768 = arith.index_cast %767 : i32 to index
    %769 = memref.load %arg6[%768] : memref<32xf32, #tpu.memory_space<smem>>
    %cst_154 = arith.constant 5.000000e-01 : f32
    %770 = arith.mulf %cst_154, %769 : f32
    %771 = vector.broadcast %770 : f32 to vector<1x1xf32>
    %772 = arith.mulf %771, %766 : vector<1x1xf32>
    %773 = arith.mulf %772, %766 : vector<1x1xf32>
    %774 = arith.addf %739, %773 : vector<1x1xf32>
    %c22_i32 = arith.constant 22 : i32
    %775 = arith.addi %3, %c22_i32 : i32
    %776 = arith.index_cast %775 : i32 to index
    %777 = memref.load %arg1[%776] : memref<32xi32, #tpu.memory_space<smem>>
    %c22_i32_155 = arith.constant 22 : i32
    %778 = arith.addi %3, %c22_i32_155 : i32
    %779 = arith.index_cast %778 : i32 to index
    %780 = memref.load %arg2[%779] : memref<32xi32, #tpu.memory_space<smem>>
    %781 = arith.index_cast %777 : i32 to index
    %c0_156 = arith.constant 0 : index
    %782 = vector.load %arg7[%781, %c0_156] : memref<5000x128xf32, #tpu.memory_space<vmem>>, vector<1x128xf32>
    %783 = arith.index_cast %780 : i32 to index
    %c0_157 = arith.constant 0 : index
    %784 = vector.load %arg7[%783, %c0_157] : memref<5000x128xf32, #tpu.memory_space<vmem>>, vector<1x128xf32>
    %785 = arith.mulf %782, %784 : vector<1x128xf32>
    %cst_158 = arith.constant dense<0.000000e+00> : vector<1xf32>
    %786 = vector.multi_reduction <add>, %785, %cst_158 [1] : vector<1x128xf32> to vector<1xf32>
    %787 = vector.shape_cast %786 : vector<1xf32> to vector<1x1xf32>
    %c22_i32_159 = arith.constant 22 : i32
    %788 = arith.addi %3, %c22_i32_159 : i32
    %789 = arith.index_cast %788 : i32 to index
    %790 = memref.load %arg5[%789] : memref<32xf32, #tpu.memory_space<smem>>
    %791 = vector.broadcast %790 : f32 to vector<1x1xf32>
    %792 = arith.index_cast %777 : i32 to index
    %793 = memref.load %arg3[%792] : memref<5000xf32, #tpu.memory_space<smem>>
    %794 = vector.broadcast %793 : f32 to vector<1x1xf32>
    %795 = arith.addf %787, %794 : vector<1x1xf32>
    %796 = arith.index_cast %780 : i32 to index
    %797 = memref.load %arg4[%796] : memref<5000xf32, #tpu.memory_space<smem>>
    %798 = vector.broadcast %797 : f32 to vector<1x1xf32>
    %799 = arith.addf %795, %798 : vector<1x1xf32>
    %800 = math.log %791 : vector<1x1xf32>
    %801 = arith.subf %799, %800 : vector<1x1xf32>
    %c22_i32_160 = arith.constant 22 : i32
    %802 = arith.addi %3, %c22_i32_160 : i32
    %803 = arith.index_cast %802 : i32 to index
    %804 = memref.load %arg6[%803] : memref<32xf32, #tpu.memory_space<smem>>
    %cst_161 = arith.constant 5.000000e-01 : f32
    %805 = arith.mulf %cst_161, %804 : f32
    %806 = vector.broadcast %805 : f32 to vector<1x1xf32>
    %807 = arith.mulf %806, %801 : vector<1x1xf32>
    %808 = arith.mulf %807, %801 : vector<1x1xf32>
    %809 = arith.addf %774, %808 : vector<1x1xf32>
    %c23_i32 = arith.constant 23 : i32
    %810 = arith.addi %3, %c23_i32 : i32
    %811 = arith.index_cast %810 : i32 to index
    %812 = memref.load %arg1[%811] : memref<32xi32, #tpu.memory_space<smem>>
    %c23_i32_162 = arith.constant 23 : i32
    %813 = arith.addi %3, %c23_i32_162 : i32
    %814 = arith.index_cast %813 : i32 to index
    %815 = memref.load %arg2[%814] : memref<32xi32, #tpu.memory_space<smem>>
    %816 = arith.index_cast %812 : i32 to index
    %c0_163 = arith.constant 0 : index
    %817 = vector.load %arg7[%816, %c0_163] : memref<5000x128xf32, #tpu.memory_space<vmem>>, vector<1x128xf32>
    %818 = arith.index_cast %815 : i32 to index
    %c0_164 = arith.constant 0 : index
    %819 = vector.load %arg7[%818, %c0_164] : memref<5000x128xf32, #tpu.memory_space<vmem>>, vector<1x128xf32>
    %820 = arith.mulf %817, %819 : vector<1x128xf32>
    %cst_165 = arith.constant dense<0.000000e+00> : vector<1xf32>
    %821 = vector.multi_reduction <add>, %820, %cst_165 [1] : vector<1x128xf32> to vector<1xf32>
    %822 = vector.shape_cast %821 : vector<1xf32> to vector<1x1xf32>
    %c23_i32_166 = arith.constant 23 : i32
    %823 = arith.addi %3, %c23_i32_166 : i32
    %824 = arith.index_cast %823 : i32 to index
    %825 = memref.load %arg5[%824] : memref<32xf32, #tpu.memory_space<smem>>
    %826 = vector.broadcast %825 : f32 to vector<1x1xf32>
    %827 = arith.index_cast %812 : i32 to index
    %828 = memref.load %arg3[%827] : memref<5000xf32, #tpu.memory_space<smem>>
    %829 = vector.broadcast %828 : f32 to vector<1x1xf32>
    %830 = arith.addf %822, %829 : vector<1x1xf32>
    %831 = arith.index_cast %815 : i32 to index
    %832 = memref.load %arg4[%831] : memref<5000xf32, #tpu.memory_space<smem>>
    %833 = vector.broadcast %832 : f32 to vector<1x1xf32>
    %834 = arith.addf %830, %833 : vector<1x1xf32>
    %835 = math.log %826 : vector<1x1xf32>
    %836 = arith.subf %834, %835 : vector<1x1xf32>
    %c23_i32_167 = arith.constant 23 : i32
    %837 = arith.addi %3, %c23_i32_167 : i32
    %838 = arith.index_cast %837 : i32 to index
    %839 = memref.load %arg6[%838] : memref<32xf32, #tpu.memory_space<smem>>
    %cst_168 = arith.constant 5.000000e-01 : f32
    %840 = arith.mulf %cst_168, %839 : f32
    %841 = vector.broadcast %840 : f32 to vector<1x1xf32>
    %842 = arith.mulf %841, %836 : vector<1x1xf32>
    %843 = arith.mulf %842, %836 : vector<1x1xf32>
    %844 = arith.addf %809, %843 : vector<1x1xf32>
    %c24_i32 = arith.constant 24 : i32
    %845 = arith.addi %3, %c24_i32 : i32
    %846 = arith.index_cast %845 : i32 to index
    %847 = memref.load %arg1[%846] : memref<32xi32, #tpu.memory_space<smem>>
    %c24_i32_169 = arith.constant 24 : i32
    %848 = arith.addi %3, %c24_i32_169 : i32
    %849 = arith.index_cast %848 : i32 to index
    %850 = memref.load %arg2[%849] : memref<32xi32, #tpu.memory_space<smem>>
    %851 = arith.index_cast %847 : i32 to index
    %c0_170 = arith.constant 0 : index
    %852 = vector.load %arg7[%851, %c0_170] : memref<5000x128xf32, #tpu.memory_space<vmem>>, vector<1x128xf32>
    %853 = arith.index_cast %850 : i32 to index
    %c0_171 = arith.constant 0 : index
    %854 = vector.load %arg7[%853, %c0_171] : memref<5000x128xf32, #tpu.memory_space<vmem>>, vector<1x128xf32>
    %855 = arith.mulf %852, %854 : vector<1x128xf32>
    %cst_172 = arith.constant dense<0.000000e+00> : vector<1xf32>
    %856 = vector.multi_reduction <add>, %855, %cst_172 [1] : vector<1x128xf32> to vector<1xf32>
    %857 = vector.shape_cast %856 : vector<1xf32> to vector<1x1xf32>
    %c24_i32_173 = arith.constant 24 : i32
    %858 = arith.addi %3, %c24_i32_173 : i32
    %859 = arith.index_cast %858 : i32 to index
    %860 = memref.load %arg5[%859] : memref<32xf32, #tpu.memory_space<smem>>
    %861 = vector.broadcast %860 : f32 to vector<1x1xf32>
    %862 = arith.index_cast %847 : i32 to index
    %863 = memref.load %arg3[%862] : memref<5000xf32, #tpu.memory_space<smem>>
    %864 = vector.broadcast %863 : f32 to vector<1x1xf32>
    %865 = arith.addf %857, %864 : vector<1x1xf32>
    %866 = arith.index_cast %850 : i32 to index
    %867 = memref.load %arg4[%866] : memref<5000xf32, #tpu.memory_space<smem>>
    %868 = vector.broadcast %867 : f32 to vector<1x1xf32>
    %869 = arith.addf %865, %868 : vector<1x1xf32>
    %870 = math.log %861 : vector<1x1xf32>
    %871 = arith.subf %869, %870 : vector<1x1xf32>
    %c24_i32_174 = arith.constant 24 : i32
    %872 = arith.addi %3, %c24_i32_174 : i32
    %873 = arith.index_cast %872 : i32 to index
    %874 = memref.load %arg6[%873] : memref<32xf32, #tpu.memory_space<smem>>
    %cst_175 = arith.constant 5.000000e-01 : f32
    %875 = arith.mulf %cst_175, %874 : f32
    %876 = vector.broadcast %875 : f32 to vector<1x1xf32>
    %877 = arith.mulf %876, %871 : vector<1x1xf32>
    %878 = arith.mulf %877, %871 : vector<1x1xf32>
    %879 = arith.addf %844, %878 : vector<1x1xf32>
    %c25_i32 = arith.constant 25 : i32
    %880 = arith.addi %3, %c25_i32 : i32
    %881 = arith.index_cast %880 : i32 to index
    %882 = memref.load %arg1[%881] : memref<32xi32, #tpu.memory_space<smem>>
    %c25_i32_176 = arith.constant 25 : i32
    %883 = arith.addi %3, %c25_i32_176 : i32
    %884 = arith.index_cast %883 : i32 to index
    %885 = memref.load %arg2[%884] : memref<32xi32, #tpu.memory_space<smem>>
    %886 = arith.index_cast %882 : i32 to index
    %c0_177 = arith.constant 0 : index
    %887 = vector.load %arg7[%886, %c0_177] : memref<5000x128xf32, #tpu.memory_space<vmem>>, vector<1x128xf32>
    %888 = arith.index_cast %885 : i32 to index
    %c0_178 = arith.constant 0 : index
    %889 = vector.load %arg7[%888, %c0_178] : memref<5000x128xf32, #tpu.memory_space<vmem>>, vector<1x128xf32>
    %890 = arith.mulf %887, %889 : vector<1x128xf32>
    %cst_179 = arith.constant dense<0.000000e+00> : vector<1xf32>
    %891 = vector.multi_reduction <add>, %890, %cst_179 [1] : vector<1x128xf32> to vector<1xf32>
    %892 = vector.shape_cast %891 : vector<1xf32> to vector<1x1xf32>
    %c25_i32_180 = arith.constant 25 : i32
    %893 = arith.addi %3, %c25_i32_180 : i32
    %894 = arith.index_cast %893 : i32 to index
    %895 = memref.load %arg5[%894] : memref<32xf32, #tpu.memory_space<smem>>
    %896 = vector.broadcast %895 : f32 to vector<1x1xf32>
    %897 = arith.index_cast %882 : i32 to index
    %898 = memref.load %arg3[%897] : memref<5000xf32, #tpu.memory_space<smem>>
    %899 = vector.broadcast %898 : f32 to vector<1x1xf32>
    %900 = arith.addf %892, %899 : vector<1x1xf32>
    %901 = arith.index_cast %885 : i32 to index
    %902 = memref.load %arg4[%901] : memref<5000xf32, #tpu.memory_space<smem>>
    %903 = vector.broadcast %902 : f32 to vector<1x1xf32>
    %904 = arith.addf %900, %903 : vector<1x1xf32>
    %905 = math.log %896 : vector<1x1xf32>
    %906 = arith.subf %904, %905 : vector<1x1xf32>
    %c25_i32_181 = arith.constant 25 : i32
    %907 = arith.addi %3, %c25_i32_181 : i32
    %908 = arith.index_cast %907 : i32 to index
    %909 = memref.load %arg6[%908] : memref<32xf32, #tpu.memory_space<smem>>
    %cst_182 = arith.constant 5.000000e-01 : f32
    %910 = arith.mulf %cst_182, %909 : f32
    %911 = vector.broadcast %910 : f32 to vector<1x1xf32>
    %912 = arith.mulf %911, %906 : vector<1x1xf32>
    %913 = arith.mulf %912, %906 : vector<1x1xf32>
    %914 = arith.addf %879, %913 : vector<1x1xf32>
    %c26_i32 = arith.constant 26 : i32
    %915 = arith.addi %3, %c26_i32 : i32
    %916 = arith.index_cast %915 : i32 to index
    %917 = memref.load %arg1[%916] : memref<32xi32, #tpu.memory_space<smem>>
    %c26_i32_183 = arith.constant 26 : i32
    %918 = arith.addi %3, %c26_i32_183 : i32
    %919 = arith.index_cast %918 : i32 to index
    %920 = memref.load %arg2[%919] : memref<32xi32, #tpu.memory_space<smem>>
    %921 = arith.index_cast %917 : i32 to index
    %c0_184 = arith.constant 0 : index
    %922 = vector.load %arg7[%921, %c0_184] : memref<5000x128xf32, #tpu.memory_space<vmem>>, vector<1x128xf32>
    %923 = arith.index_cast %920 : i32 to index
    %c0_185 = arith.constant 0 : index
    %924 = vector.load %arg7[%923, %c0_185] : memref<5000x128xf32, #tpu.memory_space<vmem>>, vector<1x128xf32>
    %925 = arith.mulf %922, %924 : vector<1x128xf32>
    %cst_186 = arith.constant dense<0.000000e+00> : vector<1xf32>
    %926 = vector.multi_reduction <add>, %925, %cst_186 [1] : vector<1x128xf32> to vector<1xf32>
    %927 = vector.shape_cast %926 : vector<1xf32> to vector<1x1xf32>
    %c26_i32_187 = arith.constant 26 : i32
    %928 = arith.addi %3, %c26_i32_187 : i32
    %929 = arith.index_cast %928 : i32 to index
    %930 = memref.load %arg5[%929] : memref<32xf32, #tpu.memory_space<smem>>
    %931 = vector.broadcast %930 : f32 to vector<1x1xf32>
    %932 = arith.index_cast %917 : i32 to index
    %933 = memref.load %arg3[%932] : memref<5000xf32, #tpu.memory_space<smem>>
    %934 = vector.broadcast %933 : f32 to vector<1x1xf32>
    %935 = arith.addf %927, %934 : vector<1x1xf32>
    %936 = arith.index_cast %920 : i32 to index
    %937 = memref.load %arg4[%936] : memref<5000xf32, #tpu.memory_space<smem>>
    %938 = vector.broadcast %937 : f32 to vector<1x1xf32>
    %939 = arith.addf %935, %938 : vector<1x1xf32>
    %940 = math.log %931 : vector<1x1xf32>
    %941 = arith.subf %939, %940 : vector<1x1xf32>
    %c26_i32_188 = arith.constant 26 : i32
    %942 = arith.addi %3, %c26_i32_188 : i32
    %943 = arith.index_cast %942 : i32 to index
    %944 = memref.load %arg6[%943] : memref<32xf32, #tpu.memory_space<smem>>
    %cst_189 = arith.constant 5.000000e-01 : f32
    %945 = arith.mulf %cst_189, %944 : f32
    %946 = vector.broadcast %945 : f32 to vector<1x1xf32>
    %947 = arith.mulf %946, %941 : vector<1x1xf32>
    %948 = arith.mulf %947, %941 : vector<1x1xf32>
    %949 = arith.addf %914, %948 : vector<1x1xf32>
    %c27_i32 = arith.constant 27 : i32
    %950 = arith.addi %3, %c27_i32 : i32
    %951 = arith.index_cast %950 : i32 to index
    %952 = memref.load %arg1[%951] : memref<32xi32, #tpu.memory_space<smem>>
    %c27_i32_190 = arith.constant 27 : i32
    %953 = arith.addi %3, %c27_i32_190 : i32
    %954 = arith.index_cast %953 : i32 to index
    %955 = memref.load %arg2[%954] : memref<32xi32, #tpu.memory_space<smem>>
    %956 = arith.index_cast %952 : i32 to index
    %c0_191 = arith.constant 0 : index
    %957 = vector.load %arg7[%956, %c0_191] : memref<5000x128xf32, #tpu.memory_space<vmem>>, vector<1x128xf32>
    %958 = arith.index_cast %955 : i32 to index
    %c0_192 = arith.constant 0 : index
    %959 = vector.load %arg7[%958, %c0_192] : memref<5000x128xf32, #tpu.memory_space<vmem>>, vector<1x128xf32>
    %960 = arith.mulf %957, %959 : vector<1x128xf32>
    %cst_193 = arith.constant dense<0.000000e+00> : vector<1xf32>
    %961 = vector.multi_reduction <add>, %960, %cst_193 [1] : vector<1x128xf32> to vector<1xf32>
    %962 = vector.shape_cast %961 : vector<1xf32> to vector<1x1xf32>
    %c27_i32_194 = arith.constant 27 : i32
    %963 = arith.addi %3, %c27_i32_194 : i32
    %964 = arith.index_cast %963 : i32 to index
    %965 = memref.load %arg5[%964] : memref<32xf32, #tpu.memory_space<smem>>
    %966 = vector.broadcast %965 : f32 to vector<1x1xf32>
    %967 = arith.index_cast %952 : i32 to index
    %968 = memref.load %arg3[%967] : memref<5000xf32, #tpu.memory_space<smem>>
    %969 = vector.broadcast %968 : f32 to vector<1x1xf32>
    %970 = arith.addf %962, %969 : vector<1x1xf32>
    %971 = arith.index_cast %955 : i32 to index
    %972 = memref.load %arg4[%971] : memref<5000xf32, #tpu.memory_space<smem>>
    %973 = vector.broadcast %972 : f32 to vector<1x1xf32>
    %974 = arith.addf %970, %973 : vector<1x1xf32>
    %975 = math.log %966 : vector<1x1xf32>
    %976 = arith.subf %974, %975 : vector<1x1xf32>
    %c27_i32_195 = arith.constant 27 : i32
    %977 = arith.addi %3, %c27_i32_195 : i32
    %978 = arith.index_cast %977 : i32 to index
    %979 = memref.load %arg6[%978] : memref<32xf32, #tpu.memory_space<smem>>
    %cst_196 = arith.constant 5.000000e-01 : f32
    %980 = arith.mulf %cst_196, %979 : f32
    %981 = vector.broadcast %980 : f32 to vector<1x1xf32>
    %982 = arith.mulf %981, %976 : vector<1x1xf32>
    %983 = arith.mulf %982, %976 : vector<1x1xf32>
    %984 = arith.addf %949, %983 : vector<1x1xf32>
    %c28_i32 = arith.constant 28 : i32
    %985 = arith.addi %3, %c28_i32 : i32
    %986 = arith.index_cast %985 : i32 to index
    %987 = memref.load %arg1[%986] : memref<32xi32, #tpu.memory_space<smem>>
    %c28_i32_197 = arith.constant 28 : i32
    %988 = arith.addi %3, %c28_i32_197 : i32
    %989 = arith.index_cast %988 : i32 to index
    %990 = memref.load %arg2[%989] : memref<32xi32, #tpu.memory_space<smem>>
    %991 = arith.index_cast %987 : i32 to index
    %c0_198 = arith.constant 0 : index
    %992 = vector.load %arg7[%991, %c0_198] : memref<5000x128xf32, #tpu.memory_space<vmem>>, vector<1x128xf32>
    %993 = arith.index_cast %990 : i32 to index
    %c0_199 = arith.constant 0 : index
    %994 = vector.load %arg7[%993, %c0_199] : memref<5000x128xf32, #tpu.memory_space<vmem>>, vector<1x128xf32>
    %995 = arith.mulf %992, %994 : vector<1x128xf32>
    %cst_200 = arith.constant dense<0.000000e+00> : vector<1xf32>
    %996 = vector.multi_reduction <add>, %995, %cst_200 [1] : vector<1x128xf32> to vector<1xf32>
    %997 = vector.shape_cast %996 : vector<1xf32> to vector<1x1xf32>
    %c28_i32_201 = arith.constant 28 : i32
    %998 = arith.addi %3, %c28_i32_201 : i32
    %999 = arith.index_cast %998 : i32 to index
    %1000 = memref.load %arg5[%999] : memref<32xf32, #tpu.memory_space<smem>>
    %1001 = vector.broadcast %1000 : f32 to vector<1x1xf32>
    %1002 = arith.index_cast %987 : i32 to index
    %1003 = memref.load %arg3[%1002] : memref<5000xf32, #tpu.memory_space<smem>>
    %1004 = vector.broadcast %1003 : f32 to vector<1x1xf32>
    %1005 = arith.addf %997, %1004 : vector<1x1xf32>
    %1006 = arith.index_cast %990 : i32 to index
    %1007 = memref.load %arg4[%1006] : memref<5000xf32, #tpu.memory_space<smem>>
    %1008 = vector.broadcast %1007 : f32 to vector<1x1xf32>
    %1009 = arith.addf %1005, %1008 : vector<1x1xf32>
    %1010 = math.log %1001 : vector<1x1xf32>
    %1011 = arith.subf %1009, %1010 : vector<1x1xf32>
    %c28_i32_202 = arith.constant 28 : i32
    %1012 = arith.addi %3, %c28_i32_202 : i32
    %1013 = arith.index_cast %1012 : i32 to index
    %1014 = memref.load %arg6[%1013] : memref<32xf32, #tpu.memory_space<smem>>
    %cst_203 = arith.constant 5.000000e-01 : f32
    %1015 = arith.mulf %cst_203, %1014 : f32
    %1016 = vector.broadcast %1015 : f32 to vector<1x1xf32>
    %1017 = arith.mulf %1016, %1011 : vector<1x1xf32>
    %1018 = arith.mulf %1017, %1011 : vector<1x1xf32>
    %1019 = arith.addf %984, %1018 : vector<1x1xf32>
    %c29_i32 = arith.constant 29 : i32
    %1020 = arith.addi %3, %c29_i32 : i32
    %1021 = arith.index_cast %1020 : i32 to index
    %1022 = memref.load %arg1[%1021] : memref<32xi32, #tpu.memory_space<smem>>
    %c29_i32_204 = arith.constant 29 : i32
    %1023 = arith.addi %3, %c29_i32_204 : i32
    %1024 = arith.index_cast %1023 : i32 to index
    %1025 = memref.load %arg2[%1024] : memref<32xi32, #tpu.memory_space<smem>>
    %1026 = arith.index_cast %1022 : i32 to index
    %c0_205 = arith.constant 0 : index
    %1027 = vector.load %arg7[%1026, %c0_205] : memref<5000x128xf32, #tpu.memory_space<vmem>>, vector<1x128xf32>
    %1028 = arith.index_cast %1025 : i32 to index
    %c0_206 = arith.constant 0 : index
    %1029 = vector.load %arg7[%1028, %c0_206] : memref<5000x128xf32, #tpu.memory_space<vmem>>, vector<1x128xf32>
    %1030 = arith.mulf %1027, %1029 : vector<1x128xf32>
    %cst_207 = arith.constant dense<0.000000e+00> : vector<1xf32>
    %1031 = vector.multi_reduction <add>, %1030, %cst_207 [1] : vector<1x128xf32> to vector<1xf32>
    %1032 = vector.shape_cast %1031 : vector<1xf32> to vector<1x1xf32>
    %c29_i32_208 = arith.constant 29 : i32
    %1033 = arith.addi %3, %c29_i32_208 : i32
    %1034 = arith.index_cast %1033 : i32 to index
    %1035 = memref.load %arg5[%1034] : memref<32xf32, #tpu.memory_space<smem>>
    %1036 = vector.broadcast %1035 : f32 to vector<1x1xf32>
    %1037 = arith.index_cast %1022 : i32 to index
    %1038 = memref.load %arg3[%1037] : memref<5000xf32, #tpu.memory_space<smem>>
    %1039 = vector.broadcast %1038 : f32 to vector<1x1xf32>
    %1040 = arith.addf %1032, %1039 : vector<1x1xf32>
    %1041 = arith.index_cast %1025 : i32 to index
    %1042 = memref.load %arg4[%1041] : memref<5000xf32, #tpu.memory_space<smem>>
    %1043 = vector.broadcast %1042 : f32 to vector<1x1xf32>
    %1044 = arith.addf %1040, %1043 : vector<1x1xf32>
    %1045 = math.log %1036 : vector<1x1xf32>
    %1046 = arith.subf %1044, %1045 : vector<1x1xf32>
    %c29_i32_209 = arith.constant 29 : i32
    %1047 = arith.addi %3, %c29_i32_209 : i32
    %1048 = arith.index_cast %1047 : i32 to index
    %1049 = memref.load %arg6[%1048] : memref<32xf32, #tpu.memory_space<smem>>
    %cst_210 = arith.constant 5.000000e-01 : f32
    %1050 = arith.mulf %cst_210, %1049 : f32
    %1051 = vector.broadcast %1050 : f32 to vector<1x1xf32>
    %1052 = arith.mulf %1051, %1046 : vector<1x1xf32>
    %1053 = arith.mulf %1052, %1046 : vector<1x1xf32>
    %1054 = arith.addf %1019, %1053 : vector<1x1xf32>
    %c30_i32 = arith.constant 30 : i32
    %1055 = arith.addi %3, %c30_i32 : i32
    %1056 = arith.index_cast %1055 : i32 to index
    %1057 = memref.load %arg1[%1056] : memref<32xi32, #tpu.memory_space<smem>>
    %c30_i32_211 = arith.constant 30 : i32
    %1058 = arith.addi %3, %c30_i32_211 : i32
    %1059 = arith.index_cast %1058 : i32 to index
    %1060 = memref.load %arg2[%1059] : memref<32xi32, #tpu.memory_space<smem>>
    %1061 = arith.index_cast %1057 : i32 to index
    %c0_212 = arith.constant 0 : index
    %1062 = vector.load %arg7[%1061, %c0_212] : memref<5000x128xf32, #tpu.memory_space<vmem>>, vector<1x128xf32>
    %1063 = arith.index_cast %1060 : i32 to index
    %c0_213 = arith.constant 0 : index
    %1064 = vector.load %arg7[%1063, %c0_213] : memref<5000x128xf32, #tpu.memory_space<vmem>>, vector<1x128xf32>
    %1065 = arith.mulf %1062, %1064 : vector<1x128xf32>
    %cst_214 = arith.constant dense<0.000000e+00> : vector<1xf32>
    %1066 = vector.multi_reduction <add>, %1065, %cst_214 [1] : vector<1x128xf32> to vector<1xf32>
    %1067 = vector.shape_cast %1066 : vector<1xf32> to vector<1x1xf32>
    %c30_i32_215 = arith.constant 30 : i32
    %1068 = arith.addi %3, %c30_i32_215 : i32
    %1069 = arith.index_cast %1068 : i32 to index
    %1070 = memref.load %arg5[%1069] : memref<32xf32, #tpu.memory_space<smem>>
    %1071 = vector.broadcast %1070 : f32 to vector<1x1xf32>
    %1072 = arith.index_cast %1057 : i32 to index
    %1073 = memref.load %arg3[%1072] : memref<5000xf32, #tpu.memory_space<smem>>
    %1074 = vector.broadcast %1073 : f32 to vector<1x1xf32>
    %1075 = arith.addf %1067, %1074 : vector<1x1xf32>
    %1076 = arith.index_cast %1060 : i32 to index
    %1077 = memref.load %arg4[%1076] : memref<5000xf32, #tpu.memory_space<smem>>
    %1078 = vector.broadcast %1077 : f32 to vector<1x1xf32>
    %1079 = arith.addf %1075, %1078 : vector<1x1xf32>
    %1080 = math.log %1071 : vector<1x1xf32>
    %1081 = arith.subf %1079, %1080 : vector<1x1xf32>
    %c30_i32_216 = arith.constant 30 : i32
    %1082 = arith.addi %3, %c30_i32_216 : i32
    %1083 = arith.index_cast %1082 : i32 to index
    %1084 = memref.load %arg6[%1083] : memref<32xf32, #tpu.memory_space<smem>>
    %cst_217 = arith.constant 5.000000e-01 : f32
    %1085 = arith.mulf %cst_217, %1084 : f32
    %1086 = vector.broadcast %1085 : f32 to vector<1x1xf32>
    %1087 = arith.mulf %1086, %1081 : vector<1x1xf32>
    %1088 = arith.mulf %1087, %1081 : vector<1x1xf32>
    %1089 = arith.addf %1054, %1088 : vector<1x1xf32>
    %c31_i32 = arith.constant 31 : i32
    %1090 = arith.addi %3, %c31_i32 : i32
    %1091 = arith.index_cast %1090 : i32 to index
    %1092 = memref.load %arg1[%1091] : memref<32xi32, #tpu.memory_space<smem>>
    %c31_i32_218 = arith.constant 31 : i32
    %1093 = arith.addi %3, %c31_i32_218 : i32
    %1094 = arith.index_cast %1093 : i32 to index
    %1095 = memref.load %arg2[%1094] : memref<32xi32, #tpu.memory_space<smem>>
    %1096 = arith.index_cast %1092 : i32 to index
    %c0_219 = arith.constant 0 : index
    %1097 = vector.load %arg7[%1096, %c0_219] : memref<5000x128xf32, #tpu.memory_space<vmem>>, vector<1x128xf32>
    %1098 = arith.index_cast %1095 : i32 to index
    %c0_220 = arith.constant 0 : index
    %1099 = vector.load %arg7[%1098, %c0_220] : memref<5000x128xf32, #tpu.memory_space<vmem>>, vector<1x128xf32>
    %1100 = arith.mulf %1097, %1099 : vector<1x128xf32>
    %cst_221 = arith.constant dense<0.000000e+00> : vector<1xf32>
    %1101 = vector.multi_reduction <add>, %1100, %cst_221 [1] : vector<1x128xf32> to vector<1xf32>
    %1102 = vector.shape_cast %1101 : vector<1xf32> to vector<1x1xf32>
    %c31_i32_222 = arith.constant 31 : i32
    %1103 = arith.addi %3, %c31_i32_222 : i32
    %1104 = arith.index_cast %1103 : i32 to index
    %1105 = memref.load %arg5[%1104] : memref<32xf32, #tpu.memory_space<smem>>
    %1106 = vector.broadcast %1105 : f32 to vector<1x1xf32>
    %1107 = arith.index_cast %1092 : i32 to index
    %1108 = memref.load %arg3[%1107] : memref<5000xf32, #tpu.memory_space<smem>>
    %1109 = vector.broadcast %1108 : f32 to vector<1x1xf32>
    %1110 = arith.addf %1102, %1109 : vector<1x1xf32>
    %1111 = arith.index_cast %1095 : i32 to index
    %1112 = memref.load %arg4[%1111] : memref<5000xf32, #tpu.memory_space<smem>>
    %1113 = vector.broadcast %1112 : f32 to vector<1x1xf32>
    %1114 = arith.addf %1110, %1113 : vector<1x1xf32>
    %1115 = math.log %1106 : vector<1x1xf32>
    %1116 = arith.subf %1114, %1115 : vector<1x1xf32>
    %c31_i32_223 = arith.constant 31 : i32
    %1117 = arith.addi %3, %c31_i32_223 : i32
    %1118 = arith.index_cast %1117 : i32 to index
    %1119 = memref.load %arg6[%1118] : memref<32xf32, #tpu.memory_space<smem>>
    %cst_224 = arith.constant 5.000000e-01 : f32
    %1120 = arith.mulf %cst_224, %1119 : f32
    %1121 = vector.broadcast %1120 : f32 to vector<1x1xf32>
    %1122 = arith.mulf %1121, %1116 : vector<1x1xf32>
    %1123 = arith.mulf %1122, %1116 : vector<1x1xf32>
    %1124 = arith.addf %1089, %1123 : vector<1x1xf32>
    %c0_225 = arith.constant 0 : index
    %c0_226 = arith.constant 0 : index
    %1125 = vector.load %arg8[%c0_225, %c0_226] : memref<1x1xf32, #tpu.memory_space<vmem>>, vector<1x1xf32>
    %1126 = arith.addf %1125, %1124 : vector<1x1xf32>
    %c0_227 = arith.constant 0 : index
    %c0_228 = arith.constant 0 : index
    %1127 = vector.load %arg8[%c0_227, %c0_228] : memref<1x1xf32, #tpu.memory_space<vmem>>, vector<1x1xf32>
    tpu.vector_store %arg8[%c0_227, %c0_228], %1126 {strides = array<i32>} : memref<1x1xf32, #tpu.memory_space<vmem>>, vector<1x1xf32>,
    return
  }
  func.func @transform_0(%arg0: i32) -> i32 {
    %c0_i32 = arith.constant 0 : i32
    %c0_i32_0 = arith.constant 0 : i32
    return %c0_i32 : i32
  }
  func.func @transform_1(%arg0: i32) -> i32 {
    %c0_i32 = arith.constant 0 : i32
    %c0_i32_0 = arith.constant 0 : i32
    return %c0_i32 : i32
  }
  func.func @transform_2(%arg0: i32) -> i32 {
    %c0_i32 = arith.constant 0 : i32
    %c0_i32_0 = arith.constant 0 : i32
    return %c0_i32 : i32
  }
  func.func @transform_3(%arg0: i32) -> i32 {
    %c0_i32 = arith.constant 0 : i32
    %c0_i32_0 = arith.constant 0 : i32
    return %c0_i32 : i32
  }
  func.func @transform_4(%arg0: i32) -> i32 {
    %c0_i32 = arith.constant 0 : i32
    %c0_i32_0 = arith.constant 0 : i32
    return %c0_i32 : i32
  }
  func.func @transform_5(%arg0: i32) -> i32 {
    %c0_i32 = arith.constant 0 : i32
    %c0_i32_0 = arith.constant 0 : i32
    return %c0_i32 : i32
  }
  func.func @transform_6(%arg0: i32) -> (i32, i32) {
    %c0_i32 = arith.constant 0 : i32
    %c0_i32_0 = arith.constant 0 : i32
    %c0_i32_1 = arith.constant 0 : i32
    return %c0_i32, %c0_i32_0 : i32, i32
  }
  func.func @transform_7(%arg0: i32) -> (i32, i32) {
    %c0_i32 = arith.constant 0 : i32
    %c0_i32_0 = arith.constant 0 : i32
    %c0_i32_1 = arith.constant 0 : i32
    return %c0_i32, %c0_i32_0 : i32, i32
  }
}

</mosaic_0001>

<bundles_post_ra>
// kernel: glove_forward.1
= control target key start
LH: loop header
LB: loop body
LE: loop exit
PB: predicated region body
PF: predicated region fallthrough
CT: control target
= control target key end

     0   :  { %s2497_s0 = inlined_call_operand.vmem [shape: s32[32], index: 0, kind: input, shape index: {}]   ;;  %s2498_s1 = inlined_call_operand.vmem [shape: s32[32], index: 1, kind: input, shape index: {}]   ;;  %s2499_s2 = inlined_call_operand.hbm [shape: f32[5000], index: 2, kind: input, shape index: {}]   ;;  %s2500_s3 = inlined_call_operand.hbm [shape: f32[5000], index: 3, kind: input, shape index: {}]   ;;  %s2501_s4 = inlined_call_operand.vmem [shape: f32[32], index: 4, kind: input, shape index: {}]   ;;  %s2502_s5 = inlined_call_operand.vmem [shape: f32[32], index: 5, kind: input, shape index: {}]   ;;  %s2503_s6 = inlined_call_operand.hbm [shape: f32[5000,128], index: 6, kind: input, shape index: {}]   ;;  %s2504_s7 = inlined_call_operand.hbm [shape: f32[1,1], index: 7, kind: output, shape index: {}]  }
   0x1   :  { %2593 = sst [smem:[#allocation90_spill]] %s2504_s7 }
   0x2   :  { %12 = vsyncpa [#allocation6], 0 }
   0x3   :  { %13 = vsyncpa [#allocation8], 0 }
   0x4   :  { %14 = vsyncpa [#allocation5], 0 }
   0x5   :  { %15 = vsyncpa [#allocation11], 0 }
   0x6   :  { %16 = vsyncpa [#allocation14], 0 }
   0x7   :  { %17 = vsyncpa [#allocation3], 0  ;;  %s35_s26 = sshll.u32 %s2498_s1, 4  ;;  %s36_s26 = int_to_ptr.vmem [resolvable:$true] %s35_s26 }
   0x8   :  { %18 = vsyncpa [#allocation4], 0  ;;  %s25_s29 = sshll.u32 %s2497_s0, 4  ;;  %s1299_s30 = scalar_lea.vmem %s36_s26, 16  ;;  %s26_s29 = int_to_ptr.vmem [resolvable:$true] %s25_s29 }
   0x9   :  { %p1300_p0 = scmp.ne.s32.totalorder %s36_s26, %s1299_s30  ;;  %p1304_p1 = scmp.lt.s32.totalorder %s36_s26, %s36_s26 }
   0xa   :  { %p1305_p2 = scmp.lt.s32.totalorder %s1299_s30, %s1299_s30 }
   0xc   :  { %p1306_p3 = por %p1305_p2, %p1304_p1 }
   0xe   :  { %p1307_p4 = pnand %p1306_p3, %p1300_p0 }
  0x10   :  { %1310 = shalt.err (!%p1307_p4)
}
  0x11   :  { %s1427_s8 = smov [#allocation7]   ;;  %s1311_s9 = scalar_lea.vmem %s26_s29, 16 }
  0x12   :  { %38 = dma.vmem_to_smem %s36_s26, 16, %s1427_s8, [#allocation8]  }
  0x13   :  { %p1312_p5 = scmp.ne.s32.totalorder %s26_s29, %s1311_s9  ;;  %p1316_p6 = scmp.lt.s32.totalorder %s26_s29, %s26_s29 }
  0x14   :  { %p1317_p7 = scmp.lt.s32.totalorder %s1311_s9, %s1311_s9 }
  0x16   :  { %p1318_p8 = por %p1317_p7, %p1316_p6 }
  0x18   :  { %p1319_p9 = pnand %p1318_p8, %p1312_p5 }
  0x1a   :  { %1322 = shalt.err (!%p1319_p9)
}
  0x1b   :  { %s1428_s1 = smov [#allocation2]   ;;  %s1323_s11 = scalar_lea.hbm %s2499_s2, 640 }
  0x1c   :  { %28 = dma.vmem_to_smem %s26_s29, 16, %s1428_s1, [#allocation6]  }
  0x1d   :  { %p1324_p10 = scmp.ne.s32.totalorder %s2499_s2, %s1323_s11  ;;  %p1327_p11 = scmp.lt.u32.totalorder %s1323_s11, %s2499_s2 }
  0x1f   :  { %p1329_p12 = pnand %p1327_p11, %p1324_p10 }
  0x21   :  { %1332 = shalt.err (!%p1329_p12)
}
  0x22   :  { %s1429_s16 = smov [#allocation9]   ;;  %s1333_s21 = scalar_lea.hbm %s2500_s3, 640 }
  0x23   :  { %46 = dma.hbm_to_smem %s2499_s2, 640, %s1429_s16, [#allocation5]  }
  0x24   :  { %p1334_p13 = scmp.ne.s32.totalorder %s2500_s3, %s1333_s21  ;;  %p1337_p0 = scmp.lt.u32.totalorder %s1333_s21, %s2500_s3 }
  0x26   :  { %p1339_p1 = pnand %p1337_p0, %p1334_p13 }
  0x28   :  { %1342 = shalt.err (!%p1339_p1)
}
  0x29   :  { %s1430_s26 = smov [#allocation10]   ;;  %s61_s30 = sshll.u32 %s2501_s4, 4  ;;  %s62_s30 = int_to_ptr.vmem [resolvable:$true] %s61_s30 }
  0x2a   :  { %54 = dma.hbm_to_smem %s2500_s3, 640, %s1430_s26, [#allocation11]  }
  0x2b   :  { %s71_s1 = sshll.u32 %s2502_s5, 4  ;;  %s1343_s0 = scalar_lea.vmem %s62_s30, 16  ;;  %s72_s1 = int_to_ptr.vmem [resolvable:$true] %s71_s1 }
  0x2c   :  { %p1344_p2 = scmp.ne.s32.totalorder %s62_s30, %s1343_s0  ;;  %p1348_p3 = scmp.lt.s32.totalorder %s62_s30, %s62_s30 }
  0x2d   :  { %p1349_p4 = scmp.lt.s32.totalorder %s1343_s0, %s1343_s0 }
  0x2f   :  { %p1350_p5 = por %p1349_p4, %p1348_p3 }
  0x31   :  { %p1351_p6 = pnand %p1350_p5, %p1344_p2 }
  0x33   :  { %1354 = shalt.err (!%p1351_p6)
}
  0x34   :  { %s1431_s10 = smov [#allocation12]   ;;  %s1355_s3 = scalar_lea.vmem %s72_s1, 16 }
  0x35   :  { %64 = dma.vmem_to_smem %s62_s30, 16, %s1431_s10, [#allocation8]  }
  0x36   :  { %p1356_p7 = scmp.ne.s32.totalorder %s72_s1, %s1355_s3  ;;  %p1360_p8 = scmp.lt.s32.totalorder %s72_s1, %s72_s1 }
  0x37   :  { %p1361_p9 = scmp.lt.s32.totalorder %s1355_s3, %s1355_s3 }
  0x39   :  { %p1362_p10 = por %p1361_p9, %p1360_p8 }
  0x3b   :  { %p1363_p11 = pnand %p1362_p10, %p1356_p7 }
  0x3d   :  { %1366 = shalt.err (!%p1363_p11)
}
  0x3e   :  { %s1432_s4 = smov [#allocation13]   ;;  %s1433_s5 = smov [#allocation15]  }
  0x3f   :  { %74 = dma.vmem_to_smem %s72_s1, 16, %s1432_s4, [#allocation14]  }
  0x40   :  { %s80_s11 = sshll.u32 %s1433_s5, 4  ;;  %s1367_s14 = scalar_lea.hbm %s2503_s6, 80000  ;;  %s81_s11 = int_to_ptr.vmem [resolvable:$true] %s80_s11 }
  0x41   :  { %p1368_p12 = scmp.ne.s32.totalorder %s2503_s6, %s1367_s14  ;;  %p1371_p13 = scmp.lt.u32.totalorder %s1367_s14, %s2503_s6 }
  0x43   :  { %p1373_p0 = pnand %p1371_p13, %p1368_p12 }
  0x45   :  { %1376 = shalt.err (!%p1373_p0)
}
  0x46   :  { %s1377_s19 = scalar_lea.vmem %s81_s11, 80000  ;;  %p1382_p2 = scmp.lt.s32.totalorder %s81_s11, %s81_s11 }
  0x47   :  { %p1378_p1 = scmp.ne.s32.totalorder %s81_s11, %s1377_s19  ;;  %p1383_p3 = scmp.lt.s32.totalorder %s1377_s19, %s1377_s19 }
  0x49   :  { %p1384_p4 = por %p1383_p3, %p1382_p2 }
  0x4b   :  { %p1385_p5 = pnand %p1384_p4, %p1378_p1 }
  0x4d   :  { %1388 = shalt.err (!%p1385_p5)
}
  0x4e   :  { %s1434_s20 = smov 128   ;;  %s1435_s21 = smov 8  }
  0x4f   :  { %86 = dma.hbm_to_vmem [thread:$0]  %s2503_s6, 80000, %s81_s11, [#allocation3], %s1434_s20, %s1434_s20, %s1435_s21  }
  0x50   :  { %1411 = dma.done.wait [#allocation6], 16  }
  0x51   :  { %1412 = vsyncadd [#allocation6], 4294967280 }
  0x52   :  { %1413 = dma.done.wait [#allocation8], 16  }
  0x53   :  { %1414 = vsyncadd [#allocation8], 4294967280 }
  0x54   :  { %1415 = dma.done.wait [#allocation5], 640  }
  0x55   :  { %1416 = vsyncadd [#allocation5], 4294966656 }
  0x56   :  { %1417 = dma.done.wait [#allocation11], 640  }
  0x57   :  { %1418 = vsyncadd [#allocation11], 4294966656 }
  0x58   :  { %1419 = dma.done.wait [#allocation8], 16  }
  0x59   :  { %1420 = vsyncadd [#allocation8], 4294967280 }
  0x5a   :  { %1421 = dma.done.wait [#allocation14], 16  }
  0x5b   :  { %1422 = vsyncadd [#allocation14], 4294967280 }
  0x5c   :  { %1423 = dma.done.wait [#allocation3], 80000  }
  0x5d   :  { %1424 = vsyncadd [#allocation3], 4294887296 }
  0x5e   :  { %108 = sfence }
  0x5f   :  { %s1526_s24 = sld [smem:[#allocation2]]  ;;  %s1530_s6 = sld [smem:[#allocation2 + $0x2]]  ;;  %vm123_vm0 = vcmask 1040384   ;;  %vm113_vm1 = vcmask 0  }
  0x60   :  { %s1528_s25 = sld [smem:[#allocation7]]  ;;  %s1532_s26 = sld [smem:[#allocation7 + $0x2]] }
  0x61   :  { %s1534_s27 = sld [smem:[#allocation2 + $0x1]]  ;;  %s1538_s2 = sld [smem:[#allocation2 + $0x3]] }
  0x62   :  { %s1536_s28 = sld [smem:[#allocation7 + $0x1]]  ;;  %s1540_s29 = sld [smem:[#allocation7 + $0x3]] }
  0x63   :  { %s1542_s30 = sld [smem:[#allocation2 + $0x4]]  ;;  %s1546_s9 = sld [smem:[#allocation2 + $0x5]] }
  0x64   :  { %s1544_s8 = sld [smem:[#allocation7 + $0x4]]  ;;  %s1548_s1 = sld [smem:[#allocation7 + $0x5]] }
  0x65   :  { %s118_s0 = scalar_lea.vmem [#allocation15], %s1526_s24  ;;  %s175_s3 = scalar_lea.vmem [#allocation15], %s1530_s6 }
  0x66   :  { %v119_v0 = vld [vmem:[%s118_s0] sm:$0x1]  ;;  %s120_s10 = scalar_lea.vmem [#allocation15], %s1528_s25  ;;  %s177_s4 = scalar_lea.vmem [#allocation15], %s1532_s26 }
  0x67   :  { %v121_v1 = vld [vmem:[%s120_s10] sm:$0x1]  ;;  %s147_s5 = scalar_lea.vmem [#allocation15], %s1534_s27  ;;  %s203_s12 = scalar_lea.vmem [#allocation15], %s1538_s2 }
  0x68   :  { %v122_v2 = vmul.f32 %v121_v1, %v119_v0  ;;  %v176_v3 = vld [vmem:[%s175_s3] sm:$0x1]  ;;  %s149_s11 = scalar_lea.vmem [#allocation15], %s1536_s28  ;;  %s205_s13 = scalar_lea.vmem [#allocation15], %s1540_s29 }
  0x69   :  { %v178_v4 = vld [vmem:[%s177_s4] sm:$0x1]  ;;  %s231_s14 = scalar_lea.vmem [#allocation15], %s1542_s30  ;;  %s259_s16 = scalar_lea.vmem [#allocation15], %s1546_s9 }
  0x6a   :  { %v179_v5 = vmul.f32 %v178_v4, %v176_v3  ;;  %v148_v6 = vld [vmem:[%s147_s5] sm:$0x1]  ;;  %v124_v8 = vsel %vm123_vm0, %v122_v2, 0.0  ;;  %s233_s15 = scalar_lea.vmem [#allocation15], %s1544_s8  ;;  %s261_s17 = scalar_lea.vmem [#allocation15], %s1548_s1 }
  0x6b   :  { %v150_v7 = vld [vmem:[%s149_s11] sm:$0x1]  ;;  %125 = vadd.xlane.f32.xlu0 %v124_v8  ;;  %s1566_s18 = sld [smem:[#allocation2 + $0x6]]  ;;  %s1570_s20 = sld [smem:[#allocation2 + $0x7]] }
  0x6c   :  { %v151_v9 = vmul.f32 %v150_v7, %v148_v6  ;;  %v204_v10 = vld [vmem:[%s203_s12] sm:$0x1]  ;;  %v180_v12 = vsel %vm123_vm0, %v179_v5, 0.0  ;;  %s1568_s19 = sld [smem:[#allocation7 + $0x6]]  ;;  %s1572_s21 = sld [smem:[#allocation7 + $0x7]] }
  0x6d   :  { %v206_v11 = vld [vmem:[%s205_s13] sm:$0x1]  ;;  %181 = vadd.xlane.f32.xlu1 %v180_v12  ;;  %s1574_s22 = sld [smem:[#allocation2 + $0x8]]  ;;  %s1579_s0 = sld [smem:[#allocation2 + $0x9]] }
  0x6e   :  { %v207_v13 = vmul.f32 %v206_v11, %v204_v10  ;;  %v232_v14 = vld [vmem:[%s231_s14] sm:$0x1]  ;;  %v152_v15 = vsel %vm123_vm0, %v151_v9, 0.0  ;;  %s1577_s23 = sld [smem:[#allocation7 + $0x8]]  ;;  %s1582_s10 = sld [smem:[#allocation7 + $0x9]] }
  0x6f   :  { %v234_v16 = vld [vmem:[%s233_s15] sm:$0x1]  ;;  %153 = vadd.xlane.f32.xlu0 %v152_v15  ;;  %s1584_s3 = sld [smem:[#allocation2 + $0xa]]  ;;  %s1588_s5 = sld [smem:[#allocation2 + $0xb]] }
  0x70   :  { %v260_v17 = vld [vmem:[%s259_s16] sm:$0x1]  ;;  %v208_v18 = vsel %vm123_vm0, %v207_v13, 0.0  ;;  %v235_v19 = vmul.f32 %v234_v16, %v232_v14  ;;  %s1586_s4 = sld [smem:[#allocation7 + $0xa]]  ;;  %s1590_s11 = sld [smem:[#allocation7 + $0xb]] }
  0x71   :  { %v262_v20 = vld [vmem:[%s261_s17] sm:$0x1]  ;;  %2594 = sst [smem:[#allocation25_spill]] %s1566_s18  ;;  %209 = vadd.xlane.f32.xlu1 %v208_v18  ;;  %s287_s12 = scalar_lea.vmem [#allocation15], %s1566_s18 }
  0x72   :  { %v263_v21 = vmul.f32 %v262_v20, %v260_v17  ;;  %2595 = sst [smem:[#allocation26_spill]] %s1568_s19  ;;  %v236_v22 = vsel %vm123_vm0, %v235_v19, 0.0  ;;  %v288_v24 = vld [vmem:[%s287_s12] sm:$0x1]  ;;  %s289_s13 = scalar_lea.vmem [#allocation15], %s1568_s19 }
  0x73   :  { %2596 = sst [smem:[#allocation27_spill]] %s1570_s20  ;;  %237 = vadd.xlane.f32.xlu0 %v236_v22  ;;  %v290_v25 = vld [vmem:[%s289_s13] sm:$0x1]  ;;  %s315_s14 = scalar_lea.vmem [#allocation15], %s1570_s20 }
  0x74   :  { %2597 = sst [smem:[#allocation28_spill]] %s1572_s21  ;;  %v264_v23 = vsel %vm123_vm0, %v263_v21, 0.0  ;;  %v316_v26 = vld [vmem:[%s315_s14] sm:$0x1]  ;;  %v291_v27 = vmul.f32 %v290_v25, %v288_v24  ;;  %s317_s15 = scalar_lea.vmem [#allocation15], %s1572_s21 }
  0x75   :  { %2598 = sst [smem:[#allocation29_spill]] %s1574_s22  ;;  %265 = vadd.xlane.f32.xlu1 %v264_v23  ;;  %v318_v28 = vld [vmem:[%s317_s15] sm:$0x1]  ;;  %s343_s16 = scalar_lea.vmem [#allocation15], %s1574_s22 }
  0x76   :  { %2599 = sst [smem:[#allocation30_spill]] %s1577_s23  ;;  %v344_v29 = vld [vmem:[%s343_s16] sm:$0x1]  ;;  %v319_v30 = vmul.f32 %v318_v28, %v316_v26  ;;  %s345_s17 = scalar_lea.vmem [#allocation15], %s1577_s23  ;;  %v292_v33 = vsel %vm123_vm0, %v291_v27, 0.0 }
  0x77   :  { %2600 = sst [smem:[#allocation31_spill]] %s1579_s0  ;;  %v346_v31 = vld [vmem:[%s345_s17] sm:$0x1]  ;;  %s371_s7 = scalar_lea.vmem [#allocation15], %s1579_s0  ;;  %293 = vadd.xlane.f32.xlu0 %v292_v33 }
  0x78   :  { %2601 = sst [smem:[#allocation32_spill]] %s1582_s10  ;;  %v372_v32 = vld [vmem:[%s371_s7] sm:$0x1]  ;;  %v347_v34 = vmul.f32 %v346_v31, %v344_v29  ;;  %s373_s12 = scalar_lea.vmem [#allocation15], %s1582_s10  ;;  %v320_v37 = vsel %vm123_vm0, %v319_v30, 0.0 }
  0x79   :  { %2602 = sst [smem:[#allocation33_spill]] %s1584_s3  ;;  %v374_v35 = vld [vmem:[%s373_s12] sm:$0x1]  ;;  %s399_s13 = scalar_lea.vmem [#allocation15], %s1584_s3  ;;  %321 = vadd.xlane.f32.xlu1 %v320_v37 }
  0x7a   :  { %2603 = sst [smem:[#allocation34_spill]] %s1586_s4  ;;  %v400_v36 = vld [vmem:[%s399_s13] sm:$0x1]  ;;  %v375_v38 = vmul.f32 %v374_v35, %v372_v32  ;;  %s401_s14 = scalar_lea.vmem [#allocation15], %s1586_s4  ;;  %v348_v40 = vsel %vm123_vm0, %v347_v34, 0.0 }
  0x7b   :  { %2604 = sst [smem:[#allocation35_spill]] %s1588_s5  ;;  %v402_v39 = vld [vmem:[%s401_s14] sm:$0x1]  ;;  %s427_s15 = scalar_lea.vmem [#allocation15], %s1588_s5  ;;  %349 = vadd.xlane.f32.xlu0 %v348_v40 }
  0x7c   :  { %2605 = sst [smem:[#allocation36_spill]] %s1590_s11  ;;  %v403_v41 = vmul.f32 %v402_v39, %v400_v36  ;;  %v428_v42 = vld [vmem:[%s427_s15] sm:$0x1]  ;;  %s429_s7 = scalar_lea.vmem [#allocation15], %s1590_s11  ;;  %v376_v44 = vsel %vm123_vm0, %v375_v38, 0.0 }
  0x7d   :  { %v430_v43 = vld [vmem:[%s429_s7] sm:$0x1]  ;;  %s1608_s16 = sld [smem:[#allocation2 + $0xc]]  ;;  %s1612_s12 = sld [smem:[#allocation2 + $0xd]]  ;;  %377 = vadd.xlane.f32.xlu1 %v376_v44 }
  0x7e   :  { %v431_v45 = vmul.f32 %v430_v43, %v428_v42  ;;  %s1610_s17 = sld [smem:[#allocation7 + $0xc]]  ;;  %s1614_s13 = sld [smem:[#allocation7 + $0xd]]  ;;  %v404_v46 = vsel %vm123_vm0, %v403_v41, 0.0 }
  0x7f   :  { %s1616_s14 = sld [smem:[#allocation2 + $0xe]]  ;;  %s1621_s15 = sld [smem:[#allocation2 + $0xf]]  ;;  %405 = vadd.xlane.f32.xlu0 %v404_v46 }
  0x80   :  { %s1618_s5 = sld [smem:[#allocation7 + $0xe]]  ;;  %s1623_s7 = sld [smem:[#allocation7 + $0xf]]  ;;  %v432_v47 = vsel %vm123_vm0, %v431_v45, 0.0 }
  0x81   :  { %s1626_s11 = sld [smem:[#allocation2 + $0x10]]  ;;  %s1630_s3 = sld [smem:[#allocation2 + $0x11]]  ;;  %433 = vadd.xlane.f32.xlu1 %v432_v47 }
  0x82   :  { %s1628_s4 = sld [smem:[#allocation7 + $0x10]]  ;;  %s1632_s10 = sld [smem:[#allocation7 + $0x11]] }
  0x83   :  { %2606 = sst [smem:[#allocation37_spill]] %s1608_s16  ;;  %s455_s0 = scalar_lea.vmem [#allocation15], %s1608_s16 }
  0x84   :  { %2607 = sst [smem:[#allocation38_spill]] %s1610_s17  ;;  %v456_v48 = vld [vmem:[%s455_s0] sm:$0x1]  ;;  %s457_s23 = scalar_lea.vmem [#allocation15], %s1610_s17 }
  0x85   :  { %2608 = sst [smem:[#allocation39_spill]] %s1612_s12  ;;  %v458_v49 = vld [vmem:[%s457_s23] sm:$0x1]  ;;  %s483_s22 = scalar_lea.vmem [#allocation15], %s1612_s12 }
  0x86   :  { %2609 = sst [smem:[#allocation40_spill]] %s1614_s13  ;;  %v459_v50 = vmul.f32 %v458_v49, %v456_v48  ;;  %v484_v51 = vld [vmem:[%s483_s22] sm:$0x1]  ;;  %s485_s21 = scalar_lea.vmem [#allocation15], %s1614_s13 }
  0x87   :  { %2610 = sst [smem:[#allocation41_spill]] %s1616_s14  ;;  %v486_v52 = vld [vmem:[%s485_s21] sm:$0x1]  ;;  %s511_s20 = scalar_lea.vmem [#allocation15], %s1616_s14 }
  0x88   :  { %2611 = sst [smem:[#allocation42_spill]] %s1618_s5  ;;  %v487_v53 = vmul.f32 %v486_v52, %v484_v51  ;;  %v512_v54 = vld [vmem:[%s511_s20] sm:$0x1]  ;;  %s513_s19 = scalar_lea.vmem [#allocation15], %s1618_s5  ;;  %v460_v56 = vsel %vm123_vm0, %v459_v50, 0.0 }
  0x89   :  { %2612 = sst [smem:[#allocation43_spill]] %s1621_s15  ;;  %v514_v55 = vld [vmem:[%s513_s19] sm:$0x1]  ;;  %s539_s0 = scalar_lea.vmem [#allocation15], %s1621_s15  ;;  %461 = vadd.xlane.f32.xlu0 %v460_v56 }
  0x8a   :  { %2613 = sst [smem:[#allocation44_spill]] %s1623_s7  ;;  %v515_v57 = vmul.f32 %v514_v55, %v512_v54  ;;  %v540_v58 = vld [vmem:[%s539_s0] sm:$0x1]  ;;  %s541_s23 = scalar_lea.vmem [#allocation15], %s1623_s7  ;;  %v488_v60 = vsel %vm123_vm0, %v487_v53, 0.0 }
  0x8b   :  { %2614 = sst [smem:[#allocation45_spill]] %s1626_s11  ;;  %v542_v59 = vld [vmem:[%s541_s23] sm:$0x1]  ;;  %s567_s21 = scalar_lea.vmem [#allocation15], %s1626_s11  ;;  %489 = vadd.xlane.f32.xlu1 %v488_v60 }
  0x8c   :  { %2615 = sst [smem:[#allocation46_spill]] %s1628_s4  ;;  %v543_v61 = vmul.f32 %v542_v59, %v540_v58  ;;  %v568_v62 = vld [vmem:[%s567_s21] sm:$0x1]  ;;  %v516_v63 = vsel %vm123_vm0, %v515_v57, 0.0  ;;  %s569_s20 = scalar_lea.vmem [#allocation15], %s1628_s4 }
  0x8d   :  { %2616 = sst [smem:[#allocation47_spill]] %s1630_s3  ;;  %v570_v0 = vld [vmem:[%s569_s20] sm:$0x1]  ;;  %s595_s19 = scalar_lea.vmem [#allocation15], %s1630_s3  ;;  %517 = vadd.xlane.f32.xlu0 %v516_v63 }
  0x8e   :  { %2617 = sst [smem:[#allocation48_spill]] %s1632_s10  ;;  %v596_v1 = vld [vmem:[%s595_s19] sm:$0x1]  ;;  %v544_v2 = vsel %vm123_vm0, %v543_v61, 0.0  ;;  %v571_v3 = vmul.f32 %v570_v0, %v568_v62  ;;  %s597_s22 = scalar_lea.vmem [#allocation15], %s1632_s10  ;;  %v1436_v0 = vmov 0.0  }
  0x8f   :  { %v598_v4 = vld [vmem:[%s597_s22] sm:$0x1]  ;;  %s1650_s0 = sld [smem:[#allocation2 + $0x12]]  ;;  %s1654_s7 = sld [smem:[#allocation2 + $0x13]]  ;;  %545 = vadd.xlane.f32.xlu1 %v544_v2  ;;  %114 = vst.msk [vmem:[#allocation16] sm:$0x1] %vm113_vm1, %v1436_v0 }
  0x90   :  { %v599_v5 = vmul.f32 %v598_v4, %v596_v1  ;;  %s1652_s23 = sld [smem:[#allocation7 + $0x12]]  ;;  %s1656_s21 = sld [smem:[#allocation7 + $0x13]]  ;;  %v572_v6 = vsel %vm123_vm0, %v571_v3, 0.0 }
  0x91   :  { %s1658_s20 = sld [smem:[#allocation2 + $0x14]]  ;;  %s1663_s22 = sld [smem:[#allocation2 + $0x15]]  ;;  %573 = vadd.xlane.f32.xlu0 %v572_v6 }
  0x92   :  { %s1661_s19 = sld [smem:[#allocation7 + $0x14]]  ;;  %v600_v7 = vsel %vm123_vm0, %v599_v5, 0.0  ;;  %s1666_s10 = sld [smem:[#allocation7 + $0x15]] }
  0x93   :  { %s1668_s3 = sld [smem:[#allocation2 + $0x16]]  ;;  %s1672_s11 = sld [smem:[#allocation2 + $0x17]]  ;;  %601 = vadd.xlane.f32.xlu1 %v600_v7 }
  0x94   :  { %s1670_s4 = sld [smem:[#allocation7 + $0x16]]  ;;  %s1674_s15 = sld [smem:[#allocation7 + $0x17]] }
  0x95   :  { %2618 = sst [smem:[#allocation49_spill]] %s1650_s0  ;;  %s623_s5 = scalar_lea.vmem [#allocation15], %s1650_s0 }
  0x96   :  { %2619 = sst [smem:[#allocation50_spill]] %s1652_s23  ;;  %v624_v8 = vld [vmem:[%s623_s5] sm:$0x1]  ;;  %s625_s14 = scalar_lea.vmem [#allocation15], %s1652_s23 }
  0x97   :  { %2620 = sst [smem:[#allocation51_spill]] %s1654_s7  ;;  %v626_v9 = vld [vmem:[%s625_s14] sm:$0x1]  ;;  %s651_s13 = scalar_lea.vmem [#allocation15], %s1654_s7 }
  0x98   :  { %2621 = sst [smem:[#allocation52_spill]] %s1656_s21  ;;  %v652_v10 = vld [vmem:[%s651_s13] sm:$0x1]  ;;  %v627_v11 = vmul.f32 %v626_v9, %v624_v8  ;;  %s653_s12 = scalar_lea.vmem [#allocation15], %s1656_s21 }
  0x99   :  { %2622 = sst [smem:[#allocation53_spill]] %s1658_s20  ;;  %v654_v12 = vld [vmem:[%s653_s12] sm:$0x1]  ;;  %s679_s17 = scalar_lea.vmem [#allocation15], %s1658_s20 }
  0x9a   :  { %2623 = sst [smem:[#allocation54_spill]] %s1661_s19  ;;  %v680_v13 = vld [vmem:[%s679_s17] sm:$0x1]  ;;  %v655_v14 = vmul.f32 %v654_v12, %v652_v10  ;;  %s681_s16 = scalar_lea.vmem [#allocation15], %s1661_s19  ;;  %v628_v17 = vsel %vm123_vm0, %v627_v11, 0.0 }
  0x9b   :  { %2624 = sst [smem:[#allocation55_spill]] %s1663_s22  ;;  %v682_v15 = vld [vmem:[%s681_s16] sm:$0x1]  ;;  %s707_s18 = scalar_lea.vmem [#allocation15], %s1663_s22  ;;  %629 = vadd.xlane.f32.xlu0 %v628_v17 }
  0x9c   :  { %2625 = sst [smem:[#allocation56_spill]] %s1666_s10  ;;  %v708_v16 = vld [vmem:[%s707_s18] sm:$0x1]  ;;  %v683_v18 = vmul.f32 %v682_v15, %v680_v13  ;;  %s709_s5 = scalar_lea.vmem [#allocation15], %s1666_s10  ;;  %v656_v21 = vsel %vm123_vm0, %v655_v14, 0.0 }
  0x9d   :  { %2626 = sst [smem:[#allocation57_spill]] %s1668_s3  ;;  %v710_v19 = vld [vmem:[%s709_s5] sm:$0x1]  ;;  %s735_s14 = scalar_lea.vmem [#allocation15], %s1668_s3  ;;  %657 = vadd.xlane.f32.xlu1 %v656_v21 }
  0x9e   :  { %2627 = sst [smem:[#allocation58_spill]] %s1670_s4  ;;  %v736_v20 = vld [vmem:[%s735_s14] sm:$0x1]  ;;  %v711_v22 = vmul.f32 %v710_v19, %v708_v16  ;;  %s737_s12 = scalar_lea.vmem [#allocation15], %s1670_s4  ;;  %v684_v24 = vsel %vm123_vm0, %v683_v18, 0.0 }
  0x9f   :  { %2628 = sst [smem:[#allocation59_spill]] %s1672_s11  ;;  %v738_v23 = vld [vmem:[%s737_s12] sm:$0x1]  ;;  %s763_s16 = scalar_lea.vmem [#allocation15], %s1672_s11  ;;  %685 = vadd.xlane.f32.xlu0 %v684_v24 }
  0xa0   :  { %2629 = sst [smem:[#allocation60_spill]] %s1674_s15  ;;  %v739_v25 = vmul.f32 %v738_v23, %v736_v20  ;;  %v764_v26 = vld [vmem:[%s763_s16] sm:$0x1]  ;;  %s765_s18 = scalar_lea.vmem [#allocation15], %s1674_s15  ;;  %v712_v28 = vsel %vm123_vm0, %v711_v22, 0.0 }
  0xa1   :  { %v766_v27 = vld [vmem:[%s765_s18] sm:$0x1]  ;;  %s1692_s17 = sld [smem:[#allocation2 + $0x18]]  ;;  %s1696_s5 = sld [smem:[#allocation2 + $0x19]]  ;;  %713 = vadd.xlane.f32.xlu1 %v712_v28 }
  0xa2   :  { %v767_v29 = vmul.f32 %v766_v27, %v764_v26  ;;  %s1694_s13 = sld [smem:[#allocation7 + $0x18]]  ;;  %s1698_s14 = sld [smem:[#allocation7 + $0x19]]  ;;  %v740_v30 = vsel %vm123_vm0, %v739_v25, 0.0 }
  0xa3   :  { %s1700_s12 = sld [smem:[#allocation2 + $0x1a]]  ;;  %s1705_s16 = sld [smem:[#allocation2 + $0x1b]]  ;;  %741 = vadd.xlane.f32.xlu0 %v740_v30 }
  0xa4   :  { %s1702_s11 = sld [smem:[#allocation7 + $0x1a]]  ;;  %s1707_s18 = sld [smem:[#allocation7 + $0x1b]]  ;;  %v768_v31 = vsel %vm123_vm0, %v767_v29, 0.0 }
  0xa5   :  { %s1710_s15 = sld [smem:[#allocation2 + $0x1c]]  ;;  %s1714_s3 = sld [smem:[#allocation2 + $0x1d]]  ;;  %769 = vadd.xlane.f32.xlu1 %v768_v31 }
  0xa6   :  { %s1712_s4 = sld [smem:[#allocation7 + $0x1c]]  ;;  %s1716_s10 = sld [smem:[#allocation7 + $0x1d]] }
  0xa7   :  { %2630 = sst [smem:[#allocation61_spill]] %s1692_s17  ;;  %s791_s22 = scalar_lea.vmem [#allocation15], %s1692_s17 }
  0xa8   :  { %2631 = sst [smem:[#allocation62_spill]] %s1694_s13  ;;  %v792_v32 = vld [vmem:[%s791_s22] sm:$0x1]  ;;  %s793_s19 = scalar_lea.vmem [#allocation15], %s1694_s13 }
  0xa9   :  { %2632 = sst [smem:[#allocation63_spill]] %s1696_s5  ;;  %v794_v33 = vld [vmem:[%s793_s19] sm:$0x1]  ;;  %s819_s20 = scalar_lea.vmem [#allocation15], %s1696_s5 }
  0xaa   :  { %2633 = sst [smem:[#allocation64_spill]] %s1698_s14  ;;  %v795_v34 = vmul.f32 %v794_v33, %v792_v32  ;;  %v820_v35 = vld [vmem:[%s819_s20] sm:$0x1]  ;;  %s821_s21 = scalar_lea.vmem [#allocation15], %s1698_s14 }
  0xab   :  { %2634 = sst [smem:[#allocation65_spill]] %s1700_s12  ;;  %v822_v36 = vld [vmem:[%s821_s21] sm:$0x1]  ;;  %s847_s7 = scalar_lea.vmem [#allocation15], %s1700_s12 }
  0xac   :  { %2635 = sst [smem:[#allocation66_spill]] %s1702_s11  ;;  %v823_v37 = vmul.f32 %v822_v36, %v820_v35  ;;  %v848_v38 = vld [vmem:[%s847_s7] sm:$0x1]  ;;  %s849_s23 = scalar_lea.vmem [#allocation15], %s1702_s11  ;;  %v796_v40 = vsel %vm123_vm0, %v795_v34, 0.0 }
  0xad   :  { %2636 = sst [smem:[#allocation67_spill]] %s1705_s16  ;;  %v850_v39 = vld [vmem:[%s849_s23] sm:$0x1]  ;;  %s875_s22 = scalar_lea.vmem [#allocation15], %s1705_s16  ;;  %797 = vadd.xlane.f32.xlu0 %v796_v40 }
  0xae   :  { %2637 = sst [smem:[#allocation68_spill]] %s1707_s18  ;;  %v851_v41 = vmul.f32 %v850_v39, %v848_v38  ;;  %v876_v42 = vld [vmem:[%s875_s22] sm:$0x1]  ;;  %s877_s19 = scalar_lea.vmem [#allocation15], %s1707_s18  ;;  %v824_v44 = vsel %vm123_vm0, %v823_v37, 0.0 }
  0xaf   :  { %2638 = sst [smem:[#allocation69_spill]] %s1710_s15  ;;  %v878_v43 = vld [vmem:[%s877_s19] sm:$0x1]  ;;  %s903_s21 = scalar_lea.vmem [#allocation15], %s1710_s15  ;;  %825 = vadd.xlane.f32.xlu1 %v824_v44 }
  0xb0   :  { %2639 = sst [smem:[#allocation70_spill]] %s1712_s4  ;;  %v879_v45 = vmul.f32 %v878_v43, %v876_v42  ;;  %v904_v46 = vld [vmem:[%s903_s21] sm:$0x1]  ;;  %v852_v47 = vsel %vm123_vm0, %v851_v41, 0.0  ;;  %s905_s7 = scalar_lea.vmem [#allocation15], %s1712_s4 }
  0xb1   :  { %2640 = sst [smem:[#allocation71_spill]] %s1714_s3  ;;  %v906_v48 = vld [vmem:[%s905_s7] sm:$0x1]  ;;  %s931_s23 = scalar_lea.vmem [#allocation15], %s1714_s3  ;;  %853 = vadd.xlane.f32.xlu0 %v852_v47 }
  0xb2   :  { %2641 = sst [smem:[#allocation72_spill]] %s1716_s10  ;;  %v932_v49 = vld [vmem:[%s931_s23] sm:$0x1]  ;;  %v880_v50 = vsel %vm123_vm0, %v879_v45, 0.0  ;;  %v907_v51 = vmul.f32 %v906_v48, %v904_v46  ;;  %s933_s20 = scalar_lea.vmem [#allocation15], %s1716_s10 }
  0xb3   :  { %v934_v52 = vld [vmem:[%s933_s20] sm:$0x1]  ;;  %s1734_s22 = sld [smem:[#allocation2 + $0x1e]]  ;;  %s1738_s21 = sld [smem:[#allocation2 + $0x1f]]  ;;  %881 = vadd.xlane.f32.xlu1 %v880_v50 }
  0xb4   :  { %v935_v53 = vmul.f32 %v934_v52, %v932_v49  ;;  %s1736_s19 = sld [smem:[#allocation7 + $0x1e]]  ;;  %s1740_s4 = sld [smem:[#allocation7 + $0x1f]]  ;;  %v908_v54 = vsel %vm123_vm0, %v907_v51, 0.0 }
  0xb5   :  { %909 = vadd.xlane.f32.xlu0 %v908_v54  ;;  %s1772_s3 = sld [smem:[#allocation9 + %s1534_s27]] }
  0xb6   :  { %v936_v55 = vsel %vm123_vm0, %v935_v53, 0.0  ;;  %s1776_s15 = sld [smem:[#allocation12 + $0x1]]  ;;  %s1781_s18 = sld [smem:[#allocation12 + $0x3]] }
  0xb7   :  { %937 = vadd.xlane.f32.xlu1 %v936_v55  ;;  %s1786_s16 = sld [smem:[#allocation13 + $0x3]]  ;;  %s2656_s12 = sld [smem:[#allocation26_spill]] }
  0xb8   :  { %s1790_s27 = sld [smem:[#allocation10 + %s1540_s29]] }
  0xb9   :  { %2642 = sst [smem:[#allocation73_spill]] %s1734_s22  ;;  %s959_s7 = scalar_lea.vmem [#allocation15], %s1734_s22 }
  0xba   :  { %2643 = sst [smem:[#allocation74_spill]] %s1736_s19  ;;  %v960_v56 = vld [vmem:[%s959_s7] sm:$0x1]  ;;  %s961_s23 = scalar_lea.vmem [#allocation15], %s1736_s19 }
  0xbb   :  { %2644 = sst [smem:[#allocation75_spill]] %s1738_s21  ;;  %v962_v57 = vld [vmem:[%s961_s23] sm:$0x1]  ;;  %s987_s20 = scalar_lea.vmem [#allocation15], %s1738_s21 }
  0xbc   :  { %2645 = sst [smem:[#allocation76_spill]] %s1740_s4  ;;  %v988_v58 = vld [vmem:[%s987_s20] sm:$0x1]  ;;  %v963_v59 = vmul.f32 %v962_v57, %v960_v56  ;;  %s989_s10 = scalar_lea.vmem [#allocation15], %s1740_s4  ;;  %v156_v3 = vstv %s1776_s15  ;;  %v212_v4 = vstv %s1781_s18 }
  0xbd   :  { %v990_v60 = vld [vmem:[%s989_s10] sm:$0x1]  ;;  %s1751_s7 = sld [smem:[#allocation13]]  ;;  %s1756_s10 = sld [smem:[#allocation13 + $0x2]] }
  0xbe   :  { %v991_v61 = vmul.f32 %v990_v60, %v988_v58  ;;  %v964_v62 = vsel %vm123_vm0, %v963_v59, 0.0  ;;  %s1754_s23 = sld [smem:[#allocation9 + %s1526_s24]] }
  0xbf   :  { %965 = vadd.xlane.f32.xlu0 %v964_v62  ;;  %s1759_s20 = sld [smem:[#allocation10 + %s1528_s25]] }
  0xc0   :  { %v992_v63 = vsel %vm123_vm0, %v991_v61, 0.0  ;;  %s1761_s4 = sld [smem:[#allocation13 + $0x1]]  ;;  %s1769_s22 = sld [smem:[#allocation12]] }
  0xc1   :  { %993 = vadd.xlane.f32.xlu1 %v992_v63  ;;  %s1764_s21 = sld [smem:[#allocation9 + %s1530_s6]] }
  0xc2   :  { %s1767_s19 = sld [smem:[#allocation10 + %s1532_s26]] }
  0xc3   :  { %2647 = sst [smem:[#allocation78_spill]] %s1756_s10  ;;  %s1774_s24 = sld [smem:[#allocation12 + $0x2]] }
  0xc4   :  { %2646 = sst [smem:[#allocation77_spill]] %s1754_s23  ;;  %s2655_s26 = sld [smem:[#allocation25_spill]]  ;;  %v130_v10 = vstv %s1754_s23 }
  0xc5   :  { %2648 = sst [smem:[#allocation79_spill]] %s1759_s20  ;;  %s1793_s5 = sld [smem:[#allocation13 + $0x4]]  ;;  %v133_v11 = vstv %s1759_s20 }
  0xc6   :  { %2649 = sst [smem:[#allocation80_spill]] %s1761_s4  ;;  %s2658_s13 = sld [smem:[#allocation27_spill]]  ;;  %v128_v1 = vstv %s1769_s22 }
  0xc7   :  { %2650 = sst [smem:[#allocation81_spill]] %s1764_s21  ;;  %s2659_s0 = sld [smem:[#allocation28_spill]]  ;;  %1235 = vlog2.f32 %v128_v1  ;;  %v186_v13 = vstv %s1764_s21 }
  0xc8   :  { %2651 = sst [smem:[#allocation82_spill]] %s1767_s19  ;;  %s1806_s29 = sld [smem:[#allocation12 + $0x5]]  ;;  %v189_v14 = vstv %s1767_s19 }
  0xc9   :  { %2652 = sst [smem:[#allocation83_spill]] %s1772_s3  ;;  %s2664_s17 = sld [smem:[#allocation29_spill]]  ;;  %v184_v2 = vstv %s1774_s24 }
  0xca   :  { %s1779_s25 = sld [smem:[#allocation10 + %s1536_s28]]  ;;  %1237 = vlog2.f32 %v184_v2  ;;  %s2692_s20 = smul.f32 0.5, %s1751_s7 }
  0xcb   :  { %s1784_s6 = sld [smem:[#allocation9 + %s1538_s2]]  ;;  %1239 = vlog2.f32 %v156_v3 }
  0xcc   :  { %2657 = sst [smem:[#allocation25_spill]] %s1790_s27  ;;  %s1796_s28 = sld [smem:[#allocation12 + $0x4]]  ;;  %1241 = vlog2.f32 %v212_v4  ;;  %v1905_v17 = vstv %s2692_s20 }
  0xcd   :  { %s1799_s2 = sld [smem:[#allocation9 + %s1542_s30]] }
  0xce   :  { %s1809_s14 = sld [smem:[#allocation9 + %s1546_s9]]  ;;  %v268_v6 = vstv %s1806_s29 }
  0xcf   :  { %s1812_s11 = sld [smem:[#allocation10 + %s1548_s1]] }
  0xd0   :  { %2653 = sst [smem:[#allocation84_spill]] %s1779_s25  ;;  %s1814_s27 = sld [smem:[#allocation12 + $0x6]] }
  0xd1   :  { %2654 = sst [smem:[#allocation85_spill]] %s1784_s6  ;;  %s1801_s6 = sld [smem:[#allocation13 + $0x5]]  ;;  %v1236_v16 = vpop.eup %1235 }
  0xd2   :  { %s1804_s25 = sld [smem:[#allocation10 + %s1544_s8]]  ;;  %v240_v5 = vstv %s1796_s28  ;;  %v1934_v29 = vmul.f32 0.6931472, %v1236_v16 }
  0xd3   :  { %2660 = sst [smem:[#allocation26_spill]] %s1799_s2  ;;  %s1816_s4 = sld [smem:[#allocation13 + $0x6]]  ;;  %1243 = vlog2.f32 %v240_v5 }
  0xd4   :  { %2662 = sst [smem:[#allocation28_spill]] %s1809_s14  ;;  %s2667_s10 = sld [smem:[#allocation30_spill]]  ;;  %1245 = vlog2.f32 %v268_v6  ;;  %v1238_v20 = vpop.eup %1237 }
  0xd5   :  { %2663 = sst [smem:[#allocation86_spill]] %s1812_s11  ;;  %s1835_s11 = sld [smem:[#allocation13 + $0x7]]  ;;  %v1240_v24 = vpop.eup %1239  ;;  %v1947_v33 = vmul.f32 0.6931472, %v1238_v20 }
  0xd6   :  { %s1820_s2 = sld [smem:[#allocation9 + %s2655_s26]]  ;;  %v296_v7 = vstv %s1814_s27  ;;  %v1242_v28 = vpop.eup %1241  ;;  %v1954_v37 = vmul.f32 0.6931472, %v1240_v24 }
  0xd7   :  { %s1823_s8 = sld [smem:[#allocation10 + %s2656_s12]]  ;;  %1247 = vlog2.f32 %v296_v7  ;;  %v1966_v41 = vmul.f32 0.6931472, %v1242_v28 }
  0xd8   :  { %2661 = sst [smem:[#allocation27_spill]] %s1804_s25  ;;  %s1825_s25 = sld [smem:[#allocation12 + $0x7]] }
  0xd9   :  { %2665 = sst [smem:[#allocation29_spill]] %s1816_s4  ;;  %s2671_s14 = sld [smem:[#allocation31_spill]] }
  0xda   :  { %s1829_s9 = sld [smem:[#allocation9 + %s2658_s13]] }
  0xdb   :  { %s1833_s1 = sld [smem:[#allocation10 + %s2659_s0]] }
  0xdc   :  { %2666 = sst [smem:[#allocation87_spill]] %s1820_s2  ;;  %s1839_s26 = sld [smem:[#allocation12 + $0x8]]  ;;  %v298_v43 = vstv %s1820_s2 }
  0xdd   :  { %2668 = sst [smem:[#allocation30_spill]] %s1823_s8  ;;  %s2672_s12 = sld [smem:[#allocation32_spill]]  ;;  %v1244_v36 = vpop.eup %1243 }
  0xde   :  { %s1843_s8 = sld [smem:[#allocation9 + %s2664_s17]]  ;;  %v324_v8 = vstv %s1825_s25  ;;  %v1246_v40 = vpop.eup %1245  ;;  %s2722_s2 = smul.f32 0.5, %s1835_s11  ;;  %v2001_v54 = vmul.f32 0.6931472, %v1244_v36 }
  0xdf   :  { %s1845_s3 = sld [smem:[#allocation13 + $0x8]]  ;;  %s1851_s13 = sld [smem:[#allocation12 + $0x9]]  ;;  %1249 = vlog2.f32 %v324_v8  ;;  %v2003_v55 = vmul.f32 0.6931472, %v1246_v40 }
  0xe0   :  { %2669 = sst [smem:[#allocation88_spill]] %s1829_s9  ;;  %s2675_s22 = sld [smem:[#allocation33_spill]]  ;;  %v1992_v50 = vstv %s2722_s2 }
  0xe1   :  { %2670 = sst [smem:[#allocation89_spill]] %s1833_s1  ;;  %s1854_s30 = sld [smem:[#allocation12 + $0xa]]  ;;  %v1248_v45 = vpop.eup %1247 }
  0xe2   :  { %s1849_s0 = sld [smem:[#allocation10 + %s2667_s10]]  ;;  %v352_v9 = vstv %s1839_s26  ;;  %v2014_v59 = vmul.f32 0.6931472, %v1248_v45 }
  0xe3   :  { %s2676_s15 = sld [smem:[#allocation34_spill]]  ;;  %s1866_s10 = sld [smem:[#allocation12 + $0xb]]  ;;  %1251 = vlog2.f32 %v352_v9 }
  0xe4   :  { %2673 = sst [smem:[#allocation31_spill]] %s1843_s8  ;;  %s1860_s8 = sld [smem:[#allocation13 + $0x9]] }
  0xe5   :  { %s1858_s17 = sld [smem:[#allocation9 + %s2671_s14]]  ;;  %v380_v12 = vstv %s1851_s13  ;;  %s2727_s11 = smul.f32 0.5, %s1845_s3 }
  0xe6   :  { %s1864_s18 = sld [smem:[#allocation10 + %s2672_s12]]  ;;  %1253 = vlog2.f32 %v380_v12 }
  0xe7   :  { %s1869_s24 = sld [smem:[#allocation13 + $0xa]]  ;;  %s1871_s28 = sld [smem:[#allocation12 + $0xc]]  ;;  %v408_v15 = vstv %s1854_s30  ;;  %v2007_v56 = vstv %s2727_s11 }
  0xe8   :  { %2674 = sst [smem:[#allocation32_spill]] %s1849_s0  ;;  %s2679_s0 = sld [smem:[#allocation35_spill]]  ;;  %1255 = vlog2.f32 %v408_v15 }
  0xe9   :  { %s2681_s29 = sld [smem:[#allocation36_spill]]  ;;  %s2683_s27 = sld [smem:[#allocation83_spill]]  ;;  %v436_v23 = vstv %s1866_s10  ;;  %v1250_v53 = vpop.eup %1249 }
  0xea   :  { %s1879_s12 = sld [smem:[#allocation10 + %s2676_s15]]  ;;  %s2704_s10 = smul.f32 0.5, %s1786_s16  ;;  %1257 = vlog2.f32 %v436_v23  ;;  %v2037_v4 = vmul.f32 0.6931472, %v1250_v53 }
  0xeb   :  { %2677 = sst [smem:[#allocation33_spill]] %s1858_s17  ;;  %s2684_s9 = sld [smem:[#allocation84_spill]] }
  0xec   :  { %2678 = sst [smem:[#allocation34_spill]] %s1864_s18  ;;  %s1881_s18 = sld [smem:[#allocation13 + $0xb]]  ;;  %v1938_v30 = vstv %s2704_s10 }
  0xed   :  { %s1875_s17 = sld [smem:[#allocation9 + %s2675_s22]]  ;;  %v464_v27 = vstv %s1871_s28  ;;  %v1252_v58 = vpop.eup %1251  ;;  %s2730_s11 = smul.f32 0.5, %s1860_s8 }
  0xee   :  { %s1885_s4 = sld [smem:[#allocation12 + $0xd]]  ;;  %s2685_s22 = sld [smem:[#allocation37_spill]]  ;;  %1259 = vlog2.f32 %v464_v27  ;;  %v2046_v8 = vmul.f32 0.6931472, %v1252_v58 }
  0xef   :  { %s1891_s14 = sld [smem:[#allocation9 + %s2679_s0]]  ;;  %v158_v18 = vstv %s2683_s27  ;;  %v2025_v63 = vstv %s2730_s11 }
  0xf0   :  { %2682 = sst [smem:[#allocation36_spill]] %s1879_s12  ;;  %s2687_s25 = sld [smem:[#allocation78_spill]]  ;;  %v1254_v62 = vpop.eup %1253 }
  0xf1   :  { %s1893_s15 = sld [smem:[#allocation13 + $0xc]]  ;;  %s2688_s12 = sld [smem:[#allocation80_spill]]  ;;  %v161_v19 = vstv %s2684_s9  ;;  %v2068_v36 = vmul.f32 0.6931472, %v1254_v62 }
  0xf2   :  { %s2689_s26 = sld [smem:[#allocation38_spill]]  ;;  %s2691_s23 = sld [smem:[#allocation85_spill]]  ;;  %v1256_v3 = vpop.eup %1255 }
  0xf3   :  { %2680 = sst [smem:[#allocation35_spill]] %s1875_s17  ;;  %s1901_s17 = sld [smem:[#allocation12 + $0xe]] }
  0xf4   :  { %s1899_s1 = sld [smem:[#allocation10 + %s2681_s29]]  ;;  %v492_v39 = vstv %s1885_s4  ;;  %v1258_v16 = vpop.eup %1257 }
  0xf5   :  { %2686 = sst [smem:[#allocation37_spill]] %s1891_s14  ;;  %s2693_s13 = sld [smem:[#allocation25_spill]]  ;;  %1261 = vlog2.f32 %v492_v39  ;;  %v438_v5 = vstv %s1891_s14  ;;  %v2070_v39 = vmul.f32 0.6931472, %v1256_v3  ;;  %v2091_v3 = vmul.f32 0.6931472, %v1258_v16 }
  0xf6   :  { %s2694_s0 = sld [smem:[#allocation39_spill]]  ;;  %s2695_s30 = smul.f32 0.5, %s2687_s25 }
  0xf7   :  { %s1911_s21 = sld [smem:[#allocation9 + %s2685_s22]]  ;;  %s2696_s29 = smul.f32 0.5, %s2688_s12 }
  0xf8   :  { %v1915_v21 = vstv %s2695_s30  ;;  %s2698_s7 = sld [smem:[#allocation27_spill]]  ;;  %s2699_s20 = sld [smem:[#allocation40_spill]]  ;;  %v214_v25 = vstv %s2691_s23  ;;  %v1260_v27 = vpop.eup %1259  ;;  %v126_v28 = vpop.xlane.xlu0 %125 }
  0xf9   :  { %v1919_v22 = vstv %s2696_s29  ;;  %s1923_s9 = sld [smem:[#allocation10 + %s2689_s26]]  ;;  %v520_v49 = vstv %s1901_s17  ;;  %v2100_v24 = vmul.f32 0.6931472, %v1260_v27 }
  0xfa   :  { %2690 = sst [smem:[#allocation78_spill]] %s1899_s1  ;;  %s2697_s1 = sld [smem:[#allocation26_spill]]  ;;  %1263 = vlog2.f32 %v520_v49  ;;  %v131_v49 = vadd.f32 %v130_v10, %v126_v28  ;;  %v182_v53 = vpop.xlane.xlu1 %181 }
  0xfb   :  { %s1925_s27 = sld [smem:[#allocation13 + $0xd]]  ;;  %s2701_s19 = sld [smem:[#allocation28_spill]]  ;;  %v217_v26 = vstv %s2693_s13 }
  0xfc   :  { %s2702_s22 = sld [smem:[#allocation86_spill]]  ;;  %s2705_s26 = sld [smem:[#allocation41_spill]]  ;;  %v134_v58 = vadd.f32 %v133_v11, %v131_v49  ;;  %v154_v16 = vpop.xlane.xlu0 %153 }
  0xfd   :  { %s1932_s12 = sld [smem:[#allocation9 + %s2694_s0]] }
  0xfe   :  { %v245_v32 = vstv %s2698_s7  ;;  %s1943_s30 = sld [smem:[#allocation10 + %s2699_s20]]  ;;  %s2711_s20 = smul.f32 0.5, %s1793_s5  ;;  %v137_v49 = vsub.f32 %v134_v58, %v1934_v29  ;;  %v210_v45 = vpop.xlane.xlu1 %209 }
  0xff   :  { %2700 = sst [smem:[#allocation80_spill]] %s1923_s9  ;;  %s2707_s28 = sld [smem:[#allocation30_spill]]  ;;  %v1262_v28 = vpop.eup %1261  ;;  %v215_v10 = vadd.f32 %v214_v25, %v210_v45 }
 0x100   :  { %v242_v31 = vstv %s2697_s1  ;;  %s1945_s29 = sld [smem:[#allocation12 + $0xf]]  ;;  %s2708_s16 = sld [smem:[#allocation42_spill]]  ;;  %v1958_v38 = vstv %s2711_s20  ;;  %v2129_v23 = vmul.f32 0.6931472, %v1262_v28  ;;  %v238_v25 = vpop.xlane.xlu0 %237 }
 0x101   :  { %v270_v34 = vstv %s2701_s19  ;;  %s1952_s10 = sld [smem:[#allocation13 + $0xe]]  ;;  %s2709_s25 = sld [smem:[#allocation29_spill]] }
 0x102   :  { %v273_v35 = vstv %s2702_s22  ;;  %s2710_s7 = sld [smem:[#allocation88_spill]]  ;;  %s2712_s1 = sld [smem:[#allocation89_spill]] }
 0x103   :  { %2703 = sst [smem:[#allocation38_spill]] %s1932_s12  ;;  %s2713_s19 = sld [smem:[#allocation43_spill]] }
 0x104   :  { %2706 = sst [smem:[#allocation39_spill]] %s1943_s30  ;;  %s1964_s13 = sld [smem:[#allocation12 + $0x10]]  ;;  %v1264_v27 = vpop.eup %1263 }
 0x105   :  { %s1962_s22 = sld [smem:[#allocation9 + %s2705_s26]]  ;;  %s2717_s30 = smul.f32 0.5, %s1801_s6  ;;  %v301_v44 = vstv %s2707_s28  ;;  %v2141_v45 = vmul.f32 0.6931472, %v1264_v27 }
 0x106   :  { %s2715_s0 = sld [smem:[#allocation31_spill]]  ;;  %s2716_s23 = sld [smem:[#allocation32_spill]]  ;;  %v548_v2 = vstv %s1945_s29 }
 0x107   :  { %v1970_v42 = vstv %s2717_s30  ;;  %s2718_s5 = sld [smem:[#allocation44_spill]]  ;;  %s2719_s4 = smul.f32 0.5, %s2709_s25  ;;  %1265 = vlog2.f32 %v548_v2  ;;  %v187_v2 = vadd.f32 %v186_v13, %v182_v53 }
 0x108   :  { %s1976_s12 = sld [smem:[#allocation10 + %s2708_s16]]  ;;  %v326_v47 = vstv %s2710_s7  ;;  %v329_v48 = vstv %s2712_s1  ;;  %s531_s11 = smul.f32 0.5, %s1952_s10 }
 0x109   :  { %v1980_v46 = vstv %s2719_s4  ;;  %s2720_s26 = sld [smem:[#allocation33_spill]]  ;;  %s1988_s30 = sld [smem:[#allocation13 + $0xf]]  ;;  %v190_v13 = vadd.f32 %v189_v14, %v187_v2 }
 0x10a   :  { %s1986_s6 = sld [smem:[#allocation9 + %s2713_s19]]  ;;  %s2736_s29 = smul.f32 0.5, %s1881_s18  ;;  %v576_v15 = vstv %s1964_s13  ;;  %v2084_v62 = vstv %s531_s11 }
 0x10b   :  { %2714 = sst [smem:[#allocation40_spill]] %s1962_s22  ;;  %s2721_s22 = sld [smem:[#allocation45_spill]]  ;;  %1267 = vlog2.f32 %v576_v15  ;;  %v159_v15 = vadd.f32 %v158_v18, %v154_v16  ;;  %v193_v18 = vsub.f32 %v190_v13, %v1947_v33  ;;  %v218_v16 = vadd.f32 %v217_v26, %v215_v10 }
 0x10c   :  { %s2723_s28 = sld [smem:[#allocation34_spill]]  ;;  %s2724_s16 = sld [smem:[#allocation35_spill]]  ;;  %v354_v51 = vstv %s2715_s0  ;;  %v357_v52 = vstv %s2716_s23  ;;  %v2050_v9 = vstv %s2736_s29  ;;  %v141_v33 = vmul.f32 %v1905_v17, %v137_v49 }
 0x10d   :  { %s2725_s25 = sld [smem:[#allocation46_spill]]  ;;  %s1999_s20 = sld [smem:[#allocation13 + $0x10]]  ;;  %v162_v29 = vadd.f32 %v161_v19, %v159_v15  ;;  %v243_v10 = vadd.f32 %v242_v31, %v238_v25  ;;  %v266_v15 = vpop.xlane.xlu1 %265 }
 0x10e   :  { %s1997_s4 = sld [smem:[#allocation10 + %s2718_s5]]  ;;  %s2740_s10 = smul.f32 0.5, %s1893_s15  ;;  %v271_v27 = vadd.f32 %v270_v34, %v266_v15  ;;  %v142_v15 = vmul.f32 %v141_v33, %v137_v49 }
 0x10f   :  { %s2726_s17 = sld [smem:[#allocation36_spill]]  ;;  %v382_v57 = vstv %s2720_s26  ;;  %s2728_s5 = sld [smem:[#allocation78_spill]]  ;;  %v165_v26 = vsub.f32 %v162_v29, %v1954_v37  ;;  %v197_v37 = vmul.f32 %v1915_v21, %v193_v18  ;;  %v246_v29 = vadd.f32 %v245_v32, %v243_v10 }
 0x110   :  { %s2729_s23 = sld [smem:[#allocation47_spill]]  ;;  %s2021_s3 = sld [smem:[#allocation12 + $0x11]]  ;;  %v2061_v20 = vstv %s2740_s10 }
 0x111   :  { %s2012_s2 = sld [smem:[#allocation9 + %s2721_s22]]  ;;  %s2731_s22 = smul.f32 0.5, %s1869_s24  ;;  %v1266_v19 = vpop.eup %1265  ;;  %v169_v31 = vmul.f32 %v1919_v22, %v165_v26  ;;  %v249_v32 = vsub.f32 %v246_v29, %v2001_v54  ;;  %v198_v49 = vmul.f32 %v197_v37, %v193_v18 }
 0x112   :  { %v385_v60 = vstv %s2723_s28  ;;  %v410_v61 = vstv %s2724_s16  ;;  %s2732_s19 = sld [smem:[#allocation48_spill]]  ;;  %s2033_s16 = sld [smem:[#allocation13 + $0x11]]  ;;  %v2175_v34 = vmul.f32 0.6931472, %v1266_v19  ;;  %v294_v19 = vpop.xlane.xlu0 %293 }
 0x113   :  { %s2019_s0 = sld [smem:[#allocation10 + %s2725_s25]]  ;;  %v2030_v1 = vstv %s2731_s22  ;;  %s2742_s13 = smul.f32 0.5, %s1925_s27  ;;  %v170_v21 = vmul.f32 %v169_v31, %v165_v26  ;;  %v253_v54 = vmul.f32 %v1958_v38, %v249_v32  ;;  %v299_v33 = vadd.f32 %v298_v43, %v294_v19  ;;  %v322_v26 = vpop.xlane.xlu1 %321 }
 0x114   :  { %s2035_s25 = sld [smem:[#allocation12 + $0x12]]  ;;  %s2733_s28 = sld [smem:[#allocation38_spill]] }
 0x115   :  { %v413_v0 = vstv %s2726_s17  ;;  %s2735_s8 = sld [smem:[#allocation49_spill]]  ;;  %v441_v6 = vstv %s2728_s5  ;;  %s2737_s22 = sld [smem:[#allocation40_spill]]  ;;  %v2074_v40 = vstv %s2742_s13  ;;  %v1268_v17 = vpop.eup %1267  ;;  %v302_v43 = vadd.f32 %v301_v44, %v299_v33 }
 0x116   :  { %s2044_s24 = sld [smem:[#allocation9 + %s2729_s23]]  ;;  %s559_s29 = smul.f32 0.5, %s1988_s30  ;;  %v604_v12 = vstv %s2021_s3  ;;  %v2186_v10 = vmul.f32 0.6931472, %v1268_v17 }
 0x117   :  { %s2738_s17 = sld [smem:[#allocation50_spill]]  ;;  %s2057_s7 = sld [smem:[#allocation13 + $0x12]]  ;;  %1269 = vlog2.f32 %v604_v12  ;;  %v378_v44 = vpop.xlane.xlu1 %377 }
 0x118   :  { %s2055_s1 = sld [smem:[#allocation10 + %s2732_s19]]  ;;  %s587_s27 = smul.f32 0.5, %s1999_s20  ;;  %v2111_v53 = vstv %s559_s29 }
 0x119   :  { %s2743_s15 = sld [smem:[#allocation51_spill]]  ;;  %s2087_s9 = sld [smem:[#allocation12 + $0x13]] }
 0x11a   :  { %s2748_s20 = sld [smem:[#allocation53_spill]]  ;;  %s615_s13 = smul.f32 0.5, %s2033_s16  ;;  %v632_v11 = vstv %s2035_s25  ;;  %v2121_v14 = vstv %s587_s27 }
 0x11b   :  { %s2066_s23 = sld [smem:[#allocation9 + %s2735_s8]]  ;;  %1271 = vlog2.f32 %v632_v11  ;;  %v221_v11 = vsub.f32 %v218_v16, %v1966_v41  ;;  %v274_v41 = vadd.f32 %v273_v35, %v271_v27  ;;  %v327_v27 = vadd.f32 %v326_v47, %v322_v26  ;;  %v350_v47 = vpop.xlane.xlu0 %349 }
 0x11c   :  { %s2745_s8 = sld [smem:[#allocation52_spill]]  ;;  %s2107_s18 = sld [smem:[#allocation12 + $0x14]]  ;;  %v606_v2 = vstv %s2044_s24  ;;  %v2143_v12 = vstv %s615_s13 }
 0x11d   :  { %s2079_s10 = sld [smem:[#allocation10 + %s2738_s17]]  ;;  %s643_s25 = smul.f32 0.5, %s2057_s7  ;;  %v225_v22 = vmul.f32 %v1938_v30, %v221_v11  ;;  %v277_v35 = vsub.f32 %v274_v41, %v2003_v55  ;;  %v171_v30 = vadd.f32 %v170_v21, %v142_v15  ;;  %v330_v41 = vadd.f32 %v329_v48, %v327_v27 }
 0x11e   :  { %s2116_s19 = sld [smem:[#allocation13 + $0x13]]  ;;  %s2753_s16 = sld [smem:[#allocation54_spill]]  ;;  %v609_v7 = vstv %s2055_s1 }
 0x11f   :  { %s2096_s14 = sld [smem:[#allocation9 + %s2743_s15]]  ;;  %v660_v13 = vstv %s2087_s9  ;;  %v2159_v28 = vstv %s643_s25  ;;  %v199_v37 = vadd.f32 %v198_v49, %v171_v30  ;;  %v281_v38 = vmul.f32 %v1970_v42, %v277_v35 }
 0x120   :  { %s2125_s26 = sld [smem:[#allocation9 + %s2748_s20]]  ;;  %1273 = vlog2.f32 %v660_v13  ;;  %v254_v49 = vmul.f32 %v253_v54, %v249_v32  ;;  %v355_v42 = vadd.f32 %v354_v51, %v350_v47  ;;  %v333_v48 = vsub.f32 %v330_v41, %v2037_v4 }
 0x121   :  { %s2756_s30 = sld [smem:[#allocation55_spill]]  ;;  %s2757_s20 = sld [smem:[#allocation56_spill]]  ;;  %v1270_v55 = vpop.eup %1269  ;;  %v282_v54 = vmul.f32 %v281_v38, %v277_v35 }
 0x122   :  { %s2105_s17 = sld [smem:[#allocation10 + %s2745_s8]]  ;;  %v688_v25 = vstv %s2107_s18  ;;  %v358_v51 = vadd.f32 %v357_v52, %v355_v42  ;;  %v337_v27 = vmul.f32 %v1992_v50, %v333_v48  ;;  %v434_v50 = vpop.xlane.xlu1 %433 }
 0x123   :  { %s2133_s8 = sld [smem:[#allocation13 + $0x14]]  ;;  %s2149_s11 = sld [smem:[#allocation12 + $0x15]]  ;;  %1275 = vlog2.f32 %v688_v25  ;;  %v226_v25 = vmul.f32 %v225_v22, %v221_v11  ;;  %v305_v11 = vsub.f32 %v302_v43, %v2014_v59  ;;  %v383_v22 = vadd.f32 %v382_v57, %v378_v44 }
 0x124   :  { %s2147_s7 = sld [smem:[#allocation10 + %s2753_s16]]  ;;  %s671_s25 = smul.f32 0.5, %s2116_s19  ;;  %v439_v38 = vadd.f32 %v438_v5, %v434_v50 }
 0x125   :  { %v662_v58 = vstv %s2096_s14  ;;  %s2762_s9 = sld [smem:[#allocation57_spill]]  ;;  %s2179_s29 = sld [smem:[#allocation12 + $0x16]]  ;;  %v1272_v18 = vpop.eup %1271  ;;  %v227_v26 = vadd.f32 %v226_v25, %v199_v37  ;;  %v309_v59 = vmul.f32 %v1980_v46, %v305_v11  ;;  %v386_v4 = vadd.f32 %v385_v60, %v383_v22  ;;  %v406_v37 = vpop.xlane.xlu0 %405 }
 0x126   :  { %s2183_s18 = sld [smem:[#allocation13 + $0x15]]  ;;  %v690_v13 = vstv %s2125_s26  ;;  %v2198_v17 = vstv %s671_s25  ;;  %s2219_s15 = sld [smem:[#allocation12 + $0x17]]  ;;  %v2234_v25 = vmul.f32 0.6931472, %v1270_v55  ;;  %v361_v46 = vsub.f32 %v358_v51, %v2046_v8 }
 0x127   :  { %s2163_s13 = sld [smem:[#allocation9 + %s2756_s30]]  ;;  %v255_v32 = vadd.f32 %v254_v49, %v227_v26  ;;  %v411_v52 = vadd.f32 %v410_v61, %v406_v37  ;;  %v389_v55 = vsub.f32 %v386_v4, %v2068_v36  ;;  %v2251_v43 = vmul.f32 0.6931472, %v1272_v18 }
 0x128   :  { %2749 = sst [smem:[#allocation41_spill]] %s2105_s17  ;;  %v665_v16 = vstv %s2105_s17  ;;  %s2768_s17 = sld [smem:[#allocation58_spill]]  ;;  %v338_v8 = vmul.f32 %v337_v27, %v333_v48  ;;  %v365_v41 = vmul.f32 %v2007_v56, %v361_v46  ;;  %v442_v36 = vadd.f32 %v441_v6, %v439_v38 }
 0x129   :  { %s2166_s16 = sld [smem:[#allocation10 + %s2757_s20]]  ;;  %s699_s19 = smul.f32 0.5, %s2133_s8  ;;  %v716_v29 = vstv %s2149_s11  ;;  %v283_v35 = vadd.f32 %v282_v54, %v255_v32  ;;  %v414_v47 = vadd.f32 %v413_v0, %v411_v52  ;;  %v393_v5 = vmul.f32 %v2025_v63, %v389_v55  ;;  %v462_v56 = vpop.xlane.xlu0 %461  ;;  %v490_v63 = vpop.xlane.xlu1 %489 }
 0x12a   :  { %2758 = sst [smem:[#allocation42_spill]] %s2147_s7  ;;  %v693_v31 = vstv %s2147_s7  ;;  %s2771_s30 = sld [smem:[#allocation59_spill]]  ;;  %1277 = vlog2.f32 %v716_v29  ;;  %v1274_v33 = vpop.eup %1273  ;;  %v310_v29 = vmul.f32 %v309_v59, %v305_v11  ;;  %v366_v11 = vmul.f32 %v365_v41, %v361_v46 }
 0x12b   :  { %s2191_s20 = sld [smem:[#allocation9 + %s2762_s9]]  ;;  %v2209_v15 = vstv %s699_s19  ;;  %v744_v30 = vstv %s2179_s29  ;;  %v417_v42 = vsub.f32 %v414_v47, %v2070_v39  ;;  %v445_v0 = vsub.f32 %v442_v36, %v2091_v3 }
 0x12c   :  { %s2202_s9 = sld [smem:[#allocation13 + $0x16]]  ;;  %s2774_s19 = sld [smem:[#allocation60_spill]]  ;;  %1279 = vlog2.f32 %v744_v30  ;;  %v311_v61 = vadd.f32 %v310_v29, %v283_v35  ;;  %v772_v44 = vstv %s2219_s15  ;;  %v2781_v48 = vstv %s1911_s21 }
 0x12d   :  { %v718_v21 = vstv %s2163_s13  ;;  %s727_s29 = smul.f32 0.5, %s2183_s18  ;;  %s2777_s27 = sld [smem:[#allocation61_spill]]  ;;  %v1276_v60 = vpop.eup %1275  ;;  %v467_v22 = vadd.f32 %v2781_v48, %v462_v56  ;;  %v394_v39 = vmul.f32 %v393_v5, %v389_v55  ;;  %v421_v54 = vmul.f32 %v2030_v1, %v417_v42  ;;  %v518_v50 = vpop.xlane.xlu0 %517 }
 0x12e   :  { %s2214_s25 = sld [smem:[#allocation10 + %s2768_s17]]  ;;  %v339_v49 = vadd.f32 %v338_v8, %v311_v61  ;;  %v2785_v59 = vstv %s2733_s28  ;;  %v449_v27 = vmul.f32 %v2050_v9, %v445_v0  ;;  %1281 = vlog2.f32 %v772_v44  ;;  %v546_v8 = vpop.xlane.xlu1 %545 }
 0x12f   :  { %2761 = sst [smem:[#allocation29_spill]] %s2166_s16  ;;  %v721_v19 = vstv %s2166_s16  ;;  %s2244_s7 = sld [smem:[#allocation13 + $0x17]]  ;;  %v2265_v18 = vstv %s727_s29  ;;  %v495_v51 = vadd.f32 %v2785_v59, %v490_v63  ;;  %v422_v46 = vmul.f32 %v421_v54, %v417_v42 }
 0x130   :  { %s2226_s17 = sld [smem:[#allocation9 + %s2771_s30]]  ;;  %v367_v32 = vadd.f32 %v366_v11, %v339_v49  ;;  %v2788_v38 = vstv %s2737_s22  ;;  %v2303_v41 = vmul.f32 0.6931472, %v1274_v33  ;;  %v450_v36 = vmul.f32 %v449_v27, %v445_v0 }
 0x131   :  { %2765 = sst [smem:[#allocation43_spill]] %s2191_s20  ;;  %v746_v57 = vstv %s2191_s20  ;;  %s2246_s16 = sld [smem:[#allocation12 + $0x18]]  ;;  %v523_v61 = vadd.f32 %v2788_v38, %v518_v50  ;;  %v2790_v11 = vstv %s1986_s6  ;;  %v2791_v56 = vstv %s1976_s12 }
 0x132   :  { %s2239_s30 = sld [smem:[#allocation10 + %s2774_s19]]  ;;  %s755_s18 = smul.f32 0.5, %s2202_s9  ;;  %v395_v29 = vadd.f32 %v394_v39, %v367_v32  ;;  %v551_v42 = vadd.f32 %v2790_v11, %v546_v8  ;;  %v2319_v48 = vmul.f32 0.6931472, %v1276_v60  ;;  %v574_v32 = vpop.xlane.xlu0 %573  ;;  %v2794_v54 = vstv %s2012_s2 }
 0x133   :  { %s2255_s19 = sld [smem:[#allocation9 + %s2777_s27]]  ;;  %v526_v44 = vadd.f32 %v2791_v56, %v523_v61  ;;  %v579_v59 = vadd.f32 %v2794_v54, %v574_v32  ;;  %v2800_v32 = vstv %s2079_s10 }
 0x134   :  { %s2779_s3 = sld [smem:[#allocation62_spill]]  ;;  %s2260_s20 = sld [smem:[#allocation13 + $0x18]]  ;;  %v749_v26 = vstv %s2214_s25  ;;  %v2273_v30 = vstv %s755_s18  ;;  %v2284_v3 = vpop.eup %1277  ;;  %v423_v5 = vadd.f32 %v422_v46, %v395_v29 }
 0x135   :  { %s2780_s9 = sld [smem:[#allocation80_spill]]  ;;  %s2782_s8 = sld [smem:[#allocation63_spill]]  ;;  %v529_v60 = vsub.f32 %v526_v44, %v2141_v45  ;;  %v2795_v45 = vstv %s2019_s0 }
 0x136   :  { %s2783_s5 = sld [smem:[#allocation39_spill]]  ;;  %v774_v6 = vstv %s2226_s17  ;;  %s2784_s27 = sld [smem:[#allocation64_spill]]  ;;  %v451_v0 = vadd.f32 %v450_v36, %v423_v5  ;;  %v582_v50 = vadd.f32 %v2795_v45, %v579_v59  ;;  %v724_v36 = vmul.f32 0.6931472, %v2284_v3 }
 0x137   :  { %s2282_s21 = sld [smem:[#allocation12 + $0x19]]  ;;  %s783_s28 = smul.f32 0.5, %s2244_s7  ;;  %v800_v55 = vstv %s2246_s16 }
 0x138   :  { %v777_v35 = vstv %s2239_s30  ;;  %s2306_s18 = sld [smem:[#allocation13 + $0x19]]  ;;  %s2314_s22 = sld [smem:[#allocation12 + $0x1b]]  ;;  %1283 = vlog2.f32 %v800_v55  ;;  %v585_v5 = vsub.f32 %v582_v50, %v2186_v10 }
 0x139   :  { %v802_v47 = vstv %s2255_s19  ;;  %s2792_s7 = sld [smem:[#allocation66_spill]]  ;;  %v2324_v39 = vstv %s783_s28  ;;  %s2352_s2 = sld [smem:[#allocation12 + $0x1c]] }
 0x13a   :  { %s2277_s29 = sld [smem:[#allocation10 + %s2779_s3]]  ;;  %s811_s16 = smul.f32 0.5, %s2260_s20 }
 0x13b   :  { %v2786_v4 = vstv %s2780_s9  ;;  %s2291_s15 = sld [smem:[#allocation9 + %s2782_s8]] }
 0x13c   :  { %v470_v37 = vadd.f32 %v2786_v4, %v467_v22  ;;  %v2787_v52 = vstv %s2783_s5  ;;  %s2298_s11 = sld [smem:[#allocation10 + %s2784_s27]]  ;;  %v2793_v22 = vstv %s1997_s4 }
 0x13d   :  { %v498_v1 = vadd.f32 %v2787_v52, %v495_v51  ;;  %s2308_s3 = sld [smem:[#allocation12 + $0x1a]]  ;;  %s2789_s9 = sld [smem:[#allocation65_spill]]  ;;  %v554_v63 = vadd.f32 %v2793_v22, %v551_v42  ;;  %v602_v51 = vpop.xlane.xlu1 %601  ;;  %v828_v29 = vstv %s2282_s21  ;;  %v589_v42 = vmul.f32 %v2121_v14, %v585_v5 }
 0x13e   :  { %v473_v9 = vsub.f32 %v470_v37, %v2100_v24  ;;  %v1280_v24 = vpop.eup %1279  ;;  %s2329_s20 = sld [smem:[#allocation13 + $0x1a]]  ;;  %v607_v4 = vadd.f32 %v606_v2, %v602_v51  ;;  %v2338_v37 = vstv %s811_s16  ;;  %s2356_s0 = sld [smem:[#allocation12 + $0x1d]]  ;;  %1285 = vlog2.f32 %v828_v29 }
 0x13f   :  { %v501_v49 = vsub.f32 %v498_v1, %v2129_v23  ;;  %v557_v27 = vsub.f32 %v554_v63, %v2175_v34  ;;  %s2342_s12 = sld [smem:[#allocation10 + %s2792_s7]]  ;;  %v533_v1 = vmul.f32 %v2084_v62, %v529_v60  ;;  %v1282_v38 = vpop.eup %1281  ;;  %s839_s1 = smul.f32 0.5, %s2306_s18  ;;  %v590_v63 = vmul.f32 %v589_v42, %v585_v5 }
 0x140   :  { %v477_v33 = vmul.f32 %v2061_v20, %v473_v9  ;;  %v610_v34 = vadd.f32 %v609_v7, %v607_v4  ;;  %s2796_s4 = sld [smem:[#allocation67_spill]]  ;;  %v630_v7 = vpop.xlane.xlu0 %629  ;;  %s2799_s5 = sld [smem:[#allocation68_spill]] }
 0x141   :  { %v505_v23 = vmul.f32 %v2074_v40, %v501_v49  ;;  %v805_v40 = vstv %s2277_s29  ;;  %v561_v55 = vmul.f32 %v2111_v53, %v557_v27  ;;  %v830_v2 = vstv %s2291_s15  ;;  %v658_v44 = vpop.xlane.xlu1 %657  ;;  %s2373_s21 = sld [smem:[#allocation12 + $0x1e]]  ;;  %s2803_s10 = sld [smem:[#allocation69_spill]] }
 0x142   :  { %v478_v20 = vmul.f32 %v477_v33, %v473_v9  ;;  %v833_v9 = vstv %s2298_s11  ;;  %v534_v8 = vmul.f32 %v533_v1, %v529_v60  ;;  %v613_v53 = vsub.f32 %v610_v34, %v2234_v25  ;;  %s2388_s18 = sld [smem:[#allocation13 + $0x1b]]  ;;  %s2805_s26 = sld [smem:[#allocation70_spill]] }
 0x143   :  { %s2327_s6 = sld [smem:[#allocation9 + %s2789_s9]]  ;;  %v506_v52 = vmul.f32 %v505_v23, %v501_v49  ;;  %v856_v62 = vstv %s2308_s3  ;;  %v884_v49 = vstv %s2314_s22  ;;  %v562_v10 = vmul.f32 %v561_v55, %v557_v27  ;;  %v1284_v23 = vpop.eup %1283 }
 0x144   :  { %v479_v46 = vadd.f32 %v478_v20, %v451_v0  ;;  %v2798_v33 = vstv %s2066_s23  ;;  %v617_v25 = vmul.f32 %v2143_v12, %v613_v53  ;;  %v663_v3 = vadd.f32 %v662_v58, %v658_v44  ;;  %s867_s27 = smul.f32 0.5, %s2329_s20  ;;  %v686_v54 = vpop.xlane.xlu0 %685  ;;  %s2390_s3 = sld [smem:[#allocation12 + $0x1f]] }
 0x145   :  { %v635_v56 = vadd.f32 %v2798_v33, %v630_v7  ;;  %1287 = vlog2.f32 %v856_v62  ;;  %v752_v20 = vmul.f32 0.6931472, %v1280_v24  ;;  %v2379_v12 = vstv %s839_s1  ;;  %v714_v24 = vpop.xlane.xlu1 %713  ;;  %s2806_s16 = sld [smem:[#allocation71_spill]]  ;;  %s2807_s22 = sld [smem:[#allocation72_spill]] }
 0x146   :  { %v507_v61 = vadd.f32 %v506_v52, %v479_v46  ;;  %s2363_s24 = sld [smem:[#allocation9 + %s2796_s4]]  ;;  %v666_v60 = vadd.f32 %v665_v16, %v663_v3  ;;  %v861_v58 = vstv %s2342_s12  ;;  %1289 = vlog2.f32 %v884_v49  ;;  %s1437_s23 = smov [#allocation16]  }
 0x147   :  { %v638_v14 = vadd.f32 %v2800_v32, %v635_v56  ;;  %s2383_s14 = sld [smem:[#allocation10 + %s2799_s5]]  ;;  %v618_v51 = vmul.f32 %v617_v25, %v613_v53  ;;  %v691_v4 = vadd.f32 %v690_v13, %v686_v54  ;;  %v719_v29 = vadd.f32 %v718_v21, %v714_v24 }
 0x148   :  { %v535_v11 = vadd.f32 %v534_v8, %v507_v61  ;;  %v669_v16 = vsub.f32 %v666_v60, %v2303_v41  ;;  %v2395_v46 = vstv %s867_s27  ;;  %v912_v52 = vstv %s2352_s2  ;;  %v742_v34 = vpop.xlane.xlu0 %741  ;;  %s2407_s13 = sld [smem:[#allocation9 + %s2803_s10]]  ;;  %v1286_v5 = vpop.eup %1285  ;;  %s895_s25 = smul.f32 0.5, %s2388_s18 }
 0x149   :  { %v858_v0 = vstv %s2327_s6  ;;  %v641_v27 = vsub.f32 %v638_v14, %v2251_v43  ;;  %v694_v13 = vadd.f32 %v693_v31, %v691_v4  ;;  %v940_v45 = vstv %s2356_s0  ;;  %v770_v31 = vpop.xlane.xlu1 %769  ;;  %s2419_s7 = sld [smem:[#allocation10 + %s2805_s26]] }
 0x14a   :  { %v563_v22 = vadd.f32 %v562_v10, %v535_v11  ;;  %v673_v50 = vmul.f32 %v2198_v17, %v669_v16  ;;  %v722_v55 = vadd.f32 %v721_v19, %v719_v29  ;;  %v780_v41 = vmul.f32 0.6931472, %v1282_v38  ;;  %s2421_s20 = sld [smem:[#allocation13 + $0x1c]]  ;;  %s2434_s2 = sld [smem:[#allocation13 + $0x1d]] }
 0x14b   :  { %v645_v43 = vmul.f32 %v2159_v28, %v641_v27  ;;  %v697_v8 = vsub.f32 %v694_v13, %v2319_v48  ;;  %v747_v28 = vadd.f32 %v746_v57, %v742_v34  ;;  %1291 = vlog2.f32 %v912_v52  ;;  %s2428_s17 = sld [smem:[#allocation9 + %s2806_s16]] }
 0x14c   :  { %v591_v59 = vadd.f32 %v590_v63, %v563_v22  ;;  %v886_v61 = vstv %s2363_s24  ;;  %v725_v17 = vsub.f32 %v722_v55, %v724_v36  ;;  %v775_v19 = vadd.f32 %v774_v6, %v770_v31  ;;  %s2431_s4 = sld [smem:[#allocation10 + %s2807_s22]]  ;;  %v798_v42 = vpop.xlane.xlu0 %797 }
 0x14d   :  { %v646_v21 = vmul.f32 %v645_v43, %v641_v27  ;;  %1293 = vlog2.f32 %v940_v45  ;;  %v968_v38 = vstv %s2373_s21  ;;  %v674_v53 = vmul.f32 %v673_v50, %v669_v16  ;;  %s2808_s30 = sld [smem:[#allocation73_spill]]  ;;  %v826_v25 = vpop.xlane.xlu1 %825  ;;  %s2809_s0 = sld [smem:[#allocation74_spill]] }
 0x14e   :  { %v619_v1 = vadd.f32 %v618_v51, %v591_v59  ;;  %v701_v7 = vmul.f32 %v2209_v15, %v697_v8  ;;  %v750_v48 = vadd.f32 %v749_v26, %v747_v28  ;;  %v729_v36 = vmul.f32 %v2265_v18, %v725_v17  ;;  %s2810_s1 = sld [smem:[#allocation75_spill]]  ;;  %s2811_s19 = sld [smem:[#allocation76_spill]] }
 0x14f   :  { %v1288_v57 = vpop.eup %1287  ;;  %v778_v6 = vadd.f32 %v777_v35, %v775_v19  ;;  %v808_v49 = vmul.f32 0.6931472, %v1284_v23  ;;  %v889_v11 = vstv %s2383_s14  ;;  %v996_v33 = vstv %s2390_s3  ;;  %s2451_s15 = sld [smem:[#allocation13 + $0x1e]]  ;;  %s2472_s6 = sld [smem:[#allocation13 + $0x1f]] }
 0x150   :  { %v647_v62 = vadd.f32 %v646_v21, %v619_v1  ;;  %v702_v26 = vmul.f32 %v701_v7, %v697_v8  ;;  %v753_v10 = vsub.f32 %v750_v48, %v752_v20  ;;  %v1290_v18 = vpop.eup %1289  ;;  %v803_v56 = vadd.f32 %v802_v47, %v798_v42  ;;  %v854_v59 = vpop.xlane.xlu0 %853  ;;  %s923_s5 = smul.f32 0.5, %s2421_s20  ;;  %s1022_s14 = sshll.u32 %s1437_s23, 4  ;;  %s1023_s14 = int_to_ptr.vmem [resolvable:$true] %s1022_s14 }
 0x151   :  { %v781_v35 = vsub.f32 %v778_v6, %v780_v41  ;;  %v836_v44 = vmul.f32 0.6931472, %v1286_v5  ;;  %1295 = vlog2.f32 %v968_v38  ;;  %v730_v23 = vmul.f32 %v729_v36, %v725_v17  ;;  %v882_v27 = vpop.xlane.xlu1 %881  ;;  %s951_s24 = smul.f32 0.5, %s2434_s2  ;;  %s1389_s28 = scalar_lea.vmem %s1023_s14, 16 }
 0x152   :  { %v675_v15 = vadd.f32 %v674_v53, %v647_v62  ;;  %v757_v22 = vmul.f32 %v2273_v30, %v753_v10  ;;  %v831_v63 = vadd.f32 %v830_v2, %v826_v25  ;;  %v806_v14 = vadd.f32 %v805_v40, %v803_v56  ;;  %p1390_p6 = scmp.ne.s32.totalorder %s1023_s14, %s1389_s28  ;;  %s1393_s10 = scalar_lea.vmem %s1023_s14, 32 }
 0x153   :  { %v785_v32 = vmul.f32 %v2324_v39, %v781_v35  ;;  %v914_v20 = vstv %s2407_s13  ;;  %1297 = vlog2.f32 %v996_v33  ;;  %v896_v51 = vstv %s895_s25  ;;  %s2449_s8 = sld [smem:[#allocation9 + %s2808_s30]]  ;;  %p1394_p7 = scmp.lt.s32.totalorder %s1023_s14, %s1023_s14 }
 0x154   :  { %v703_v3 = vadd.f32 %v702_v26, %v675_v15  ;;  %v758_v60 = vmul.f32 %v757_v22, %v753_v10  ;;  %v834_v54 = vadd.f32 %v833_v9, %v831_v63  ;;  %v809_v30 = vsub.f32 %v806_v14, %v808_v49  ;;  %s2456_s29 = sld [smem:[#allocation10 + %s2809_s0]]  ;;  %v910_v34 = vpop.xlane.xlu0 %909  ;;  %p1395_p8 = scmp.lt.s32.totalorder %s1393_s10, %s1389_s28 }
 0x155   :  { %v864_v39 = vmul.f32 0.6931472, %v1288_v57  ;;  %v859_v40 = vadd.f32 %v858_v0, %v854_v59  ;;  %v892_v2 = vmul.f32 0.6931472, %v1290_v18  ;;  %s2459_s11 = sld [smem:[#allocation9 + %s2810_s1]]  ;;  %v1292_v9 = vpop.eup %1291  ;;  %v786_v24 = vmul.f32 %v785_v32, %v781_v35  ;;  %v938_v31 = vpop.xlane.xlu1 %937  ;;  %s979_s12 = smul.f32 0.5, %s2451_s15 }
 0x156   :  { %v731_v47 = vadd.f32 %v730_v23, %v703_v3  ;;  %v837_v16 = vsub.f32 %v834_v54, %v836_v44  ;;  %v887_v29 = vadd.f32 %v886_v61, %v882_v27  ;;  %s2465_s27 = sld [smem:[#allocation10 + %s2811_s19]]  ;;  %v813_v0 = vmul.f32 %v2338_v37, %v809_v30  ;;  %s1007_s21 = smul.f32 0.5, %s2472_s6 }
 0x157   :  { %v1294_v52 = vpop.eup %1293  ;;  %v862_v1 = vadd.f32 %v861_v58, %v859_v40  ;;  %v917_v43 = vstv %s2419_s7  ;;  %v942_v13 = vstv %s2428_s17  ;;  %v945_v41 = vstv %s2431_s4  ;;  %p1396_p9 = por %p1395_p8, %p1394_p7 }
 0x158   :  { %v759_v4 = vadd.f32 %v758_v60, %v731_v47  ;;  %v841_v50 = vmul.f32 %v2379_v12, %v837_v16  ;;  %v890_v55 = vadd.f32 %v889_v11, %v887_v29  ;;  %v814_v61 = vmul.f32 %v813_v0, %v809_v30  ;;  %v966_v18 = vpop.xlane.xlu0 %965 }
 0x159   :  { %v865_v21 = vsub.f32 %v862_v1, %v864_v39  ;;  %v920_v8 = vmul.f32 0.6931472, %v1292_v9  ;;  %v915_v28 = vadd.f32 %v914_v20, %v910_v34  ;;  %v924_v5 = vstv %s923_s5  ;;  %v994_v3 = vpop.xlane.xlu1 %993  ;;  %p1397_p10 = pnand %p1396_p9, %p1390_p6 }
 0x15a   :  { %v787_v45 = vadd.f32 %v786_v24, %v759_v4  ;;  %v893_v37 = vsub.f32 %v890_v55, %v892_v2  ;;  %v948_v58 = vmul.f32 0.6931472, %v1294_v52  ;;  %v943_v17 = vadd.f32 %v942_v13, %v938_v31 }
 0x15b   :  { %v1296_v19 = vpop.eup %1295  ;;  %v842_v12 = vmul.f32 %v841_v50, %v837_v16  ;;  %v869_v62 = vmul.f32 %v2395_v46, %v865_v21  ;;  %v918_v53 = vadd.f32 %v917_v43, %v915_v28  ;;  %v952_v48 = vstv %s951_s24  ;;  %v1012_v16 = vld [vmem:[#allocation16] sm:$0x1] }
 0x15c   :  { %v815_v38 = vadd.f32 %v814_v61, %v787_v45  ;;  %v897_v7 = vmul.f32 %v896_v51, %v893_v37  ;;  %v946_v57 = vadd.f32 %v945_v41, %v943_v17  ;;  %v970_v36 = vstv %s2449_s8 }
 0x15d   :  { %v1298_v6 = vpop.eup %1297  ;;  %v870_v11 = vmul.f32 %v869_v62, %v865_v21  ;;  %v921_v15 = vsub.f32 %v918_v53, %v920_v8  ;;  %v998_v26 = vstv %s2459_s11  ;;  %v973_v42 = vstv %s2456_s29 }
 0x15e   :  { %v843_v49 = vadd.f32 %v842_v12, %v815_v38  ;;  %v949_v10 = vsub.f32 %v946_v57, %v948_v58  ;;  %v976_v33 = vmul.f32 0.6931472, %v1296_v19  ;;  %v1001_v35 = vstv %s2465_s27 }
 0x15f   :  { %v898_v46 = vmul.f32 %v897_v7, %v893_v37  ;;  %v925_v44 = vmul.f32 %v924_v5, %v921_v15  ;;  %v971_v25 = vadd.f32 %v970_v36, %v966_v18  ;;  %v1004_v22 = vmul.f32 0.6931472, %v1298_v6 }
 0x160   :  { %v871_v56 = vadd.f32 %v870_v11, %v843_v49  ;;  %v953_v23 = vmul.f32 %v952_v48, %v949_v10  ;;  %v999_v63 = vadd.f32 %v998_v26, %v994_v3  ;;  %v980_v47 = vstv %s979_s12 }
 0x161   :  { %v926_v14 = vmul.f32 %v925_v44, %v921_v15  ;;  %v974_v20 = vadd.f32 %v973_v42, %v971_v25  ;;  %v1008_v30 = vstv %s1007_s21 }
 0x162   :  { %v899_v32 = vadd.f32 %v898_v46, %v871_v56  ;;  %v1002_v60 = vadd.f32 %v1001_v35, %v999_v63  ;;  %v954_v59 = vmul.f32 %v953_v23, %v949_v10 }
 0x163   :  { %v977_v51 = vsub.f32 %v974_v20, %v976_v33 }
 0x164   :  { %v927_v54 = vadd.f32 %v926_v14, %v899_v32  ;;  %v1005_v39 = vsub.f32 %v1002_v60, %v1004_v22 }
 0x165   :  { %v981_v2 = vmul.f32 %v980_v47, %v977_v51 }
 0x166   :  { %v955_v40 = vadd.f32 %v954_v59, %v927_v54  ;;  %v1009_v27 = vmul.f32 %v1008_v30, %v1005_v39 }
 0x167   :  { %v982_v9 = vmul.f32 %v981_v2, %v977_v51 }
 0x168   :  { %v1010_v24 = vmul.f32 %v1009_v27, %v1005_v39 }
 0x169   :  { %v983_v4 = vadd.f32 %v982_v9, %v955_v40 }
 0x16b   :  { %v1011_v29 = vadd.f32 %v1010_v24, %v983_v4 }
 0x16d   :  { %v1013_v52 = vadd.f32 %v1012_v16, %v1011_v29 }
 0x16f   :  { %1015 = vst.msk [vmem:[#allocation16] sm:$0x1] %vm113_vm1, %v1013_v52 }
 0x170   :  { %1400 = shalt.err (!%p1397_p10)
}
 0x171   :  { %s2812_s9 = sld [smem:[#allocation90_spill]] }
 0x177   :  { %s1401_s26 = scalar_lea.hbm %s2812_s9, 16 }
 0x178   :  { %p1402_p11 = scmp.ne.s32.totalorder %s2812_s9, %s1401_s26  ;;  %p1405_p12 = scmp.lt.u32.totalorder %s1401_s26, %s2812_s9 }
 0x17a   :  { %p1407_p13 = pnand %p1405_p12, %p1402_p11 }
 0x17c   :  { %1410 = shalt.err (!%p1407_p13)
}
 0x17d   :  { %1025 = dma.vmem_to_hbm [thread:$0]  %s1023_s14, 16, %s2812_s9, [#allocation4]  }
 0x17e   :  { %1425 = dma.done.wait [#allocation4], 16  }
 0x17f   :  { %1426 = vsyncadd [#allocation4], 4294967280 }
 0x180   :  { %1029 = vsyncpa [#allocation3], 1 }
 0x181   :  { %1030 = vsyncpa [#allocation4], 1 }
 0x182   :  { %1031 = vsyncpa [#allocation5], 1 }
 0x183   :  { %1032 = vsyncpa [#allocation11], 1 }
 0x184   :  { %1033 = vsyncpa [#allocation6], 1 }
 0x185   :  { %1034 = vsyncpa [#allocation8], 1 }
 0x186   :  { %1035 = vsyncpa [#allocation14], 1 }

</bundles_post_ra>
